<compile_context>
chip_gen: v6e
topology: v6e:2x2x1
jax: 0.10.0
libtpu: 0.0.40
codegen_flags: <defaults>
</compile_context>

<pallas_src>
import jax
import jax.numpy as jnp
from jax import lax
from jax.experimental import pallas as pl
from jax.experimental.pallas import tpu as pltpu

# --- small arch consistent with the module -----------------------------------
B, T = 8, 8          # batch, sequence length
INP = 16             # arch['inp_size']
NH = 32              # arch['n_hidden']
NLAT = 32            # arch['nlat']
NLAYERS = 2          # arch['n_layers'] (hard-coded to 2 in the kernel signature)


def articles_kernel(x_ref, wc_ref, bc_ref,
                    wih0_ref, whh0_ref, bih0_ref, bhh0_ref,
                    wih1_ref, whh1_ref, bih1_ref, bhh1_ref,
                    wdec_ref, bdec_ref,
                    out_ref,
                    g0_tmp, gxr_s, gxz_s, gxn_s):
    """Whole forward pass in one kernel (everything resident in VMEM)."""
    H = NLAT
    f32 = jnp.float32

    # --- convert_input: ReLU(x @ Wc + bc), all timesteps in one MXU call -----
    x2d = x_ref[...].reshape(B * T, INP)                     # batch-major rows
    h0 = jnp.maximum(
        jnp.dot(x2d, wc_ref[...], preferred_element_type=f32) + bc_ref[...],
        0.0)                                                 # (B*T, NH)

    # --- layer-0 input-gate projection hoisted out of the time loop ----------
    # one (B*T x NH) @ (NH x 3H) matmul, bih0 folded in
    g0_tmp[...] = (jnp.dot(h0, wih0_ref[...], preferred_element_type=f32)
                   + bih0_ref[...]).reshape(B, T, 3 * H)

    # one-time reorder to time-major + pre-split r/z/n, so the serial loop only
    # does a leading-index load per step (no per-step lane slicing of gx)
    for t in range(T):
        gt = g0_tmp[:, t, :]                                 # (B, 3H)
        gxr_s[t] = gt[:, :H]
        gxz_s[t] = gt[:, H:2 * H]
        gxn_s[t] = gt[:, 2 * H:]

    whh0 = whh0_ref[...]; bhh0 = bhh0_ref[...]
    wih1 = wih1_ref[...]; whh1 = whh1_ref[...]
    bih1 = bih1_ref[...]; bhh1 = bhh1_ref[...]

    # PyTorch GRU gate order (r, z, n); note b_hn stays inside r * (.) term.
    def step_l0(s, h):
        # only the recurrent half is in the loop; input half comes from scratch
        gh = jnp.dot(h, whh0, preferred_element_type=f32) + bhh0    # (B, 3H)
        r = jax.nn.sigmoid(gxr_s[s] + gh[:, :H])
        z = jax.nn.sigmoid(gxz_s[s] + gh[:, H:2 * H])
        n = jnp.tanh(gxn_s[s] + r * gh[:, 2 * H:])
        return n + z * (h - n)

    def step_l1(x_in, h):
        gx = jnp.dot(x_in, wih1, preferred_element_type=f32) + bih1
        gh = jnp.dot(h, whh1, preferred_element_type=f32) + bhh1
        r = jax.nn.sigmoid(gx[:, :H] + gh[:, :H])
        z = jax.nn.sigmoid(gx[:, H:2 * H] + gh[:, H:2 * H])
        n = jnp.tanh(gx[:, 2 * H:] + r * gh[:, 2 * H:])
        return n + z * (h - n)

    zeros = jnp.zeros((B, H), f32)

    # --- skewed two-layer recurrence: layer-1 step s-1 runs alongside layer-0
    #     step s (independent work -> ILP), serial chain ~T+1 steps not 2*T.
    hA = step_l0(0, zeros)          # layer-0, t = 0
    hB = zeros                      # layer-1 initial hidden

    def body(s, carry):
        hA, hB = carry
        hB_new = step_l1(hA, hB)    # layer-1, t = s-1 (uses previous hA)
        hA_new = step_l0(s, hA)     # layer-0, t = s
        return (hA_new, hB_new)

    hA, hB = lax.fori_loop(1, T, body, (hA, hB), unroll=True)
    h_last = step_l1(hA, hB)        # layer-1, t = T-1

    # --- decoder on last timestep of last layer ------------------------------
    out_ref[...] = (jnp.dot(h_last, wdec_ref[...], preferred_element_type=f32)
                    + bdec_ref[...])


def articles_to_vec(x_btf, p):
    """x_btf: (B, T, INP) float32 (PyTorch batch_first). Returns (B, NH)."""
    args = (x_btf,
            p['wc_t'], p['bc'],
            p['wih0_t'], p['whh0_t'], p['bih0'], p['bhh0'],
            p['wih1_t'], p['whh1_t'], p['bih1'], p['bhh1'],
            p['wdec_t'], p['bdec'])
    return pl.pallas_call(
        articles_kernel,
        out_shape=jax.ShapeDtypeStruct((B, NH), jnp.float32),
        # gridless single invocation: whole (tiny) arrays resident in VMEM
        scratch_shapes=[
            pltpu.VMEM((B, T, 3 * NLAT), jnp.float32),   # staged layer-0 gate proj
            pltpu.VMEM((T, B, NLAT), jnp.float32),       # gx_r, time-major
            pltpu.VMEM((T, B, NLAT), jnp.float32),       # gx_z, time-major
            pltpu.VMEM((T, B, NLAT), jnp.float32),       # gx_n, time-major
        ],
    )(*args)


# --- deterministic parameter construction (PyTorch-style uniform init) --------
def init_params(key):
    ks = jax.random.split(key, 12)

    def unif(k, shape, fan_in):
        bound = 1.0 / jnp.sqrt(jnp.float32(fan_in))
        return jax.random.uniform(k, shape, jnp.float32, -bound, bound)

    def weight_norm(v):
        # weight_norm(Linear) with dim=0: w = g * v / ||v||_row ; default init g=||v||
        norm = jnp.sqrt(jnp.sum(v * v, axis=1, keepdims=True))
        g = norm
        return g * v / norm

    # convert_input: weight_norm(Linear(INP, NH)) + ReLU
    wc = weight_norm(unif(ks[0], (NH, INP), INP));  bc = unif(ks[1], (NH,), INP)
    # decoder: weight_norm(Linear(NLAT, NH))
    wdec = weight_norm(unif(ks[2], (NH, NLAT), NLAT)); bdec = unif(ks[3], (NH,), NLAT)
    # GRU: weight_ih_l0 (3*NLAT, NH), weight_hh_l0 (3*NLAT, NLAT), layer 1 input = NLAT
    wih0 = unif(ks[4], (3 * NLAT, NH), NLAT);   whh0 = unif(ks[5], (3 * NLAT, NLAT), NLAT)
    bih0 = unif(ks[6], (3 * NLAT,), NLAT);      bhh0 = unif(ks[7], (3 * NLAT,), NLAT)
    wih1 = unif(ks[8], (3 * NLAT, NLAT), NLAT); whh1 = unif(ks[9], (3 * NLAT, NLAT), NLAT)
    bih1 = unif(ks[10], (3 * NLAT,), NLAT);     bhh1 = unif(ks[11], (3 * NLAT,), NLAT)

    return dict(
        wc_t=wc.T, bc=bc[None, :],
        wdec_t=wdec.T, bdec=bdec[None, :],
        wih0_t=wih0.T, whh0_t=whh0.T, bih0=bih0[None, :], bhh0=bhh0[None, :],
        wih1_t=wih1.T, whh1_t=whh1.T, bih1=bih1[None, :], bhh1=bhh1[None, :],
    )


# --- pure-JAX reference for correctness check ---------------------------------
def reference(x, p):
    h = jnp.maximum(x @ p['wc_t'] + p['bc'][0], 0.0)      # (B, T, NH)

    def run_layer(seq, wih_t, whh_t, bih, bhh):
        H = NLAT

        def step(hprev, x_t):
            gx = x_t @ wih_t + bih[0]
            gh = hprev @ whh_t + bhh[0]
            r = jax.nn.sigmoid(gx[:, :H] + gh[:, :H])
            z = jax.nn.sigmoid(gx[:, H:2 * H] + gh[:, H:2 * H])
            n = jnp.tanh(gx[:, 2 * H:] + r * gh[:, 2 * H:])
            hn = (1.0 - z) * n + z * hprev
            return hn, hn

        h0 = jnp.zeros((seq.shape[0], H), jnp.float32)
        _, ys = lax.scan(step, h0, jnp.transpose(seq, (1, 0, 2)))
        return jnp.transpose(ys, (1, 0, 2))

    o = run_layer(h, p['wih0_t'], p['whh0_t'], p['bih0'], p['bhh0'])
    o = run_layer(o, p['wih1_t'], p['whh1_t'], p['bih1'], p['bhh1'])
    return o[:, -1, :] @ p['wdec_t'] + p['bdec'][0]


if __name__ == "__main__":
    key = jax.random.PRNGKey(0)
    kx, kp = jax.random.split(key)
    x = jax.random.normal(kx, (B, T, INP), jnp.float32)
    params = init_params(kp)

    out = articles_to_vec(x, params)
    jax.block_until_ready(out)

    ref = reference(x, params)
    assert out.shape == (B, NH), out.shape
    err = float(jnp.max(jnp.abs(out - ref)))
    assert jnp.allclose(out, ref, atol=2e-3, rtol=2e-3), f"max abs err {err}"
    print("KERNEL_OK")
</pallas_src>

<mosaic_0001>
module attributes {stable_mosaic.version = 11 : i64} {
  func.func @articles_kernel(%arg0: memref<8x8x16xf32, #tpu.memory_space<vmem>>, %arg1: memref<16x32xf32, #tpu.memory_space<vmem>>, %arg2: memref<1x32xf32, #tpu.memory_space<vmem>>, %arg3: memref<32x96xf32, #tpu.memory_space<vmem>>, %arg4: memref<32x96xf32, #tpu.memory_space<vmem>>, %arg5: memref<1x96xf32, #tpu.memory_space<vmem>>, %arg6: memref<1x96xf32, #tpu.memory_space<vmem>>, %arg7: memref<32x96xf32, #tpu.memory_space<vmem>>, %arg8: memref<32x96xf32, #tpu.memory_space<vmem>>, %arg9: memref<1x96xf32, #tpu.memory_space<vmem>>, %arg10: memref<1x96xf32, #tpu.memory_space<vmem>>, %arg11: memref<32x32xf32, #tpu.memory_space<vmem>>, %arg12: memref<1x32xf32, #tpu.memory_space<vmem>>, %arg13: memref<8x32xf32, #tpu.memory_space<vmem>>, %arg14: memref<8x8x96xf32, #tpu.memory_space<vmem>>, %arg15: memref<8x8x32xf32, #tpu.memory_space<vmem>>, %arg16: memref<8x8x32xf32, #tpu.memory_space<vmem>>, %arg17: memref<8x8x32xf32, #tpu.memory_space<vmem>>) attributes {dimension_semantics = [], scalar_prefetch = 0 : i64, scratch_operands = 4 : i64, tpu.core_type = #tpu.core_type<tc>} {
    %c0 = arith.constant 0 : index
    %c0_0 = arith.constant 0 : index
    %c0_1 = arith.constant 0 : index
    %0 = vector.load %arg0[%c0, %c0_0, %c0_1] : memref<8x8x16xf32, #tpu.memory_space<vmem>>, vector<8x8x16xf32>
    %1 = vector.shape_cast %0 : vector<8x8x16xf32> to vector<64x16xf32>
    %c0_2 = arith.constant 0 : index
    %c0_3 = arith.constant 0 : index
    %2 = vector.load %arg1[%c0_2, %c0_3] : memref<16x32xf32, #tpu.memory_space<vmem>>, vector<16x32xf32>
    %cst = arith.constant dense<0.000000e+00> : vector<64x32xf32>
    %3 = tpu.matmul %1, %2, %cst {dimension_numbers = #tpu.dot_dimension_numbers<[1], [0], [0], [1], [0, 0, 1, 1], [], []>} : vector<64x16xf32>, vector<16x32xf32>, vector<64x32xf32> -> vector<64x32xf32>
    %c0_4 = arith.constant 0 : index
    %c0_5 = arith.constant 0 : index
    %4 = vector.load %arg2[%c0_4, %c0_5] : memref<1x32xf32, #tpu.memory_space<vmem>>, vector<1x32xf32>
    %5 = vector.broadcast %4 : vector<1x32xf32> to vector<64x32xf32>
    %6 = arith.addf %3, %5 : vector<64x32xf32>
    %cst_6 = arith.constant 0.000000e+00 : f32
    %7 = vector.broadcast %cst_6 : f32 to vector<64x32xf32>
    %8 = arith.maximumf %6, %7 : vector<64x32xf32>
    %c0_7 = arith.constant 0 : index
    %c0_8 = arith.constant 0 : index
    %9 = vector.load %arg3[%c0_7, %c0_8] : memref<32x96xf32, #tpu.memory_space<vmem>>, vector<32x96xf32>
    %cst_9 = arith.constant dense<0.000000e+00> : vector<64x96xf32>
    %10 = tpu.matmul %8, %9, %cst_9 {dimension_numbers = #tpu.dot_dimension_numbers<[1], [0], [0], [1], [0, 0, 1, 1], [], []>} : vector<64x32xf32>, vector<32x96xf32>, vector<64x96xf32> -> vector<64x96xf32>
    %c0_10 = arith.constant 0 : index
    %c0_11 = arith.constant 0 : index
    %11 = vector.load %arg5[%c0_10, %c0_11] : memref<1x96xf32, #tpu.memory_space<vmem>>, vector<1x96xf32>
    %12 = vector.broadcast %11 : vector<1x96xf32> to vector<64x96xf32>
    %13 = arith.addf %10, %12 : vector<64x96xf32>
    %14 = vector.shape_cast %13 : vector<64x96xf32> to vector<8x8x96xf32>
    %c0_12 = arith.constant 0 : index
    %c0_13 = arith.constant 0 : index
    %c0_14 = arith.constant 0 : index
    %15 = vector.load %arg14[%c0_12, %c0_13, %c0_14] : memref<8x8x96xf32, #tpu.memory_space<vmem>>, vector<8x8x96xf32>
    tpu.vector_store %arg14[%c0_12, %c0_13, %c0_14], %14 {strides = array<i32>} : memref<8x8x96xf32, #tpu.memory_space<vmem>>, vector<8x8x96xf32>,
    %c0_15 = arith.constant 0 : index
    %c0_16 = arith.constant 0 : index
    %c0_17 = arith.constant 0 : index
    %16 = vector.load %arg14[%c0_15, %c0_16, %c0_17] : memref<8x8x96xf32, #tpu.memory_space<vmem>>, vector<8x1x96xf32>
    %17 = vector.shape_cast %16 : vector<8x1x96xf32> to vector<8x96xf32>
    %18 = vector.extract_strided_slice %17 {offsets = [0, 0], sizes = [8, 32], strides = [1, 1]} : vector<8x96xf32> to vector<8x32xf32>
    %c0_18 = arith.constant 0 : index
    %c0_19 = arith.constant 0 : index
    %c0_20 = arith.constant 0 : index
    %19 = vector.load %arg15[%c0_18, %c0_19, %c0_20] : memref<8x8x32xf32, #tpu.memory_space<vmem>>, vector<1x8x32xf32>
    %20 = vector.shape_cast %19 : vector<1x8x32xf32> to vector<8x32xf32>
    %21 = vector.shape_cast %18 : vector<8x32xf32> to vector<1x8x32xf32>
    tpu.vector_store %arg15[%c0_18, %c0_19, %c0_20], %21 {strides = array<i32>} : memref<8x8x32xf32, #tpu.memory_space<vmem>>, vector<1x8x32xf32>,
    %22 = vector.extract_strided_slice %17 {offsets = [0, 32], sizes = [8, 32], strides = [1, 1]} : vector<8x96xf32> to vector<8x32xf32>
    %c0_21 = arith.constant 0 : index
    %c0_22 = arith.constant 0 : index
    %c0_23 = arith.constant 0 : index
    %23 = vector.load %arg16[%c0_21, %c0_22, %c0_23] : memref<8x8x32xf32, #tpu.memory_space<vmem>>, vector<1x8x32xf32>
    %24 = vector.shape_cast %23 : vector<1x8x32xf32> to vector<8x32xf32>
    %25 = vector.shape_cast %22 : vector<8x32xf32> to vector<1x8x32xf32>
    tpu.vector_store %arg16[%c0_21, %c0_22, %c0_23], %25 {strides = array<i32>} : memref<8x8x32xf32, #tpu.memory_space<vmem>>, vector<1x8x32xf32>,
    %26 = vector.extract_strided_slice %17 {offsets = [0, 64], sizes = [8, 32], strides = [1, 1]} : vector<8x96xf32> to vector<8x32xf32>
    %c0_24 = arith.constant 0 : index
    %c0_25 = arith.constant 0 : index
    %c0_26 = arith.constant 0 : index
    %27 = vector.load %arg17[%c0_24, %c0_25, %c0_26] : memref<8x8x32xf32, #tpu.memory_space<vmem>>, vector<1x8x32xf32>
    %28 = vector.shape_cast %27 : vector<1x8x32xf32> to vector<8x32xf32>
    %29 = vector.shape_cast %26 : vector<8x32xf32> to vector<1x8x32xf32>
    tpu.vector_store %arg17[%c0_24, %c0_25, %c0_26], %29 {strides = array<i32>} : memref<8x8x32xf32, #tpu.memory_space<vmem>>, vector<1x8x32xf32>,
    %c0_27 = arith.constant 0 : index
    %c1 = arith.constant 1 : index
    %c0_28 = arith.constant 0 : index
    %30 = vector.load %arg14[%c0_27, %c1, %c0_28] : memref<8x8x96xf32, #tpu.memory_space<vmem>>, vector<8x1x96xf32>
    %31 = vector.shape_cast %30 : vector<8x1x96xf32> to vector<8x96xf32>
    %32 = vector.extract_strided_slice %31 {offsets = [0, 0], sizes = [8, 32], strides = [1, 1]} : vector<8x96xf32> to vector<8x32xf32>
    %c1_29 = arith.constant 1 : index
    %c0_30 = arith.constant 0 : index
    %c0_31 = arith.constant 0 : index
    %33 = vector.load %arg15[%c1_29, %c0_30, %c0_31] : memref<8x8x32xf32, #tpu.memory_space<vmem>>, vector<1x8x32xf32>
    %34 = vector.shape_cast %33 : vector<1x8x32xf32> to vector<8x32xf32>
    %35 = vector.shape_cast %32 : vector<8x32xf32> to vector<1x8x32xf32>
    tpu.vector_store %arg15[%c1_29, %c0_30, %c0_31], %35 {strides = array<i32>} : memref<8x8x32xf32, #tpu.memory_space<vmem>>, vector<1x8x32xf32>,
    %36 = vector.extract_strided_slice %31 {offsets = [0, 32], sizes = [8, 32], strides = [1, 1]} : vector<8x96xf32> to vector<8x32xf32>
    %c1_32 = arith.constant 1 : index
    %c0_33 = arith.constant 0 : index
    %c0_34 = arith.constant 0 : index
    %37 = vector.load %arg16[%c1_32, %c0_33, %c0_34] : memref<8x8x32xf32, #tpu.memory_space<vmem>>, vector<1x8x32xf32>
    %38 = vector.shape_cast %37 : vector<1x8x32xf32> to vector<8x32xf32>
    %39 = vector.shape_cast %36 : vector<8x32xf32> to vector<1x8x32xf32>
    tpu.vector_store %arg16[%c1_32, %c0_33, %c0_34], %39 {strides = array<i32>} : memref<8x8x32xf32, #tpu.memory_space<vmem>>, vector<1x8x32xf32>,
    %40 = vector.extract_strided_slice %31 {offsets = [0, 64], sizes = [8, 32], strides = [1, 1]} : vector<8x96xf32> to vector<8x32xf32>
    %c1_35 = arith.constant 1 : index
    %c0_36 = arith.constant 0 : index
    %c0_37 = arith.constant 0 : index
    %41 = vector.load %arg17[%c1_35, %c0_36, %c0_37] : memref<8x8x32xf32, #tpu.memory_space<vmem>>, vector<1x8x32xf32>
    %42 = vector.shape_cast %41 : vector<1x8x32xf32> to vector<8x32xf32>
    %43 = vector.shape_cast %40 : vector<8x32xf32> to vector<1x8x32xf32>
    tpu.vector_store %arg17[%c1_35, %c0_36, %c0_37], %43 {strides = array<i32>} : memref<8x8x32xf32, #tpu.memory_space<vmem>>, vector<1x8x32xf32>,
    %c0_38 = arith.constant 0 : index
    %c2 = arith.constant 2 : index
    %c0_39 = arith.constant 0 : index
    %44 = vector.load %arg14[%c0_38, %c2, %c0_39] : memref<8x8x96xf32, #tpu.memory_space<vmem>>, vector<8x1x96xf32>
    %45 = vector.shape_cast %44 : vector<8x1x96xf32> to vector<8x96xf32>
    %46 = vector.extract_strided_slice %45 {offsets = [0, 0], sizes = [8, 32], strides = [1, 1]} : vector<8x96xf32> to vector<8x32xf32>
    %c2_40 = arith.constant 2 : index
    %c0_41 = arith.constant 0 : index
    %c0_42 = arith.constant 0 : index
    %47 = vector.load %arg15[%c2_40, %c0_41, %c0_42] : memref<8x8x32xf32, #tpu.memory_space<vmem>>, vector<1x8x32xf32>
    %48 = vector.shape_cast %47 : vector<1x8x32xf32> to vector<8x32xf32>
    %49 = vector.shape_cast %46 : vector<8x32xf32> to vector<1x8x32xf32>
    tpu.vector_store %arg15[%c2_40, %c0_41, %c0_42], %49 {strides = array<i32>} : memref<8x8x32xf32, #tpu.memory_space<vmem>>, vector<1x8x32xf32>,
    %50 = vector.extract_strided_slice %45 {offsets = [0, 32], sizes = [8, 32], strides = [1, 1]} : vector<8x96xf32> to vector<8x32xf32>
    %c2_43 = arith.constant 2 : index
    %c0_44 = arith.constant 0 : index
    %c0_45 = arith.constant 0 : index
    %51 = vector.load %arg16[%c2_43, %c0_44, %c0_45] : memref<8x8x32xf32, #tpu.memory_space<vmem>>, vector<1x8x32xf32>
    %52 = vector.shape_cast %51 : vector<1x8x32xf32> to vector<8x32xf32>
    %53 = vector.shape_cast %50 : vector<8x32xf32> to vector<1x8x32xf32>
    tpu.vector_store %arg16[%c2_43, %c0_44, %c0_45], %53 {strides = array<i32>} : memref<8x8x32xf32, #tpu.memory_space<vmem>>, vector<1x8x32xf32>,
    %54 = vector.extract_strided_slice %45 {offsets = [0, 64], sizes = [8, 32], strides = [1, 1]} : vector<8x96xf32> to vector<8x32xf32>
    %c2_46 = arith.constant 2 : index
    %c0_47 = arith.constant 0 : index
    %c0_48 = arith.constant 0 : index
    %55 = vector.load %arg17[%c2_46, %c0_47, %c0_48] : memref<8x8x32xf32, #tpu.memory_space<vmem>>, vector<1x8x32xf32>
    %56 = vector.shape_cast %55 : vector<1x8x32xf32> to vector<8x32xf32>
    %57 = vector.shape_cast %54 : vector<8x32xf32> to vector<1x8x32xf32>
    tpu.vector_store %arg17[%c2_46, %c0_47, %c0_48], %57 {strides = array<i32>} : memref<8x8x32xf32, #tpu.memory_space<vmem>>, vector<1x8x32xf32>,
    %c0_49 = arith.constant 0 : index
    %c3 = arith.constant 3 : index
    %c0_50 = arith.constant 0 : index
    %58 = vector.load %arg14[%c0_49, %c3, %c0_50] : memref<8x8x96xf32, #tpu.memory_space<vmem>>, vector<8x1x96xf32>
    %59 = vector.shape_cast %58 : vector<8x1x96xf32> to vector<8x96xf32>
    %60 = vector.extract_strided_slice %59 {offsets = [0, 0], sizes = [8, 32], strides = [1, 1]} : vector<8x96xf32> to vector<8x32xf32>
    %c3_51 = arith.constant 3 : index
    %c0_52 = arith.constant 0 : index
    %c0_53 = arith.constant 0 : index
    %61 = vector.load %arg15[%c3_51, %c0_52, %c0_53] : memref<8x8x32xf32, #tpu.memory_space<vmem>>, vector<1x8x32xf32>
    %62 = vector.shape_cast %61 : vector<1x8x32xf32> to vector<8x32xf32>
    %63 = vector.shape_cast %60 : vector<8x32xf32> to vector<1x8x32xf32>
    tpu.vector_store %arg15[%c3_51, %c0_52, %c0_53], %63 {strides = array<i32>} : memref<8x8x32xf32, #tpu.memory_space<vmem>>, vector<1x8x32xf32>,
    %64 = vector.extract_strided_slice %59 {offsets = [0, 32], sizes = [8, 32], strides = [1, 1]} : vector<8x96xf32> to vector<8x32xf32>
    %c3_54 = arith.constant 3 : index
    %c0_55 = arith.constant 0 : index
    %c0_56 = arith.constant 0 : index
    %65 = vector.load %arg16[%c3_54, %c0_55, %c0_56] : memref<8x8x32xf32, #tpu.memory_space<vmem>>, vector<1x8x32xf32>
    %66 = vector.shape_cast %65 : vector<1x8x32xf32> to vector<8x32xf32>
    %67 = vector.shape_cast %64 : vector<8x32xf32> to vector<1x8x32xf32>
    tpu.vector_store %arg16[%c3_54, %c0_55, %c0_56], %67 {strides = array<i32>} : memref<8x8x32xf32, #tpu.memory_space<vmem>>, vector<1x8x32xf32>,
    %68 = vector.extract_strided_slice %59 {offsets = [0, 64], sizes = [8, 32], strides = [1, 1]} : vector<8x96xf32> to vector<8x32xf32>
    %c3_57 = arith.constant 3 : index
    %c0_58 = arith.constant 0 : index
    %c0_59 = arith.constant 0 : index
    %69 = vector.load %arg17[%c3_57, %c0_58, %c0_59] : memref<8x8x32xf32, #tpu.memory_space<vmem>>, vector<1x8x32xf32>
    %70 = vector.shape_cast %69 : vector<1x8x32xf32> to vector<8x32xf32>
    %71 = vector.shape_cast %68 : vector<8x32xf32> to vector<1x8x32xf32>
    tpu.vector_store %arg17[%c3_57, %c0_58, %c0_59], %71 {strides = array<i32>} : memref<8x8x32xf32, #tpu.memory_space<vmem>>, vector<1x8x32xf32>,
    %c0_60 = arith.constant 0 : index
    %c4 = arith.constant 4 : index
    %c0_61 = arith.constant 0 : index
    %72 = vector.load %arg14[%c0_60, %c4, %c0_61] : memref<8x8x96xf32, #tpu.memory_space<vmem>>, vector<8x1x96xf32>
    %73 = vector.shape_cast %72 : vector<8x1x96xf32> to vector<8x96xf32>
    %74 = vector.extract_strided_slice %73 {offsets = [0, 0], sizes = [8, 32], strides = [1, 1]} : vector<8x96xf32> to vector<8x32xf32>
    %c4_62 = arith.constant 4 : index
    %c0_63 = arith.constant 0 : index
    %c0_64 = arith.constant 0 : index
    %75 = vector.load %arg15[%c4_62, %c0_63, %c0_64] : memref<8x8x32xf32, #tpu.memory_space<vmem>>, vector<1x8x32xf32>
    %76 = vector.shape_cast %75 : vector<1x8x32xf32> to vector<8x32xf32>
    %77 = vector.shape_cast %74 : vector<8x32xf32> to vector<1x8x32xf32>
    tpu.vector_store %arg15[%c4_62, %c0_63, %c0_64], %77 {strides = array<i32>} : memref<8x8x32xf32, #tpu.memory_space<vmem>>, vector<1x8x32xf32>,
    %78 = vector.extract_strided_slice %73 {offsets = [0, 32], sizes = [8, 32], strides = [1, 1]} : vector<8x96xf32> to vector<8x32xf32>
    %c4_65 = arith.constant 4 : index
    %c0_66 = arith.constant 0 : index
    %c0_67 = arith.constant 0 : index
    %79 = vector.load %arg16[%c4_65, %c0_66, %c0_67] : memref<8x8x32xf32, #tpu.memory_space<vmem>>, vector<1x8x32xf32>
    %80 = vector.shape_cast %79 : vector<1x8x32xf32> to vector<8x32xf32>
    %81 = vector.shape_cast %78 : vector<8x32xf32> to vector<1x8x32xf32>
    tpu.vector_store %arg16[%c4_65, %c0_66, %c0_67], %81 {strides = array<i32>} : memref<8x8x32xf32, #tpu.memory_space<vmem>>, vector<1x8x32xf32>,
    %82 = vector.extract_strided_slice %73 {offsets = [0, 64], sizes = [8, 32], strides = [1, 1]} : vector<8x96xf32> to vector<8x32xf32>
    %c4_68 = arith.constant 4 : index
    %c0_69 = arith.constant 0 : index
    %c0_70 = arith.constant 0 : index
    %83 = vector.load %arg17[%c4_68, %c0_69, %c0_70] : memref<8x8x32xf32, #tpu.memory_space<vmem>>, vector<1x8x32xf32>
    %84 = vector.shape_cast %83 : vector<1x8x32xf32> to vector<8x32xf32>
    %85 = vector.shape_cast %82 : vector<8x32xf32> to vector<1x8x32xf32>
    tpu.vector_store %arg17[%c4_68, %c0_69, %c0_70], %85 {strides = array<i32>} : memref<8x8x32xf32, #tpu.memory_space<vmem>>, vector<1x8x32xf32>,
    %c0_71 = arith.constant 0 : index
    %c5 = arith.constant 5 : index
    %c0_72 = arith.constant 0 : index
    %86 = vector.load %arg14[%c0_71, %c5, %c0_72] : memref<8x8x96xf32, #tpu.memory_space<vmem>>, vector<8x1x96xf32>
    %87 = vector.shape_cast %86 : vector<8x1x96xf32> to vector<8x96xf32>
    %88 = vector.extract_strided_slice %87 {offsets = [0, 0], sizes = [8, 32], strides = [1, 1]} : vector<8x96xf32> to vector<8x32xf32>
    %c5_73 = arith.constant 5 : index
    %c0_74 = arith.constant 0 : index
    %c0_75 = arith.constant 0 : index
    %89 = vector.load %arg15[%c5_73, %c0_74, %c0_75] : memref<8x8x32xf32, #tpu.memory_space<vmem>>, vector<1x8x32xf32>
    %90 = vector.shape_cast %89 : vector<1x8x32xf32> to vector<8x32xf32>
    %91 = vector.shape_cast %88 : vector<8x32xf32> to vector<1x8x32xf32>
    tpu.vector_store %arg15[%c5_73, %c0_74, %c0_75], %91 {strides = array<i32>} : memref<8x8x32xf32, #tpu.memory_space<vmem>>, vector<1x8x32xf32>,
    %92 = vector.extract_strided_slice %87 {offsets = [0, 32], sizes = [8, 32], strides = [1, 1]} : vector<8x96xf32> to vector<8x32xf32>
    %c5_76 = arith.constant 5 : index
    %c0_77 = arith.constant 0 : index
    %c0_78 = arith.constant 0 : index
    %93 = vector.load %arg16[%c5_76, %c0_77, %c0_78] : memref<8x8x32xf32, #tpu.memory_space<vmem>>, vector<1x8x32xf32>
    %94 = vector.shape_cast %93 : vector<1x8x32xf32> to vector<8x32xf32>
    %95 = vector.shape_cast %92 : vector<8x32xf32> to vector<1x8x32xf32>
    tpu.vector_store %arg16[%c5_76, %c0_77, %c0_78], %95 {strides = array<i32>} : memref<8x8x32xf32, #tpu.memory_space<vmem>>, vector<1x8x32xf32>,
    %96 = vector.extract_strided_slice %87 {offsets = [0, 64], sizes = [8, 32], strides = [1, 1]} : vector<8x96xf32> to vector<8x32xf32>
    %c5_79 = arith.constant 5 : index
    %c0_80 = arith.constant 0 : index
    %c0_81 = arith.constant 0 : index
    %97 = vector.load %arg17[%c5_79, %c0_80, %c0_81] : memref<8x8x32xf32, #tpu.memory_space<vmem>>, vector<1x8x32xf32>
    %98 = vector.shape_cast %97 : vector<1x8x32xf32> to vector<8x32xf32>
    %99 = vector.shape_cast %96 : vector<8x32xf32> to vector<1x8x32xf32>
    tpu.vector_store %arg17[%c5_79, %c0_80, %c0_81], %99 {strides = array<i32>} : memref<8x8x32xf32, #tpu.memory_space<vmem>>, vector<1x8x32xf32>,
    %c0_82 = arith.constant 0 : index
    %c6 = arith.constant 6 : index
    %c0_83 = arith.constant 0 : index
    %100 = vector.load %arg14[%c0_82, %c6, %c0_83] : memref<8x8x96xf32, #tpu.memory_space<vmem>>, vector<8x1x96xf32>
    %101 = vector.shape_cast %100 : vector<8x1x96xf32> to vector<8x96xf32>
    %102 = vector.extract_strided_slice %101 {offsets = [0, 0], sizes = [8, 32], strides = [1, 1]} : vector<8x96xf32> to vector<8x32xf32>
    %c6_84 = arith.constant 6 : index
    %c0_85 = arith.constant 0 : index
    %c0_86 = arith.constant 0 : index
    %103 = vector.load %arg15[%c6_84, %c0_85, %c0_86] : memref<8x8x32xf32, #tpu.memory_space<vmem>>, vector<1x8x32xf32>
    %104 = vector.shape_cast %103 : vector<1x8x32xf32> to vector<8x32xf32>
    %105 = vector.shape_cast %102 : vector<8x32xf32> to vector<1x8x32xf32>
    tpu.vector_store %arg15[%c6_84, %c0_85, %c0_86], %105 {strides = array<i32>} : memref<8x8x32xf32, #tpu.memory_space<vmem>>, vector<1x8x32xf32>,
    %106 = vector.extract_strided_slice %101 {offsets = [0, 32], sizes = [8, 32], strides = [1, 1]} : vector<8x96xf32> to vector<8x32xf32>
    %c6_87 = arith.constant 6 : index
    %c0_88 = arith.constant 0 : index
    %c0_89 = arith.constant 0 : index
    %107 = vector.load %arg16[%c6_87, %c0_88, %c0_89] : memref<8x8x32xf32, #tpu.memory_space<vmem>>, vector<1x8x32xf32>
    %108 = vector.shape_cast %107 : vector<1x8x32xf32> to vector<8x32xf32>
    %109 = vector.shape_cast %106 : vector<8x32xf32> to vector<1x8x32xf32>
    tpu.vector_store %arg16[%c6_87, %c0_88, %c0_89], %109 {strides = array<i32>} : memref<8x8x32xf32, #tpu.memory_space<vmem>>, vector<1x8x32xf32>,
    %110 = vector.extract_strided_slice %101 {offsets = [0, 64], sizes = [8, 32], strides = [1, 1]} : vector<8x96xf32> to vector<8x32xf32>
    %c6_90 = arith.constant 6 : index
    %c0_91 = arith.constant 0 : index
    %c0_92 = arith.constant 0 : index
    %111 = vector.load %arg17[%c6_90, %c0_91, %c0_92] : memref<8x8x32xf32, #tpu.memory_space<vmem>>, vector<1x8x32xf32>
    %112 = vector.shape_cast %111 : vector<1x8x32xf32> to vector<8x32xf32>
    %113 = vector.shape_cast %110 : vector<8x32xf32> to vector<1x8x32xf32>
    tpu.vector_store %arg17[%c6_90, %c0_91, %c0_92], %113 {strides = array<i32>} : memref<8x8x32xf32, #tpu.memory_space<vmem>>, vector<1x8x32xf32>,
    %c0_93 = arith.constant 0 : index
    %c7 = arith.constant 7 : index
    %c0_94 = arith.constant 0 : index
    %114 = vector.load %arg14[%c0_93, %c7, %c0_94] : memref<8x8x96xf32, #tpu.memory_space<vmem>>, vector<8x1x96xf32>
    %115 = vector.shape_cast %114 : vector<8x1x96xf32> to vector<8x96xf32>
    %116 = vector.extract_strided_slice %115 {offsets = [0, 0], sizes = [8, 32], strides = [1, 1]} : vector<8x96xf32> to vector<8x32xf32>
    %c7_95 = arith.constant 7 : index
    %c0_96 = arith.constant 0 : index
    %c0_97 = arith.constant 0 : index
    %117 = vector.load %arg15[%c7_95, %c0_96, %c0_97] : memref<8x8x32xf32, #tpu.memory_space<vmem>>, vector<1x8x32xf32>
    %118 = vector.shape_cast %117 : vector<1x8x32xf32> to vector<8x32xf32>
    %119 = vector.shape_cast %116 : vector<8x32xf32> to vector<1x8x32xf32>
    tpu.vector_store %arg15[%c7_95, %c0_96, %c0_97], %119 {strides = array<i32>} : memref<8x8x32xf32, #tpu.memory_space<vmem>>, vector<1x8x32xf32>,
    %120 = vector.extract_strided_slice %115 {offsets = [0, 32], sizes = [8, 32], strides = [1, 1]} : vector<8x96xf32> to vector<8x32xf32>
    %c7_98 = arith.constant 7 : index
    %c0_99 = arith.constant 0 : index
    %c0_100 = arith.constant 0 : index
    %121 = vector.load %arg16[%c7_98, %c0_99, %c0_100] : memref<8x8x32xf32, #tpu.memory_space<vmem>>, vector<1x8x32xf32>
    %122 = vector.shape_cast %121 : vector<1x8x32xf32> to vector<8x32xf32>
    %123 = vector.shape_cast %120 : vector<8x32xf32> to vector<1x8x32xf32>
    tpu.vector_store %arg16[%c7_98, %c0_99, %c0_100], %123 {strides = array<i32>} : memref<8x8x32xf32, #tpu.memory_space<vmem>>, vector<1x8x32xf32>,
    %124 = vector.extract_strided_slice %115 {offsets = [0, 64], sizes = [8, 32], strides = [1, 1]} : vector<8x96xf32> to vector<8x32xf32>
    %c7_101 = arith.constant 7 : index
    %c0_102 = arith.constant 0 : index
    %c0_103 = arith.constant 0 : index
    %125 = vector.load %arg17[%c7_101, %c0_102, %c0_103] : memref<8x8x32xf32, #tpu.memory_space<vmem>>, vector<1x8x32xf32>
    %126 = vector.shape_cast %125 : vector<1x8x32xf32> to vector<8x32xf32>
    %127 = vector.shape_cast %124 : vector<8x32xf32> to vector<1x8x32xf32>
    tpu.vector_store %arg17[%c7_101, %c0_102, %c0_103], %127 {strides = array<i32>} : memref<8x8x32xf32, #tpu.memory_space<vmem>>, vector<1x8x32xf32>,
    %c0_104 = arith.constant 0 : index
    %c0_105 = arith.constant 0 : index
    %128 = vector.load %arg4[%c0_104, %c0_105] : memref<32x96xf32, #tpu.memory_space<vmem>>, vector<32x96xf32>
    %c0_106 = arith.constant 0 : index
    %c0_107 = arith.constant 0 : index
    %129 = vector.load %arg6[%c0_106, %c0_107] : memref<1x96xf32, #tpu.memory_space<vmem>>, vector<1x96xf32>
    %c0_108 = arith.constant 0 : index
    %c0_109 = arith.constant 0 : index
    %130 = vector.load %arg7[%c0_108, %c0_109] : memref<32x96xf32, #tpu.memory_space<vmem>>, vector<32x96xf32>
    %c0_110 = arith.constant 0 : index
    %c0_111 = arith.constant 0 : index
    %131 = vector.load %arg8[%c0_110, %c0_111] : memref<32x96xf32, #tpu.memory_space<vmem>>, vector<32x96xf32>
    %c0_112 = arith.constant 0 : index
    %c0_113 = arith.constant 0 : index
    %132 = vector.load %arg9[%c0_112, %c0_113] : memref<1x96xf32, #tpu.memory_space<vmem>>, vector<1x96xf32>
    %c0_114 = arith.constant 0 : index
    %c0_115 = arith.constant 0 : index
    %133 = vector.load %arg10[%c0_114, %c0_115] : memref<1x96xf32, #tpu.memory_space<vmem>>, vector<1x96xf32>
    %cst_116 = arith.constant 0.000000e+00 : f32
    %134 = vector.broadcast %cst_116 : f32 to vector<8x32xf32>
    %cst_117 = arith.constant dense<0.000000e+00> : vector<8x96xf32>
    %135 = tpu.matmul %134, %128, %cst_117 {dimension_numbers = #tpu.dot_dimension_numbers<[1], [0], [0], [1], [0, 0, 1, 1], [], []>} : vector<8x32xf32>, vector<32x96xf32>, vector<8x96xf32> -> vector<8x96xf32>
    %136 = vector.broadcast %129 : vector<1x96xf32> to vector<8x96xf32>
    %137 = arith.addf %135, %136 : vector<8x96xf32>
    %c0_118 = arith.constant 0 : index
    %c0_119 = arith.constant 0 : index
    %c0_120 = arith.constant 0 : index
    %138 = vector.load %arg15[%c0_118, %c0_119, %c0_120] : memref<8x8x32xf32, #tpu.memory_space<vmem>>, vector<1x8x32xf32>
    %139 = vector.shape_cast %138 : vector<1x8x32xf32> to vector<8x32xf32>
    %140 = vector.extract_strided_slice %137 {offsets = [0, 0], sizes = [8, 32], strides = [1, 1]} : vector<8x96xf32> to vector<8x32xf32>
    %141 = arith.addf %139, %140 : vector<8x32xf32>
    %142 = arith.negf %141 : vector<8x32xf32>
    %143 = math.exp %142 : vector<8x32xf32>
    %cst_121 = arith.constant 1.000000e+00 : f32
    %144 = vector.broadcast %cst_121 : f32 to vector<8x32xf32>
    %145 = arith.addf %144, %143 : vector<8x32xf32>
    %146 = arith.divf %144, %145 : vector<8x32xf32>
    %c0_122 = arith.constant 0 : index
    %c0_123 = arith.constant 0 : index
    %c0_124 = arith.constant 0 : index
    %147 = vector.load %arg16[%c0_122, %c0_123, %c0_124] : memref<8x8x32xf32, #tpu.memory_space<vmem>>, vector<1x8x32xf32>
    %148 = vector.shape_cast %147 : vector<1x8x32xf32> to vector<8x32xf32>
    %149 = vector.extract_strided_slice %137 {offsets = [0, 32], sizes = [8, 32], strides = [1, 1]} : vector<8x96xf32> to vector<8x32xf32>
    %150 = arith.addf %148, %149 : vector<8x32xf32>
    %151 = arith.negf %150 : vector<8x32xf32>
    %152 = math.exp %151 : vector<8x32xf32>
    %cst_125 = arith.constant 1.000000e+00 : f32
    %153 = vector.broadcast %cst_125 : f32 to vector<8x32xf32>
    %154 = arith.addf %153, %152 : vector<8x32xf32>
    %155 = arith.divf %153, %154 : vector<8x32xf32>
    %c0_126 = arith.constant 0 : index
    %c0_127 = arith.constant 0 : index
    %c0_128 = arith.constant 0 : index
    %156 = vector.load %arg17[%c0_126, %c0_127, %c0_128] : memref<8x8x32xf32, #tpu.memory_space<vmem>>, vector<1x8x32xf32>
    %157 = vector.shape_cast %156 : vector<1x8x32xf32> to vector<8x32xf32>
    %158 = vector.extract_strided_slice %137 {offsets = [0, 64], sizes = [8, 32], strides = [1, 1]} : vector<8x96xf32> to vector<8x32xf32>
    %159 = arith.mulf %146, %158 : vector<8x32xf32>
    %160 = arith.addf %157, %159 : vector<8x32xf32>
    %161 = math.tanh %160 : vector<8x32xf32>
    %162 = arith.subf %134, %161 : vector<8x32xf32>
    %163 = arith.mulf %155, %162 : vector<8x32xf32>
    %164 = arith.addf %161, %163 : vector<8x32xf32>
    %c1_i32 = arith.constant 1 : i32
    %cst_129 = arith.constant dense<0.000000e+00> : vector<8x96xf32>
    %165 = tpu.matmul %164, %130, %cst_129 {dimension_numbers = #tpu.dot_dimension_numbers<[1], [0], [0], [1], [0, 0, 1, 1], [], []>} : vector<8x32xf32>, vector<32x96xf32>, vector<8x96xf32> -> vector<8x96xf32>
    %166 = vector.broadcast %132 : vector<1x96xf32> to vector<8x96xf32>
    %167 = arith.addf %165, %166 : vector<8x96xf32>
    %cst_130 = arith.constant dense<0.000000e+00> : vector<8x96xf32>
    %168 = tpu.matmul %134, %131, %cst_130 {dimension_numbers = #tpu.dot_dimension_numbers<[1], [0], [0], [1], [0, 0, 1, 1], [], []>} : vector<8x32xf32>, vector<32x96xf32>, vector<8x96xf32> -> vector<8x96xf32>
    %169 = vector.broadcast %133 : vector<1x96xf32> to vector<8x96xf32>
    %170 = arith.addf %168, %169 : vector<8x96xf32>
    %171 = vector.extract_strided_slice %167 {offsets = [0, 0], sizes = [8, 32], strides = [1, 1]} : vector<8x96xf32> to vector<8x32xf32>
    %172 = vector.extract_strided_slice %170 {offsets = [0, 0], sizes = [8, 32], strides = [1, 1]} : vector<8x96xf32> to vector<8x32xf32>
    %173 = arith.addf %171, %172 : vector<8x32xf32>
    %174 = arith.negf %173 : vector<8x32xf32>
    %175 = math.exp %174 : vector<8x32xf32>
    %cst_131 = arith.constant 1.000000e+00 : f32
    %176 = vector.broadcast %cst_131 : f32 to vector<8x32xf32>
    %177 = arith.addf %176, %175 : vector<8x32xf32>
    %178 = arith.divf %176, %177 : vector<8x32xf32>
    %179 = vector.extract_strided_slice %167 {offsets = [0, 32], sizes = [8, 32], strides = [1, 1]} : vector<8x96xf32> to vector<8x32xf32>
    %180 = vector.extract_strided_slice %170 {offsets = [0, 32], sizes = [8, 32], strides = [1, 1]} : vector<8x96xf32> to vector<8x32xf32>
    %181 = arith.addf %179, %180 : vector<8x32xf32>
    %182 = arith.negf %181 : vector<8x32xf32>
    %183 = math.exp %182 : vector<8x32xf32>
    %cst_132 = arith.constant 1.000000e+00 : f32
    %184 = vector.broadcast %cst_132 : f32 to vector<8x32xf32>
    %185 = arith.addf %184, %183 : vector<8x32xf32>
    %186 = arith.divf %184, %185 : vector<8x32xf32>
    %187 = vector.extract_strided_slice %167 {offsets = [0, 64], sizes = [8, 32], strides = [1, 1]} : vector<8x96xf32> to vector<8x32xf32>
    %188 = vector.extract_strided_slice %170 {offsets = [0, 64], sizes = [8, 32], strides = [1, 1]} : vector<8x96xf32> to vector<8x32xf32>
    %189 = arith.mulf %178, %188 : vector<8x32xf32>
    %190 = arith.addf %187, %189 : vector<8x32xf32>
    %191 = math.tanh %190 : vector<8x32xf32>
    %192 = arith.subf %134, %191 : vector<8x32xf32>
    %193 = arith.mulf %186, %192 : vector<8x32xf32>
    %194 = arith.addf %191, %193 : vector<8x32xf32>
    %cst_133 = arith.constant dense<0.000000e+00> : vector<8x96xf32>
    %195 = tpu.matmul %164, %128, %cst_133 {dimension_numbers = #tpu.dot_dimension_numbers<[1], [0], [0], [1], [0, 0, 1, 1], [], []>} : vector<8x32xf32>, vector<32x96xf32>, vector<8x96xf32> -> vector<8x96xf32>
    %196 = vector.broadcast %129 : vector<1x96xf32> to vector<8x96xf32>
    %197 = arith.addf %195, %196 : vector<8x96xf32>
    %198 = arith.index_cast %c1_i32 : i32 to index
    %c0_134 = arith.constant 0 : index
    %c0_135 = arith.constant 0 : index
    %199 = vector.load %arg15[%198, %c0_134, %c0_135] : memref<8x8x32xf32, #tpu.memory_space<vmem>>, vector<1x8x32xf32>
    %200 = vector.shape_cast %199 : vector<1x8x32xf32> to vector<8x32xf32>
    %201 = vector.extract_strided_slice %197 {offsets = [0, 0], sizes = [8, 32], strides = [1, 1]} : vector<8x96xf32> to vector<8x32xf32>
    %202 = arith.addf %200, %201 : vector<8x32xf32>
    %203 = arith.negf %202 : vector<8x32xf32>
    %204 = math.exp %203 : vector<8x32xf32>
    %cst_136 = arith.constant 1.000000e+00 : f32
    %205 = vector.broadcast %cst_136 : f32 to vector<8x32xf32>
    %206 = arith.addf %205, %204 : vector<8x32xf32>
    %207 = arith.divf %205, %206 : vector<8x32xf32>
    %208 = arith.index_cast %c1_i32 : i32 to index
    %c0_137 = arith.constant 0 : index
    %c0_138 = arith.constant 0 : index
    %209 = vector.load %arg16[%208, %c0_137, %c0_138] : memref<8x8x32xf32, #tpu.memory_space<vmem>>, vector<1x8x32xf32>
    %210 = vector.shape_cast %209 : vector<1x8x32xf32> to vector<8x32xf32>
    %211 = vector.extract_strided_slice %197 {offsets = [0, 32], sizes = [8, 32], strides = [1, 1]} : vector<8x96xf32> to vector<8x32xf32>
    %212 = arith.addf %210, %211 : vector<8x32xf32>
    %213 = arith.negf %212 : vector<8x32xf32>
    %214 = math.exp %213 : vector<8x32xf32>
    %cst_139 = arith.constant 1.000000e+00 : f32
    %215 = vector.broadcast %cst_139 : f32 to vector<8x32xf32>
    %216 = arith.addf %215, %214 : vector<8x32xf32>
    %217 = arith.divf %215, %216 : vector<8x32xf32>
    %218 = arith.index_cast %c1_i32 : i32 to index
    %c0_140 = arith.constant 0 : index
    %c0_141 = arith.constant 0 : index
    %219 = vector.load %arg17[%218, %c0_140, %c0_141] : memref<8x8x32xf32, #tpu.memory_space<vmem>>, vector<1x8x32xf32>
    %220 = vector.shape_cast %219 : vector<1x8x32xf32> to vector<8x32xf32>
    %221 = vector.extract_strided_slice %197 {offsets = [0, 64], sizes = [8, 32], strides = [1, 1]} : vector<8x96xf32> to vector<8x32xf32>
    %222 = arith.mulf %207, %221 : vector<8x32xf32>
    %223 = arith.addf %220, %222 : vector<8x32xf32>
    %224 = math.tanh %223 : vector<8x32xf32>
    %225 = arith.subf %164, %224 : vector<8x32xf32>
    %226 = arith.mulf %217, %225 : vector<8x32xf32>
    %227 = arith.addf %224, %226 : vector<8x32xf32>
    %c2_i32 = arith.constant 2 : i32
    %cst_142 = arith.constant dense<0.000000e+00> : vector<8x96xf32>
    %228 = tpu.matmul %227, %130, %cst_142 {dimension_numbers = #tpu.dot_dimension_numbers<[1], [0], [0], [1], [0, 0, 1, 1], [], []>} : vector<8x32xf32>, vector<32x96xf32>, vector<8x96xf32> -> vector<8x96xf32>
    %229 = vector.broadcast %132 : vector<1x96xf32> to vector<8x96xf32>
    %230 = arith.addf %228, %229 : vector<8x96xf32>
    %cst_143 = arith.constant dense<0.000000e+00> : vector<8x96xf32>
    %231 = tpu.matmul %194, %131, %cst_143 {dimension_numbers = #tpu.dot_dimension_numbers<[1], [0], [0], [1], [0, 0, 1, 1], [], []>} : vector<8x32xf32>, vector<32x96xf32>, vector<8x96xf32> -> vector<8x96xf32>
    %232 = vector.broadcast %133 : vector<1x96xf32> to vector<8x96xf32>
    %233 = arith.addf %231, %232 : vector<8x96xf32>
    %234 = vector.extract_strided_slice %230 {offsets = [0, 0], sizes = [8, 32], strides = [1, 1]} : vector<8x96xf32> to vector<8x32xf32>
    %235 = vector.extract_strided_slice %233 {offsets = [0, 0], sizes = [8, 32], strides = [1, 1]} : vector<8x96xf32> to vector<8x32xf32>
    %236 = arith.addf %234, %235 : vector<8x32xf32>
    %237 = arith.negf %236 : vector<8x32xf32>
    %238 = math.exp %237 : vector<8x32xf32>
    %cst_144 = arith.constant 1.000000e+00 : f32
    %239 = vector.broadcast %cst_144 : f32 to vector<8x32xf32>
    %240 = arith.addf %239, %238 : vector<8x32xf32>
    %241 = arith.divf %239, %240 : vector<8x32xf32>
    %242 = vector.extract_strided_slice %230 {offsets = [0, 32], sizes = [8, 32], strides = [1, 1]} : vector<8x96xf32> to vector<8x32xf32>
    %243 = vector.extract_strided_slice %233 {offsets = [0, 32], sizes = [8, 32], strides = [1, 1]} : vector<8x96xf32> to vector<8x32xf32>
    %244 = arith.addf %242, %243 : vector<8x32xf32>
    %245 = arith.negf %244 : vector<8x32xf32>
    %246 = math.exp %245 : vector<8x32xf32>
    %cst_145 = arith.constant 1.000000e+00 : f32
    %247 = vector.broadcast %cst_145 : f32 to vector<8x32xf32>
    %248 = arith.addf %247, %246 : vector<8x32xf32>
    %249 = arith.divf %247, %248 : vector<8x32xf32>
    %250 = vector.extract_strided_slice %230 {offsets = [0, 64], sizes = [8, 32], strides = [1, 1]} : vector<8x96xf32> to vector<8x32xf32>
    %251 = vector.extract_strided_slice %233 {offsets = [0, 64], sizes = [8, 32], strides = [1, 1]} : vector<8x96xf32> to vector<8x32xf32>
    %252 = arith.mulf %241, %251 : vector<8x32xf32>
    %253 = arith.addf %250, %252 : vector<8x32xf32>
    %254 = math.tanh %253 : vector<8x32xf32>
    %255 = arith.subf %194, %254 : vector<8x32xf32>
    %256 = arith.mulf %249, %255 : vector<8x32xf32>
    %257 = arith.addf %254, %256 : vector<8x32xf32>
    %cst_146 = arith.constant dense<0.000000e+00> : vector<8x96xf32>
    %258 = tpu.matmul %227, %128, %cst_146 {dimension_numbers = #tpu.dot_dimension_numbers<[1], [0], [0], [1], [0, 0, 1, 1], [], []>} : vector<8x32xf32>, vector<32x96xf32>, vector<8x96xf32> -> vector<8x96xf32>
    %259 = vector.broadcast %129 : vector<1x96xf32> to vector<8x96xf32>
    %260 = arith.addf %258, %259 : vector<8x96xf32>
    %261 = arith.index_cast %c2_i32 : i32 to index
    %c0_147 = arith.constant 0 : index
    %c0_148 = arith.constant 0 : index
    %262 = vector.load %arg15[%261, %c0_147, %c0_148] : memref<8x8x32xf32, #tpu.memory_space<vmem>>, vector<1x8x32xf32>
    %263 = vector.shape_cast %262 : vector<1x8x32xf32> to vector<8x32xf32>
    %264 = vector.extract_strided_slice %260 {offsets = [0, 0], sizes = [8, 32], strides = [1, 1]} : vector<8x96xf32> to vector<8x32xf32>
    %265 = arith.addf %263, %264 : vector<8x32xf32>
    %266 = arith.negf %265 : vector<8x32xf32>
    %267 = math.exp %266 : vector<8x32xf32>
    %cst_149 = arith.constant 1.000000e+00 : f32
    %268 = vector.broadcast %cst_149 : f32 to vector<8x32xf32>
    %269 = arith.addf %268, %267 : vector<8x32xf32>
    %270 = arith.divf %268, %269 : vector<8x32xf32>
    %271 = arith.index_cast %c2_i32 : i32 to index
    %c0_150 = arith.constant 0 : index
    %c0_151 = arith.constant 0 : index
    %272 = vector.load %arg16[%271, %c0_150, %c0_151] : memref<8x8x32xf32, #tpu.memory_space<vmem>>, vector<1x8x32xf32>
    %273 = vector.shape_cast %272 : vector<1x8x32xf32> to vector<8x32xf32>
    %274 = vector.extract_strided_slice %260 {offsets = [0, 32], sizes = [8, 32], strides = [1, 1]} : vector<8x96xf32> to vector<8x32xf32>
    %275 = arith.addf %273, %274 : vector<8x32xf32>
    %276 = arith.negf %275 : vector<8x32xf32>
    %277 = math.exp %276 : vector<8x32xf32>
    %cst_152 = arith.constant 1.000000e+00 : f32
    %278 = vector.broadcast %cst_152 : f32 to vector<8x32xf32>
    %279 = arith.addf %278, %277 : vector<8x32xf32>
    %280 = arith.divf %278, %279 : vector<8x32xf32>
    %281 = arith.index_cast %c2_i32 : i32 to index
    %c0_153 = arith.constant 0 : index
    %c0_154 = arith.constant 0 : index
    %282 = vector.load %arg17[%281, %c0_153, %c0_154] : memref<8x8x32xf32, #tpu.memory_space<vmem>>, vector<1x8x32xf32>
    %283 = vector.shape_cast %282 : vector<1x8x32xf32> to vector<8x32xf32>
    %284 = vector.extract_strided_slice %260 {offsets = [0, 64], sizes = [8, 32], strides = [1, 1]} : vector<8x96xf32> to vector<8x32xf32>
    %285 = arith.mulf %270, %284 : vector<8x32xf32>
    %286 = arith.addf %283, %285 : vector<8x32xf32>
    %287 = math.tanh %286 : vector<8x32xf32>
    %288 = arith.subf %227, %287 : vector<8x32xf32>
    %289 = arith.mulf %280, %288 : vector<8x32xf32>
    %290 = arith.addf %287, %289 : vector<8x32xf32>
    %c3_i32 = arith.constant 3 : i32
    %cst_155 = arith.constant dense<0.000000e+00> : vector<8x96xf32>
    %291 = tpu.matmul %290, %130, %cst_155 {dimension_numbers = #tpu.dot_dimension_numbers<[1], [0], [0], [1], [0, 0, 1, 1], [], []>} : vector<8x32xf32>, vector<32x96xf32>, vector<8x96xf32> -> vector<8x96xf32>
    %292 = vector.broadcast %132 : vector<1x96xf32> to vector<8x96xf32>
    %293 = arith.addf %291, %292 : vector<8x96xf32>
    %cst_156 = arith.constant dense<0.000000e+00> : vector<8x96xf32>
    %294 = tpu.matmul %257, %131, %cst_156 {dimension_numbers = #tpu.dot_dimension_numbers<[1], [0], [0], [1], [0, 0, 1, 1], [], []>} : vector<8x32xf32>, vector<32x96xf32>, vector<8x96xf32> -> vector<8x96xf32>
    %295 = vector.broadcast %133 : vector<1x96xf32> to vector<8x96xf32>
    %296 = arith.addf %294, %295 : vector<8x96xf32>
    %297 = vector.extract_strided_slice %293 {offsets = [0, 0], sizes = [8, 32], strides = [1, 1]} : vector<8x96xf32> to vector<8x32xf32>
    %298 = vector.extract_strided_slice %296 {offsets = [0, 0], sizes = [8, 32], strides = [1, 1]} : vector<8x96xf32> to vector<8x32xf32>
    %299 = arith.addf %297, %298 : vector<8x32xf32>
    %300 = arith.negf %299 : vector<8x32xf32>
    %301 = math.exp %300 : vector<8x32xf32>
    %cst_157 = arith.constant 1.000000e+00 : f32
    %302 = vector.broadcast %cst_157 : f32 to vector<8x32xf32>
    %303 = arith.addf %302, %301 : vector<8x32xf32>
    %304 = arith.divf %302, %303 : vector<8x32xf32>
    %305 = vector.extract_strided_slice %293 {offsets = [0, 32], sizes = [8, 32], strides = [1, 1]} : vector<8x96xf32> to vector<8x32xf32>
    %306 = vector.extract_strided_slice %296 {offsets = [0, 32], sizes = [8, 32], strides = [1, 1]} : vector<8x96xf32> to vector<8x32xf32>
    %307 = arith.addf %305, %306 : vector<8x32xf32>
    %308 = arith.negf %307 : vector<8x32xf32>
    %309 = math.exp %308 : vector<8x32xf32>
    %cst_158 = arith.constant 1.000000e+00 : f32
    %310 = vector.broadcast %cst_158 : f32 to vector<8x32xf32>
    %311 = arith.addf %310, %309 : vector<8x32xf32>
    %312 = arith.divf %310, %311 : vector<8x32xf32>
    %313 = vector.extract_strided_slice %293 {offsets = [0, 64], sizes = [8, 32], strides = [1, 1]} : vector<8x96xf32> to vector<8x32xf32>
    %314 = vector.extract_strided_slice %296 {offsets = [0, 64], sizes = [8, 32], strides = [1, 1]} : vector<8x96xf32> to vector<8x32xf32>
    %315 = arith.mulf %304, %314 : vector<8x32xf32>
    %316 = arith.addf %313, %315 : vector<8x32xf32>
    %317 = math.tanh %316 : vector<8x32xf32>
    %318 = arith.subf %257, %317 : vector<8x32xf32>
    %319 = arith.mulf %312, %318 : vector<8x32xf32>
    %320 = arith.addf %317, %319 : vector<8x32xf32>
    %cst_159 = arith.constant dense<0.000000e+00> : vector<8x96xf32>
    %321 = tpu.matmul %290, %128, %cst_159 {dimension_numbers = #tpu.dot_dimension_numbers<[1], [0], [0], [1], [0, 0, 1, 1], [], []>} : vector<8x32xf32>, vector<32x96xf32>, vector<8x96xf32> -> vector<8x96xf32>
    %322 = vector.broadcast %129 : vector<1x96xf32> to vector<8x96xf32>
    %323 = arith.addf %321, %322 : vector<8x96xf32>
    %324 = arith.index_cast %c3_i32 : i32 to index
    %c0_160 = arith.constant 0 : index
    %c0_161 = arith.constant 0 : index
    %325 = vector.load %arg15[%324, %c0_160, %c0_161] : memref<8x8x32xf32, #tpu.memory_space<vmem>>, vector<1x8x32xf32>
    %326 = vector.shape_cast %325 : vector<1x8x32xf32> to vector<8x32xf32>
    %327 = vector.extract_strided_slice %323 {offsets = [0, 0], sizes = [8, 32], strides = [1, 1]} : vector<8x96xf32> to vector<8x32xf32>
    %328 = arith.addf %326, %327 : vector<8x32xf32>
    %329 = arith.negf %328 : vector<8x32xf32>
    %330 = math.exp %329 : vector<8x32xf32>
    %cst_162 = arith.constant 1.000000e+00 : f32
    %331 = vector.broadcast %cst_162 : f32 to vector<8x32xf32>
    %332 = arith.addf %331, %330 : vector<8x32xf32>
    %333 = arith.divf %331, %332 : vector<8x32xf32>
    %334 = arith.index_cast %c3_i32 : i32 to index
    %c0_163 = arith.constant 0 : index
    %c0_164 = arith.constant 0 : index
    %335 = vector.load %arg16[%334, %c0_163, %c0_164] : memref<8x8x32xf32, #tpu.memory_space<vmem>>, vector<1x8x32xf32>
    %336 = vector.shape_cast %335 : vector<1x8x32xf32> to vector<8x32xf32>
    %337 = vector.extract_strided_slice %323 {offsets = [0, 32], sizes = [8, 32], strides = [1, 1]} : vector<8x96xf32> to vector<8x32xf32>
    %338 = arith.addf %336, %337 : vector<8x32xf32>
    %339 = arith.negf %338 : vector<8x32xf32>
    %340 = math.exp %339 : vector<8x32xf32>
    %cst_165 = arith.constant 1.000000e+00 : f32
    %341 = vector.broadcast %cst_165 : f32 to vector<8x32xf32>
    %342 = arith.addf %341, %340 : vector<8x32xf32>
    %343 = arith.divf %341, %342 : vector<8x32xf32>
    %344 = arith.index_cast %c3_i32 : i32 to index
    %c0_166 = arith.constant 0 : index
    %c0_167 = arith.constant 0 : index
    %345 = vector.load %arg17[%344, %c0_166, %c0_167] : memref<8x8x32xf32, #tpu.memory_space<vmem>>, vector<1x8x32xf32>
    %346 = vector.shape_cast %345 : vector<1x8x32xf32> to vector<8x32xf32>
    %347 = vector.extract_strided_slice %323 {offsets = [0, 64], sizes = [8, 32], strides = [1, 1]} : vector<8x96xf32> to vector<8x32xf32>
    %348 = arith.mulf %333, %347 : vector<8x32xf32>
    %349 = arith.addf %346, %348 : vector<8x32xf32>
    %350 = math.tanh %349 : vector<8x32xf32>
    %351 = arith.subf %290, %350 : vector<8x32xf32>
    %352 = arith.mulf %343, %351 : vector<8x32xf32>
    %353 = arith.addf %350, %352 : vector<8x32xf32>
    %c4_i32 = arith.constant 4 : i32
    %cst_168 = arith.constant dense<0.000000e+00> : vector<8x96xf32>
    %354 = tpu.matmul %353, %130, %cst_168 {dimension_numbers = #tpu.dot_dimension_numbers<[1], [0], [0], [1], [0, 0, 1, 1], [], []>} : vector<8x32xf32>, vector<32x96xf32>, vector<8x96xf32> -> vector<8x96xf32>
    %355 = vector.broadcast %132 : vector<1x96xf32> to vector<8x96xf32>
    %356 = arith.addf %354, %355 : vector<8x96xf32>
    %cst_169 = arith.constant dense<0.000000e+00> : vector<8x96xf32>
    %357 = tpu.matmul %320, %131, %cst_169 {dimension_numbers = #tpu.dot_dimension_numbers<[1], [0], [0], [1], [0, 0, 1, 1], [], []>} : vector<8x32xf32>, vector<32x96xf32>, vector<8x96xf32> -> vector<8x96xf32>
    %358 = vector.broadcast %133 : vector<1x96xf32> to vector<8x96xf32>
    %359 = arith.addf %357, %358 : vector<8x96xf32>
    %360 = vector.extract_strided_slice %356 {offsets = [0, 0], sizes = [8, 32], strides = [1, 1]} : vector<8x96xf32> to vector<8x32xf32>
    %361 = vector.extract_strided_slice %359 {offsets = [0, 0], sizes = [8, 32], strides = [1, 1]} : vector<8x96xf32> to vector<8x32xf32>
    %362 = arith.addf %360, %361 : vector<8x32xf32>
    %363 = arith.negf %362 : vector<8x32xf32>
    %364 = math.exp %363 : vector<8x32xf32>
    %cst_170 = arith.constant 1.000000e+00 : f32
    %365 = vector.broadcast %cst_170 : f32 to vector<8x32xf32>
    %366 = arith.addf %365, %364 : vector<8x32xf32>
    %367 = arith.divf %365, %366 : vector<8x32xf32>
    %368 = vector.extract_strided_slice %356 {offsets = [0, 32], sizes = [8, 32], strides = [1, 1]} : vector<8x96xf32> to vector<8x32xf32>
    %369 = vector.extract_strided_slice %359 {offsets = [0, 32], sizes = [8, 32], strides = [1, 1]} : vector<8x96xf32> to vector<8x32xf32>
    %370 = arith.addf %368, %369 : vector<8x32xf32>
    %371 = arith.negf %370 : vector<8x32xf32>
    %372 = math.exp %371 : vector<8x32xf32>
    %cst_171 = arith.constant 1.000000e+00 : f32
    %373 = vector.broadcast %cst_171 : f32 to vector<8x32xf32>
    %374 = arith.addf %373, %372 : vector<8x32xf32>
    %375 = arith.divf %373, %374 : vector<8x32xf32>
    %376 = vector.extract_strided_slice %356 {offsets = [0, 64], sizes = [8, 32], strides = [1, 1]} : vector<8x96xf32> to vector<8x32xf32>
    %377 = vector.extract_strided_slice %359 {offsets = [0, 64], sizes = [8, 32], strides = [1, 1]} : vector<8x96xf32> to vector<8x32xf32>
    %378 = arith.mulf %367, %377 : vector<8x32xf32>
    %379 = arith.addf %376, %378 : vector<8x32xf32>
    %380 = math.tanh %379 : vector<8x32xf32>
    %381 = arith.subf %320, %380 : vector<8x32xf32>
    %382 = arith.mulf %375, %381 : vector<8x32xf32>
    %383 = arith.addf %380, %382 : vector<8x32xf32>
    %cst_172 = arith.constant dense<0.000000e+00> : vector<8x96xf32>
    %384 = tpu.matmul %353, %128, %cst_172 {dimension_numbers = #tpu.dot_dimension_numbers<[1], [0], [0], [1], [0, 0, 1, 1], [], []>} : vector<8x32xf32>, vector<32x96xf32>, vector<8x96xf32> -> vector<8x96xf32>
    %385 = vector.broadcast %129 : vector<1x96xf32> to vector<8x96xf32>
    %386 = arith.addf %384, %385 : vector<8x96xf32>
    %387 = arith.index_cast %c4_i32 : i32 to index
    %c0_173 = arith.constant 0 : index
    %c0_174 = arith.constant 0 : index
    %388 = vector.load %arg15[%387, %c0_173, %c0_174] : memref<8x8x32xf32, #tpu.memory_space<vmem>>, vector<1x8x32xf32>
    %389 = vector.shape_cast %388 : vector<1x8x32xf32> to vector<8x32xf32>
    %390 = vector.extract_strided_slice %386 {offsets = [0, 0], sizes = [8, 32], strides = [1, 1]} : vector<8x96xf32> to vector<8x32xf32>
    %391 = arith.addf %389, %390 : vector<8x32xf32>
    %392 = arith.negf %391 : vector<8x32xf32>
    %393 = math.exp %392 : vector<8x32xf32>
    %cst_175 = arith.constant 1.000000e+00 : f32
    %394 = vector.broadcast %cst_175 : f32 to vector<8x32xf32>
    %395 = arith.addf %394, %393 : vector<8x32xf32>
    %396 = arith.divf %394, %395 : vector<8x32xf32>
    %397 = arith.index_cast %c4_i32 : i32 to index
    %c0_176 = arith.constant 0 : index
    %c0_177 = arith.constant 0 : index
    %398 = vector.load %arg16[%397, %c0_176, %c0_177] : memref<8x8x32xf32, #tpu.memory_space<vmem>>, vector<1x8x32xf32>
    %399 = vector.shape_cast %398 : vector<1x8x32xf32> to vector<8x32xf32>
    %400 = vector.extract_strided_slice %386 {offsets = [0, 32], sizes = [8, 32], strides = [1, 1]} : vector<8x96xf32> to vector<8x32xf32>
    %401 = arith.addf %399, %400 : vector<8x32xf32>
    %402 = arith.negf %401 : vector<8x32xf32>
    %403 = math.exp %402 : vector<8x32xf32>
    %cst_178 = arith.constant 1.000000e+00 : f32
    %404 = vector.broadcast %cst_178 : f32 to vector<8x32xf32>
    %405 = arith.addf %404, %403 : vector<8x32xf32>
    %406 = arith.divf %404, %405 : vector<8x32xf32>
    %407 = arith.index_cast %c4_i32 : i32 to index
    %c0_179 = arith.constant 0 : index
    %c0_180 = arith.constant 0 : index
    %408 = vector.load %arg17[%407, %c0_179, %c0_180] : memref<8x8x32xf32, #tpu.memory_space<vmem>>, vector<1x8x32xf32>
    %409 = vector.shape_cast %408 : vector<1x8x32xf32> to vector<8x32xf32>
    %410 = vector.extract_strided_slice %386 {offsets = [0, 64], sizes = [8, 32], strides = [1, 1]} : vector<8x96xf32> to vector<8x32xf32>
    %411 = arith.mulf %396, %410 : vector<8x32xf32>
    %412 = arith.addf %409, %411 : vector<8x32xf32>
    %413 = math.tanh %412 : vector<8x32xf32>
    %414 = arith.subf %353, %413 : vector<8x32xf32>
    %415 = arith.mulf %406, %414 : vector<8x32xf32>
    %416 = arith.addf %413, %415 : vector<8x32xf32>
    %c5_i32 = arith.constant 5 : i32
    %cst_181 = arith.constant dense<0.000000e+00> : vector<8x96xf32>
    %417 = tpu.matmul %416, %130, %cst_181 {dimension_numbers = #tpu.dot_dimension_numbers<[1], [0], [0], [1], [0, 0, 1, 1], [], []>} : vector<8x32xf32>, vector<32x96xf32>, vector<8x96xf32> -> vector<8x96xf32>
    %418 = vector.broadcast %132 : vector<1x96xf32> to vector<8x96xf32>
    %419 = arith.addf %417, %418 : vector<8x96xf32>
    %cst_182 = arith.constant dense<0.000000e+00> : vector<8x96xf32>
    %420 = tpu.matmul %383, %131, %cst_182 {dimension_numbers = #tpu.dot_dimension_numbers<[1], [0], [0], [1], [0, 0, 1, 1], [], []>} : vector<8x32xf32>, vector<32x96xf32>, vector<8x96xf32> -> vector<8x96xf32>
    %421 = vector.broadcast %133 : vector<1x96xf32> to vector<8x96xf32>
    %422 = arith.addf %420, %421 : vector<8x96xf32>
    %423 = vector.extract_strided_slice %419 {offsets = [0, 0], sizes = [8, 32], strides = [1, 1]} : vector<8x96xf32> to vector<8x32xf32>
    %424 = vector.extract_strided_slice %422 {offsets = [0, 0], sizes = [8, 32], strides = [1, 1]} : vector<8x96xf32> to vector<8x32xf32>
    %425 = arith.addf %423, %424 : vector<8x32xf32>
    %426 = arith.negf %425 : vector<8x32xf32>
    %427 = math.exp %426 : vector<8x32xf32>
    %cst_183 = arith.constant 1.000000e+00 : f32
    %428 = vector.broadcast %cst_183 : f32 to vector<8x32xf32>
    %429 = arith.addf %428, %427 : vector<8x32xf32>
    %430 = arith.divf %428, %429 : vector<8x32xf32>
    %431 = vector.extract_strided_slice %419 {offsets = [0, 32], sizes = [8, 32], strides = [1, 1]} : vector<8x96xf32> to vector<8x32xf32>
    %432 = vector.extract_strided_slice %422 {offsets = [0, 32], sizes = [8, 32], strides = [1, 1]} : vector<8x96xf32> to vector<8x32xf32>
    %433 = arith.addf %431, %432 : vector<8x32xf32>
    %434 = arith.negf %433 : vector<8x32xf32>
    %435 = math.exp %434 : vector<8x32xf32>
    %cst_184 = arith.constant 1.000000e+00 : f32
    %436 = vector.broadcast %cst_184 : f32 to vector<8x32xf32>
    %437 = arith.addf %436, %435 : vector<8x32xf32>
    %438 = arith.divf %436, %437 : vector<8x32xf32>
    %439 = vector.extract_strided_slice %419 {offsets = [0, 64], sizes = [8, 32], strides = [1, 1]} : vector<8x96xf32> to vector<8x32xf32>
    %440 = vector.extract_strided_slice %422 {offsets = [0, 64], sizes = [8, 32], strides = [1, 1]} : vector<8x96xf32> to vector<8x32xf32>
    %441 = arith.mulf %430, %440 : vector<8x32xf32>
    %442 = arith.addf %439, %441 : vector<8x32xf32>
    %443 = math.tanh %442 : vector<8x32xf32>
    %444 = arith.subf %383, %443 : vector<8x32xf32>
    %445 = arith.mulf %438, %444 : vector<8x32xf32>
    %446 = arith.addf %443, %445 : vector<8x32xf32>
    %cst_185 = arith.constant dense<0.000000e+00> : vector<8x96xf32>
    %447 = tpu.matmul %416, %128, %cst_185 {dimension_numbers = #tpu.dot_dimension_numbers<[1], [0], [0], [1], [0, 0, 1, 1], [], []>} : vector<8x32xf32>, vector<32x96xf32>, vector<8x96xf32> -> vector<8x96xf32>
    %448 = vector.broadcast %129 : vector<1x96xf32> to vector<8x96xf32>
    %449 = arith.addf %447, %448 : vector<8x96xf32>
    %450 = arith.index_cast %c5_i32 : i32 to index
    %c0_186 = arith.constant 0 : index
    %c0_187 = arith.constant 0 : index
    %451 = vector.load %arg15[%450, %c0_186, %c0_187] : memref<8x8x32xf32, #tpu.memory_space<vmem>>, vector<1x8x32xf32>
    %452 = vector.shape_cast %451 : vector<1x8x32xf32> to vector<8x32xf32>
    %453 = vector.extract_strided_slice %449 {offsets = [0, 0], sizes = [8, 32], strides = [1, 1]} : vector<8x96xf32> to vector<8x32xf32>
    %454 = arith.addf %452, %453 : vector<8x32xf32>
    %455 = arith.negf %454 : vector<8x32xf32>
    %456 = math.exp %455 : vector<8x32xf32>
    %cst_188 = arith.constant 1.000000e+00 : f32
    %457 = vector.broadcast %cst_188 : f32 to vector<8x32xf32>
    %458 = arith.addf %457, %456 : vector<8x32xf32>
    %459 = arith.divf %457, %458 : vector<8x32xf32>
    %460 = arith.index_cast %c5_i32 : i32 to index
    %c0_189 = arith.constant 0 : index
    %c0_190 = arith.constant 0 : index
    %461 = vector.load %arg16[%460, %c0_189, %c0_190] : memref<8x8x32xf32, #tpu.memory_space<vmem>>, vector<1x8x32xf32>
    %462 = vector.shape_cast %461 : vector<1x8x32xf32> to vector<8x32xf32>
    %463 = vector.extract_strided_slice %449 {offsets = [0, 32], sizes = [8, 32], strides = [1, 1]} : vector<8x96xf32> to vector<8x32xf32>
    %464 = arith.addf %462, %463 : vector<8x32xf32>
    %465 = arith.negf %464 : vector<8x32xf32>
    %466 = math.exp %465 : vector<8x32xf32>
    %cst_191 = arith.constant 1.000000e+00 : f32
    %467 = vector.broadcast %cst_191 : f32 to vector<8x32xf32>
    %468 = arith.addf %467, %466 : vector<8x32xf32>
    %469 = arith.divf %467, %468 : vector<8x32xf32>
    %470 = arith.index_cast %c5_i32 : i32 to index
    %c0_192 = arith.constant 0 : index
    %c0_193 = arith.constant 0 : index
    %471 = vector.load %arg17[%470, %c0_192, %c0_193] : memref<8x8x32xf32, #tpu.memory_space<vmem>>, vector<1x8x32xf32>
    %472 = vector.shape_cast %471 : vector<1x8x32xf32> to vector<8x32xf32>
    %473 = vector.extract_strided_slice %449 {offsets = [0, 64], sizes = [8, 32], strides = [1, 1]} : vector<8x96xf32> to vector<8x32xf32>
    %474 = arith.mulf %459, %473 : vector<8x32xf32>
    %475 = arith.addf %472, %474 : vector<8x32xf32>
    %476 = math.tanh %475 : vector<8x32xf32>
    %477 = arith.subf %416, %476 : vector<8x32xf32>
    %478 = arith.mulf %469, %477 : vector<8x32xf32>
    %479 = arith.addf %476, %478 : vector<8x32xf32>
    %c6_i32 = arith.constant 6 : i32
    %cst_194 = arith.constant dense<0.000000e+00> : vector<8x96xf32>
    %480 = tpu.matmul %479, %130, %cst_194 {dimension_numbers = #tpu.dot_dimension_numbers<[1], [0], [0], [1], [0, 0, 1, 1], [], []>} : vector<8x32xf32>, vector<32x96xf32>, vector<8x96xf32> -> vector<8x96xf32>
    %481 = vector.broadcast %132 : vector<1x96xf32> to vector<8x96xf32>
    %482 = arith.addf %480, %481 : vector<8x96xf32>
    %cst_195 = arith.constant dense<0.000000e+00> : vector<8x96xf32>
    %483 = tpu.matmul %446, %131, %cst_195 {dimension_numbers = #tpu.dot_dimension_numbers<[1], [0], [0], [1], [0, 0, 1, 1], [], []>} : vector<8x32xf32>, vector<32x96xf32>, vector<8x96xf32> -> vector<8x96xf32>
    %484 = vector.broadcast %133 : vector<1x96xf32> to vector<8x96xf32>
    %485 = arith.addf %483, %484 : vector<8x96xf32>
    %486 = vector.extract_strided_slice %482 {offsets = [0, 0], sizes = [8, 32], strides = [1, 1]} : vector<8x96xf32> to vector<8x32xf32>
    %487 = vector.extract_strided_slice %485 {offsets = [0, 0], sizes = [8, 32], strides = [1, 1]} : vector<8x96xf32> to vector<8x32xf32>
    %488 = arith.addf %486, %487 : vector<8x32xf32>
    %489 = arith.negf %488 : vector<8x32xf32>
    %490 = math.exp %489 : vector<8x32xf32>
    %cst_196 = arith.constant 1.000000e+00 : f32
    %491 = vector.broadcast %cst_196 : f32 to vector<8x32xf32>
    %492 = arith.addf %491, %490 : vector<8x32xf32>
    %493 = arith.divf %491, %492 : vector<8x32xf32>
    %494 = vector.extract_strided_slice %482 {offsets = [0, 32], sizes = [8, 32], strides = [1, 1]} : vector<8x96xf32> to vector<8x32xf32>
    %495 = vector.extract_strided_slice %485 {offsets = [0, 32], sizes = [8, 32], strides = [1, 1]} : vector<8x96xf32> to vector<8x32xf32>
    %496 = arith.addf %494, %495 : vector<8x32xf32>
    %497 = arith.negf %496 : vector<8x32xf32>
    %498 = math.exp %497 : vector<8x32xf32>
    %cst_197 = arith.constant 1.000000e+00 : f32
    %499 = vector.broadcast %cst_197 : f32 to vector<8x32xf32>
    %500 = arith.addf %499, %498 : vector<8x32xf32>
    %501 = arith.divf %499, %500 : vector<8x32xf32>
    %502 = vector.extract_strided_slice %482 {offsets = [0, 64], sizes = [8, 32], strides = [1, 1]} : vector<8x96xf32> to vector<8x32xf32>
    %503 = vector.extract_strided_slice %485 {offsets = [0, 64], sizes = [8, 32], strides = [1, 1]} : vector<8x96xf32> to vector<8x32xf32>
    %504 = arith.mulf %493, %503 : vector<8x32xf32>
    %505 = arith.addf %502, %504 : vector<8x32xf32>
    %506 = math.tanh %505 : vector<8x32xf32>
    %507 = arith.subf %446, %506 : vector<8x32xf32>
    %508 = arith.mulf %501, %507 : vector<8x32xf32>
    %509 = arith.addf %506, %508 : vector<8x32xf32>
    %cst_198 = arith.constant dense<0.000000e+00> : vector<8x96xf32>
    %510 = tpu.matmul %479, %128, %cst_198 {dimension_numbers = #tpu.dot_dimension_numbers<[1], [0], [0], [1], [0, 0, 1, 1], [], []>} : vector<8x32xf32>, vector<32x96xf32>, vector<8x96xf32> -> vector<8x96xf32>
    %511 = vector.broadcast %129 : vector<1x96xf32> to vector<8x96xf32>
    %512 = arith.addf %510, %511 : vector<8x96xf32>
    %513 = arith.index_cast %c6_i32 : i32 to index
    %c0_199 = arith.constant 0 : index
    %c0_200 = arith.constant 0 : index
    %514 = vector.load %arg15[%513, %c0_199, %c0_200] : memref<8x8x32xf32, #tpu.memory_space<vmem>>, vector<1x8x32xf32>
    %515 = vector.shape_cast %514 : vector<1x8x32xf32> to vector<8x32xf32>
    %516 = vector.extract_strided_slice %512 {offsets = [0, 0], sizes = [8, 32], strides = [1, 1]} : vector<8x96xf32> to vector<8x32xf32>
    %517 = arith.addf %515, %516 : vector<8x32xf32>
    %518 = arith.negf %517 : vector<8x32xf32>
    %519 = math.exp %518 : vector<8x32xf32>
    %cst_201 = arith.constant 1.000000e+00 : f32
    %520 = vector.broadcast %cst_201 : f32 to vector<8x32xf32>
    %521 = arith.addf %520, %519 : vector<8x32xf32>
    %522 = arith.divf %520, %521 : vector<8x32xf32>
    %523 = arith.index_cast %c6_i32 : i32 to index
    %c0_202 = arith.constant 0 : index
    %c0_203 = arith.constant 0 : index
    %524 = vector.load %arg16[%523, %c0_202, %c0_203] : memref<8x8x32xf32, #tpu.memory_space<vmem>>, vector<1x8x32xf32>
    %525 = vector.shape_cast %524 : vector<1x8x32xf32> to vector<8x32xf32>
    %526 = vector.extract_strided_slice %512 {offsets = [0, 32], sizes = [8, 32], strides = [1, 1]} : vector<8x96xf32> to vector<8x32xf32>
    %527 = arith.addf %525, %526 : vector<8x32xf32>
    %528 = arith.negf %527 : vector<8x32xf32>
    %529 = math.exp %528 : vector<8x32xf32>
    %cst_204 = arith.constant 1.000000e+00 : f32
    %530 = vector.broadcast %cst_204 : f32 to vector<8x32xf32>
    %531 = arith.addf %530, %529 : vector<8x32xf32>
    %532 = arith.divf %530, %531 : vector<8x32xf32>
    %533 = arith.index_cast %c6_i32 : i32 to index
    %c0_205 = arith.constant 0 : index
    %c0_206 = arith.constant 0 : index
    %534 = vector.load %arg17[%533, %c0_205, %c0_206] : memref<8x8x32xf32, #tpu.memory_space<vmem>>, vector<1x8x32xf32>
    %535 = vector.shape_cast %534 : vector<1x8x32xf32> to vector<8x32xf32>
    %536 = vector.extract_strided_slice %512 {offsets = [0, 64], sizes = [8, 32], strides = [1, 1]} : vector<8x96xf32> to vector<8x32xf32>
    %537 = arith.mulf %522, %536 : vector<8x32xf32>
    %538 = arith.addf %535, %537 : vector<8x32xf32>
    %539 = math.tanh %538 : vector<8x32xf32>
    %540 = arith.subf %479, %539 : vector<8x32xf32>
    %541 = arith.mulf %532, %540 : vector<8x32xf32>
    %542 = arith.addf %539, %541 : vector<8x32xf32>
    %c7_i32 = arith.constant 7 : i32
    %cst_207 = arith.constant dense<0.000000e+00> : vector<8x96xf32>
    %543 = tpu.matmul %542, %130, %cst_207 {dimension_numbers = #tpu.dot_dimension_numbers<[1], [0], [0], [1], [0, 0, 1, 1], [], []>} : vector<8x32xf32>, vector<32x96xf32>, vector<8x96xf32> -> vector<8x96xf32>
    %544 = vector.broadcast %132 : vector<1x96xf32> to vector<8x96xf32>
    %545 = arith.addf %543, %544 : vector<8x96xf32>
    %cst_208 = arith.constant dense<0.000000e+00> : vector<8x96xf32>
    %546 = tpu.matmul %509, %131, %cst_208 {dimension_numbers = #tpu.dot_dimension_numbers<[1], [0], [0], [1], [0, 0, 1, 1], [], []>} : vector<8x32xf32>, vector<32x96xf32>, vector<8x96xf32> -> vector<8x96xf32>
    %547 = vector.broadcast %133 : vector<1x96xf32> to vector<8x96xf32>
    %548 = arith.addf %546, %547 : vector<8x96xf32>
    %549 = vector.extract_strided_slice %545 {offsets = [0, 0], sizes = [8, 32], strides = [1, 1]} : vector<8x96xf32> to vector<8x32xf32>
    %550 = vector.extract_strided_slice %548 {offsets = [0, 0], sizes = [8, 32], strides = [1, 1]} : vector<8x96xf32> to vector<8x32xf32>
    %551 = arith.addf %549, %550 : vector<8x32xf32>
    %552 = arith.negf %551 : vector<8x32xf32>
    %553 = math.exp %552 : vector<8x32xf32>
    %cst_209 = arith.constant 1.000000e+00 : f32
    %554 = vector.broadcast %cst_209 : f32 to vector<8x32xf32>
    %555 = arith.addf %554, %553 : vector<8x32xf32>
    %556 = arith.divf %554, %555 : vector<8x32xf32>
    %557 = vector.extract_strided_slice %545 {offsets = [0, 32], sizes = [8, 32], strides = [1, 1]} : vector<8x96xf32> to vector<8x32xf32>
    %558 = vector.extract_strided_slice %548 {offsets = [0, 32], sizes = [8, 32], strides = [1, 1]} : vector<8x96xf32> to vector<8x32xf32>
    %559 = arith.addf %557, %558 : vector<8x32xf32>
    %560 = arith.negf %559 : vector<8x32xf32>
    %561 = math.exp %560 : vector<8x32xf32>
    %cst_210 = arith.constant 1.000000e+00 : f32
    %562 = vector.broadcast %cst_210 : f32 to vector<8x32xf32>
    %563 = arith.addf %562, %561 : vector<8x32xf32>
    %564 = arith.divf %562, %563 : vector<8x32xf32>
    %565 = vector.extract_strided_slice %545 {offsets = [0, 64], sizes = [8, 32], strides = [1, 1]} : vector<8x96xf32> to vector<8x32xf32>
    %566 = vector.extract_strided_slice %548 {offsets = [0, 64], sizes = [8, 32], strides = [1, 1]} : vector<8x96xf32> to vector<8x32xf32>
    %567 = arith.mulf %556, %566 : vector<8x32xf32>
    %568 = arith.addf %565, %567 : vector<8x32xf32>
    %569 = math.tanh %568 : vector<8x32xf32>
    %570 = arith.subf %509, %569 : vector<8x32xf32>
    %571 = arith.mulf %564, %570 : vector<8x32xf32>
    %572 = arith.addf %569, %571 : vector<8x32xf32>
    %cst_211 = arith.constant dense<0.000000e+00> : vector<8x96xf32>
    %573 = tpu.matmul %542, %128, %cst_211 {dimension_numbers = #tpu.dot_dimension_numbers<[1], [0], [0], [1], [0, 0, 1, 1], [], []>} : vector<8x32xf32>, vector<32x96xf32>, vector<8x96xf32> -> vector<8x96xf32>
    %574 = vector.broadcast %129 : vector<1x96xf32> to vector<8x96xf32>
    %575 = arith.addf %573, %574 : vector<8x96xf32>
    %576 = arith.index_cast %c7_i32 : i32 to index
    %c0_212 = arith.constant 0 : index
    %c0_213 = arith.constant 0 : index
    %577 = vector.load %arg15[%576, %c0_212, %c0_213] : memref<8x8x32xf32, #tpu.memory_space<vmem>>, vector<1x8x32xf32>
    %578 = vector.shape_cast %577 : vector<1x8x32xf32> to vector<8x32xf32>
    %579 = vector.extract_strided_slice %575 {offsets = [0, 0], sizes = [8, 32], strides = [1, 1]} : vector<8x96xf32> to vector<8x32xf32>
    %580 = arith.addf %578, %579 : vector<8x32xf32>
    %581 = arith.negf %580 : vector<8x32xf32>
    %582 = math.exp %581 : vector<8x32xf32>
    %cst_214 = arith.constant 1.000000e+00 : f32
    %583 = vector.broadcast %cst_214 : f32 to vector<8x32xf32>
    %584 = arith.addf %583, %582 : vector<8x32xf32>
    %585 = arith.divf %583, %584 : vector<8x32xf32>
    %586 = arith.index_cast %c7_i32 : i32 to index
    %c0_215 = arith.constant 0 : index
    %c0_216 = arith.constant 0 : index
    %587 = vector.load %arg16[%586, %c0_215, %c0_216] : memref<8x8x32xf32, #tpu.memory_space<vmem>>, vector<1x8x32xf32>
    %588 = vector.shape_cast %587 : vector<1x8x32xf32> to vector<8x32xf32>
    %589 = vector.extract_strided_slice %575 {offsets = [0, 32], sizes = [8, 32], strides = [1, 1]} : vector<8x96xf32> to vector<8x32xf32>
    %590 = arith.addf %588, %589 : vector<8x32xf32>
    %591 = arith.negf %590 : vector<8x32xf32>
    %592 = math.exp %591 : vector<8x32xf32>
    %cst_217 = arith.constant 1.000000e+00 : f32
    %593 = vector.broadcast %cst_217 : f32 to vector<8x32xf32>
    %594 = arith.addf %593, %592 : vector<8x32xf32>
    %595 = arith.divf %593, %594 : vector<8x32xf32>
    %596 = arith.index_cast %c7_i32 : i32 to index
    %c0_218 = arith.constant 0 : index
    %c0_219 = arith.constant 0 : index
    %597 = vector.load %arg17[%596, %c0_218, %c0_219] : memref<8x8x32xf32, #tpu.memory_space<vmem>>, vector<1x8x32xf32>
    %598 = vector.shape_cast %597 : vector<1x8x32xf32> to vector<8x32xf32>
    %599 = vector.extract_strided_slice %575 {offsets = [0, 64], sizes = [8, 32], strides = [1, 1]} : vector<8x96xf32> to vector<8x32xf32>
    %600 = arith.mulf %585, %599 : vector<8x32xf32>
    %601 = arith.addf %598, %600 : vector<8x32xf32>
    %602 = math.tanh %601 : vector<8x32xf32>
    %603 = arith.subf %542, %602 : vector<8x32xf32>
    %604 = arith.mulf %595, %603 : vector<8x32xf32>
    %605 = arith.addf %602, %604 : vector<8x32xf32>
    %c7_i32_220 = arith.constant 7 : i32
    %cst_221 = arith.constant dense<0.000000e+00> : vector<8x96xf32>
    %606 = tpu.matmul %605, %130, %cst_221 {dimension_numbers = #tpu.dot_dimension_numbers<[1], [0], [0], [1], [0, 0, 1, 1], [], []>} : vector<8x32xf32>, vector<32x96xf32>, vector<8x96xf32> -> vector<8x96xf32>
    %607 = vector.broadcast %132 : vector<1x96xf32> to vector<8x96xf32>
    %608 = arith.addf %606, %607 : vector<8x96xf32>
    %cst_222 = arith.constant dense<0.000000e+00> : vector<8x96xf32>
    %609 = tpu.matmul %572, %131, %cst_222 {dimension_numbers = #tpu.dot_dimension_numbers<[1], [0], [0], [1], [0, 0, 1, 1], [], []>} : vector<8x32xf32>, vector<32x96xf32>, vector<8x96xf32> -> vector<8x96xf32>
    %610 = vector.broadcast %133 : vector<1x96xf32> to vector<8x96xf32>
    %611 = arith.addf %609, %610 : vector<8x96xf32>
    %612 = vector.extract_strided_slice %608 {offsets = [0, 0], sizes = [8, 32], strides = [1, 1]} : vector<8x96xf32> to vector<8x32xf32>
    %613 = vector.extract_strided_slice %611 {offsets = [0, 0], sizes = [8, 32], strides = [1, 1]} : vector<8x96xf32> to vector<8x32xf32>
    %614 = arith.addf %612, %613 : vector<8x32xf32>
    %615 = arith.negf %614 : vector<8x32xf32>
    %616 = math.exp %615 : vector<8x32xf32>
    %cst_223 = arith.constant 1.000000e+00 : f32
    %617 = vector.broadcast %cst_223 : f32 to vector<8x32xf32>
    %618 = arith.addf %617, %616 : vector<8x32xf32>
    %619 = arith.divf %617, %618 : vector<8x32xf32>
    %620 = vector.extract_strided_slice %608 {offsets = [0, 32], sizes = [8, 32], strides = [1, 1]} : vector<8x96xf32> to vector<8x32xf32>
    %621 = vector.extract_strided_slice %611 {offsets = [0, 32], sizes = [8, 32], strides = [1, 1]} : vector<8x96xf32> to vector<8x32xf32>
    %622 = arith.addf %620, %621 : vector<8x32xf32>
    %623 = arith.negf %622 : vector<8x32xf32>
    %624 = math.exp %623 : vector<8x32xf32>
    %cst_224 = arith.constant 1.000000e+00 : f32
    %625 = vector.broadcast %cst_224 : f32 to vector<8x32xf32>
    %626 = arith.addf %625, %624 : vector<8x32xf32>
    %627 = arith.divf %625, %626 : vector<8x32xf32>
    %628 = vector.extract_strided_slice %608 {offsets = [0, 64], sizes = [8, 32], strides = [1, 1]} : vector<8x96xf32> to vector<8x32xf32>
    %629 = vector.extract_strided_slice %611 {offsets = [0, 64], sizes = [8, 32], strides = [1, 1]} : vector<8x96xf32> to vector<8x32xf32>
    %630 = arith.mulf %619, %629 : vector<8x32xf32>
    %631 = arith.addf %628, %630 : vector<8x32xf32>
    %632 = math.tanh %631 : vector<8x32xf32>
    %633 = arith.subf %572, %632 : vector<8x32xf32>
    %634 = arith.mulf %627, %633 : vector<8x32xf32>
    %635 = arith.addf %632, %634 : vector<8x32xf32>
    %c0_225 = arith.constant 0 : index
    %c0_226 = arith.constant 0 : index
    %636 = vector.load %arg11[%c0_225, %c0_226] : memref<32x32xf32, #tpu.memory_space<vmem>>, vector<32x32xf32>
    %cst_227 = arith.constant dense<0.000000e+00> : vector<8x32xf32>
    %637 = tpu.matmul %635, %636, %cst_227 {dimension_numbers = #tpu.dot_dimension_numbers<[1], [0], [0], [1], [0, 0, 1, 1], [], []>} : vector<8x32xf32>, vector<32x32xf32>, vector<8x32xf32> -> vector<8x32xf32>
    %c0_228 = arith.constant 0 : index
    %c0_229 = arith.constant 0 : index
    %638 = vector.load %arg12[%c0_228, %c0_229] : memref<1x32xf32, #tpu.memory_space<vmem>>, vector<1x32xf32>
    %639 = vector.broadcast %638 : vector<1x32xf32> to vector<8x32xf32>
    %640 = arith.addf %637, %639 : vector<8x32xf32>
    %c0_230 = arith.constant 0 : index
    %c0_231 = arith.constant 0 : index
    %641 = vector.load %arg13[%c0_230, %c0_231] : memref<8x32xf32, #tpu.memory_space<vmem>>, vector<8x32xf32>
    tpu.vector_store %arg13[%c0_230, %c0_231], %640 {strides = array<i32>} : memref<8x32xf32, #tpu.memory_space<vmem>>, vector<8x32xf32>,
    return
  }
}

</mosaic_0001>

<bundles_post_ra>
// kernel: tpu_custom_call.1
= control target key start
LH: loop header
LB: loop body
LE: loop exit
PB: predicated region body
PF: predicated region fallthrough
CT: control target
= control target key end

     0   :  { %18 = vsyncpa [#allocation7], 0  ;;  %s4794_s0 = inlined_call_operand.hbm [shape: f32[8,8,16], index: 0, kind: input, shape index: {}]   ;;  %s4795_s1 = inlined_call_operand.hbm [shape: f32[16,32], index: 1, kind: input, shape index: {}]   ;;  %s4796_s2 = inlined_call_operand.vmem [shape: f32[1,32], index: 2, kind: input, shape index: {}]   ;;  %s4797_s3 = inlined_call_operand.hbm [shape: f32[32,96], index: 3, kind: input, shape index: {}]   ;;  %s4798_s4 = inlined_call_operand.hbm [shape: f32[32,96], index: 4, kind: input, shape index: {}]   ;;  %s4799_s5 = inlined_call_operand.vmem [shape: f32[1,96], index: 5, kind: input, shape index: {}]   ;;  %s4800_s6 = inlined_call_operand.vmem [shape: f32[1,96], index: 6, kind: input, shape index: {}]   ;;  %s4801_s7 = inlined_call_operand.hbm [shape: f32[32,96], index: 7, kind: input, shape index: {}]   ;;  %s4802_s8 = inlined_call_operand.hbm [shape: f32[32,96], index: 8, kind: input, shape index: {}]   ;;  %s4803_s9 = inlined_call_operand.vmem [shape: f32[1,96], index: 9, kind: input, shape index: {}]   ;;  %s4804_s10 = inlined_call_operand.vmem [shape: f32[1,96], index: 10, kind: input, shape index: {}]   ;;  %s4805_s11 = inlined_call_operand.hbm [shape: f32[32,32], index: 11, kind: input, shape index: {}]   ;;  %s4806_s12 = inlined_call_operand.vmem [shape: f32[1,32], index: 12, kind: input, shape index: {}]   ;;  %s4807_s13 = inlined_call_operand.hbm [shape: f32[8,32], index: 13, kind: output, shape index: {}]  }
   0x1   :  { %19 = vsyncpa [#allocation10], 0 }
   0x2   :  { %20 = vsyncpa [#allocation13], 0 }
   0x3   :  { %21 = vsyncpa [#allocation16], 0 }
   0x4   :  { %22 = vsyncpa [#allocation8], 0  ;;  %s4000_s25 = smov [#allocation9]   ;;  %s4001_s27 = smov [#allocation12]  }
   0x5   :  { %s40_s26 = sshll.u32 %s4000_s25, 4  ;;  %s66_s28 = sshll.u32 %s4001_s27, 4  ;;  %s41_s26 = int_to_ptr.vmem [resolvable:$true] %s40_s26  ;;  %s67_s28 = int_to_ptr.vmem [resolvable:$true] %s66_s28 }
   0x6   :  { %s3838_s29 = scalar_lea.vmem %s41_s26, 256  ;;  %p3843_p1 = scmp.lt.s32.totalorder %s41_s26, %s41_s26 }
   0x7   :  { %p3839_p0 = scmp.ne.s32.totalorder %s41_s26, %s3838_s29  ;;  %p3844_p2 = scmp.lt.s32.totalorder %s3838_s29, %s3838_s29 }
   0x9   :  { %p3845_p3 = por %p3844_p2, %p3843_p1 }
   0xb   :  { %p3846_p4 = pnand %p3845_p3, %p3839_p0 }
   0xd   :  { %3849 = shalt.err (!%p3846_p4)
}
   0xe   :  { %s4002_s30 = smov 128   ;;  %s4003_s14 = smov 8  }
   0xf   :  { %46 = dma.hbm_to_vmem [thread:$0]  %s4795_s1, 256, %s41_s26, [#allocation10], %s4002_s30, %s4002_s30, %s4003_s14  }
  0x10   :  { %s3858_s17 = scalar_lea.vmem %s67_s28, 512  ;;  %p3863_p6 = scmp.lt.s32.totalorder %s67_s28, %s67_s28 }
  0x11   :  { %p3859_p5 = scmp.ne.s32.totalorder %s67_s28, %s3858_s17  ;;  %p3864_p7 = scmp.lt.s32.totalorder %s3858_s17, %s3858_s17 }
  0x13   :  { %p3865_p8 = por %p3864_p7, %p3863_p6 }
  0x15   :  { %p3866_p9 = pnand %p3865_p8, %p3859_p5 }
  0x17   :  { %3869 = shalt.err (!%p3866_p9)
}
  0x18   :  { %72 = dma.hbm_to_vmem [thread:$0]  %s4798_s4, 512, %s67_s28, [#allocation13], %s4002_s30, %s4002_s30, %s4003_s14  }
  0x19   :  { %s4004_s20 = smov [#allocation15]   ;;  %s4005_s22 = smov [#allocation6]  }
  0x1a   :  { %s94_s21 = sshll.u32 %s4004_s20, 4  ;;  %s28_s23 = sshll.u32 %s4005_s22, 4  ;;  %s95_s21 = int_to_ptr.vmem [resolvable:$true] %s94_s21  ;;  %s29_s23 = int_to_ptr.vmem [resolvable:$true] %s28_s23 }
  0x1b   :  { %s3878_s1 = scalar_lea.vmem %s95_s21, 512  ;;  %p3883_p11 = scmp.lt.s32.totalorder %s95_s21, %s95_s21 }
  0x1c   :  { %p3879_p10 = scmp.ne.s32.totalorder %s95_s21, %s3878_s1  ;;  %p3884_p12 = scmp.lt.s32.totalorder %s3878_s1, %s3878_s1 }
  0x1e   :  { %p3885_p13 = por %p3884_p12, %p3883_p11 }
  0x20   :  { %p3886_p0 = pnand %p3885_p13, %p3879_p10 }
  0x22   :  { %3889 = shalt.err (!%p3886_p0)
}
  0x23   :  { %100 = dma.hbm_to_vmem [thread:$0]  %s4802_s8, 512, %s95_s21, [#allocation16], %s4002_s30, %s4002_s30, %s4003_s14  }
  0x24   :  { %s3898_s4 = scalar_lea.vmem %s29_s23, 1024  ;;  %p3903_p2 = scmp.lt.s32.totalorder %s29_s23, %s29_s23 }
  0x25   :  { %p3899_p1 = scmp.ne.s32.totalorder %s29_s23, %s3898_s4  ;;  %p3904_p3 = scmp.lt.s32.totalorder %s3898_s4, %s3898_s4 }
  0x27   :  { %p3905_p4 = por %p3904_p3, %p3903_p2 }
  0x29   :  { %p3906_p5 = pnand %p3905_p4, %p3899_p1 }
  0x2b   :  { %3909 = shalt.err (!%p3906_p5)
}
  0x2c   :  { %34 = dma.hbm_to_vmem [thread:$0]  %s4794_s0, 1024, %s29_s23, [#allocation7], %s4002_s30, %s4002_s30, %s4003_s14  }
  0x2d   :  { %s4006_s28 = smov [#allocation11]   ;;  %s4007_s15 = smov [#allocation14]  }
  0x2e   :  { %s54_s29 = sshll.u32 %s4006_s28, 4  ;;  %s82_s16 = sshll.u32 %s4007_s15, 4  ;;  %s55_s29 = int_to_ptr.vmem [resolvable:$true] %s54_s29  ;;  %s83_s16 = int_to_ptr.vmem [resolvable:$true] %s82_s16 }
  0x2f   :  { %s3918_s8 = scalar_lea.vmem %s55_s29, 512  ;;  %p3923_p7 = scmp.lt.s32.totalorder %s55_s29, %s55_s29 }
  0x30   :  { %p3919_p6 = scmp.ne.s32.totalorder %s55_s29, %s3918_s8  ;;  %p3924_p8 = scmp.lt.s32.totalorder %s3918_s8, %s3918_s8 }
  0x32   :  { %p3925_p9 = por %p3924_p8, %p3923_p7 }
  0x34   :  { %p3926_p10 = pnand %p3925_p9, %p3919_p6 }
  0x36   :  { %3929 = shalt.err (!%p3926_p10)
}
  0x37   :  { %60 = dma.hbm_to_vmem [thread:$0]  %s4797_s3, 512, %s55_s29, [#allocation10], %s4002_s30, %s4002_s30, %s4003_s14  }
  0x38   :  { %s3938_s0 = scalar_lea.vmem %s83_s16, 512  ;;  %p3943_p12 = scmp.lt.s32.totalorder %s83_s16, %s83_s16 }
  0x39   :  { %p3939_p11 = scmp.ne.s32.totalorder %s83_s16, %s3938_s0  ;;  %p3944_p13 = scmp.lt.s32.totalorder %s3938_s0, %s3938_s0 }
  0x3b   :  { %p3945_p0 = por %p3944_p13, %p3943_p12 }
  0x3d   :  { %p3946_p1 = pnand %p3945_p0, %p3939_p11 }
  0x3f   :  { %3949 = shalt.err (!%p3946_p1)
}
  0x40   :  { %88 = dma.hbm_to_vmem [thread:$0]  %s4801_s7, 512, %s83_s16, [#allocation13], %s4002_s30, %s4002_s30, %s4003_s14  }
  0x41   :  { %s4008_s21 = smov [#allocation17]  }
  0x42   :  { %s110_s22 = sshll.u32 %s4008_s21, 4  ;;  %s111_s22 = int_to_ptr.vmem [resolvable:$true] %s110_s22 }
  0x43   :  { %s3958_s23 = scalar_lea.vmem %s111_s22, 512  ;;  %p3963_p3 = scmp.lt.s32.totalorder %s111_s22, %s111_s22 }
  0x44   :  { %p3959_p2 = scmp.ne.s32.totalorder %s111_s22, %s3958_s23  ;;  %p3964_p4 = scmp.lt.s32.totalorder %s3958_s23, %s3958_s23 }
  0x46   :  { %p3965_p5 = por %p3964_p4, %p3963_p3 }
  0x48   :  { %p3966_p6 = pnand %p3965_p5, %p3959_p2 }
  0x4a   :  { %3969 = shalt.err (!%p3966_p6)
}
  0x4b   :  { %116 = dma.hbm_to_vmem [thread:$0]  %s4805_s11, 512, %s111_s22, [#allocation16], %s4002_s30, %s4002_s30, %s4003_s14  }
  0x4c   :  { %3990 = dma.done.wait [#allocation7], 1024  }
  0x4d   :  { %3991 = vsyncadd [#allocation7], 4294966272 }
  0x4e   :  { %3992 = dma.done.wait [#allocation10], 768  }
  0x4f   :  { %3993 = vsyncadd [#allocation10], 4294966528 }
  0x50   :  { %3994 = dma.done.wait [#allocation13], 1024  }
  0x51   :  { %3995 = vsyncadd [#allocation13], 4294966272 }
  0x52   :  { %3996 = dma.done.wait [#allocation16], 1024  }
  0x53   :  { %3997 = vsyncadd [#allocation16], 4294966272  ;;  %vm157_vm0 = vcmask 130048   ;;  %v149_v0 = vld [vmem:[#allocation9 + $0x8] sm:$0xff]  ;;  %v148_v1 = vld [vmem:[#allocation9] sm:$0xff]  ;;  %v4009_v15 = vmov 0.0  }
  0x54   :  { %v140_v2 = vld [vmem:[#allocation6] sm:$0xff]  ;;  %3361 = vmatprep.subr.mxu0 %v149_v0  ;;  %v141_v3 = vld [vmem:[#allocation6 + $0x8] sm:$0xff]  ;;  %v142_v4 = vld [vmem:[#allocation6 + $0x10] sm:$0xff]  ;;  %vm4010_vm1 = vmmov 0   ;;  %vm306_vm2 = vcmask 261120   ;;  %vm436_vm3 = vcmask 785408  }
  0x55   :  { %3365 = vmatprep.mubr.msk.f32.mxu0 %vm157_vm0, %v140_v2  ;;  %3362 = vmatpush3.msra.mxu0 %v149_v0  ;;  %v143_v5 = vld [vmem:[#allocation6 + $0x18] sm:$0xff]  ;;  %v144_v6 = vld [vmem:[#allocation6 + $0x20] sm:$0xff]  ;;  %v145_v7 = vld [vmem:[#allocation6 + $0x28] sm:$0xff]  ;;  %vm462_vm4 = vcmask 1041409   ;;  %vm465_vm5 = vcmask 1042434   ;;  %vm468_vm6 = vcmask 1043459  }
  0x56   :  { %3363 = vmatprep.subr.mxu0 %v148_v1  ;;  %v146_v8 = vld [vmem:[#allocation6 + $0x30] sm:$0xff]  ;;  %v147_v9 = vld [vmem:[#allocation6 + $0x38] sm:$0xff]  ;;  %v298_v10 = vld [vmem:[#allocation11 + $0x18] sm:$0xff]  ;;  %vm471_vm7 = vcmask 1044484   ;;  %vm474_vm8 = vcmask 1045509   ;;  %vm477_vm9 = vcmask 1046534  }
  0x57   :  { %3364 = vmatpush3.msra.mxu0 %v148_v1  ;;  %3377 = vmatprep.subr.mxu1 %v298_v10  ;;  %v297_v11 = vld [vmem:[#allocation11 + $0x10] sm:$0xff]  ;;  %v296_v12 = vld [vmem:[#allocation11 + $0x8] sm:$0xff]  ;;  %v295_v13 = vld [vmem:[#allocation11] sm:$0xff]  ;;  %vm480_vm10 = vcmask 1047559   ;;  %s4011_s24 = smov 64   ;;  %s4012_s25 = smov 96  }
  0x58   :  { %3366 = vmatmul.mubr.msk.f32.vlgmr.msra.gmra.mxu0 %vm157_vm0, %v141_v3  ;;  %3378 = vmatpush3.msra.mxu1 %v298_v10  ;;  %v4135_v14 = vld [vmem:[#allocation12 + $0x18] sm:$0xff]  ;;  %v4138_v16 = vld [vmem:[#allocation12 + $0x10] sm:$0xff]  ;;  %v4145_v17 = vld [vmem:[#allocation12 + $0x8] sm:$0xff]  ;;  %s4013_s29 = smov 32   ;;  %s4014_s0 = smov [#allocation18]  }
  0x59   :  { %3368 = vmatprep.mubr.msk.f32.mxu0 %vm157_vm0, %v142_v4  ;;  %3379 = vmatprep.subr.mxu1 %v297_v11  ;;  %v4149_v18 = vld [vmem:[#allocation12] sm:$0xff]  ;;  %v3145_v19 = vld [vmem:[%s4796_s2] ss:$0 sm:$0xff]  ;;  %v4173_v46 = vld [vmem:[#allocation15 + $0x18] sm:$0xff]  ;;  %s3133_s19 = sshll.u32 %s4014_s0, 4  ;;  %s3134_s19 = int_to_ptr.vmem [resolvable:$true] %s3133_s19 }
  0x5a   :  { %3380 = vmatpush3.msra.mxu1 %v297_v11  ;;  %3397 = vmatprep.subr.mxu0 %v4009_v15  ;;  %v4175_v47 = vld [vmem:[#allocation15 + $0x10] sm:$0xff]  ;;  %v4179_v48 = vld [vmem:[#allocation15 + $0x8] sm:$0xff]  ;;  %v4183_v49 = vld [vmem:[#allocation15] sm:$0xff]  ;;  %s3970_s20 = scalar_lea.vmem %s3134_s19, 128  ;;  %p3975_p8 = scmp.lt.s32.totalorder %s3134_s19, %s3134_s19 }
  0x5b   :  { %3381 = vmatprep.subr.mxu1 %v296_v12  ;;  %3398 = vmatpush3.msra.mxu0 %v4135_v14  ;;  %v3154_v50 = vld [vmem:[%s4799_s5] ss:$0 sm:$0xff]  ;;  %p3971_p7 = scmp.ne.s32.totalorder %s3134_s19, %s3970_s20  ;;  %p3976_p9 = scmp.lt.s32.totalorder %s3970_s20, %s3970_s20 }
  0x5c   :  { %3369 = vmatmul.mubr.msk.f32.gmra.mxu0 %vm157_vm0, %v143_v5  ;;  %3382 = vmatpush3.msra.mxu1 %v296_v12 }
  0x5d   :  { %3371 = vmatprep.mubr.msk.f32.mxu0 %vm157_vm0, %v144_v6  ;;  %3383 = vmatprep.subr.mxu1 %v295_v13  ;;  %p3977_p10 = por %p3976_p9, %p3975_p8 }
  0x5e   :  { %3384 = vmatpush3.msra.mxu1 %v295_v13  ;;  %3399 = vmatprep.subr.mxu0 %v4009_v15 }
  0x5f   :  { %3408 = vmatprep.subr.mxu1 %v4009_v15  ;;  %3400 = vmatpush3.msra.mxu0 %v4138_v16  ;;  %p3978_p11 = pnand %p3977_p10, %p3971_p7 }
  0x60   :  { %3372 = vmatmul.mubr.msk.f32.gmra.mxu0 %vm157_vm0, %v145_v7  ;;  %3401 = vmatprep.subr.mxu0 %v4009_v15 }
  0x61   :  { %3374 = vmatprep.mubr.msk.f32.mxu0 %vm157_vm0, %v146_v8  ;;  %3402 = vmatpush3.msra.mxu0 %v4145_v17 }
  0x62   :  { %3403 = vmatprep.subr.mxu0 %v4009_v15 }
  0x63   :  { %3404 = vmatpush3.msra.mxu0 %v4149_v18 }
  0x64   :  { %3375 = vmatmul.mubr.msk.f32.gmra.mxu0 %vm157_vm0, %v147_v9  ;;  %3419 = vmatprep.subr.mxu0 %v4009_v15 }
  0x65   :  { %3405 = vmatprep.mubr.msk.f32.mxu0 %vm4010_vm1, %v4009_v15 }
  0x68   :  { %3406 = vmatmul.mubr.f32.vlgmr.msra.gmra.mxu0 %v4009_v15 }
  0x69   :  { %3427 = vmatprep.mubr.msk.f32.mxu0 %vm4010_vm1, %v4009_v15  ;;  %3420 = vmatpush3.msra.mxu0 %v4173_v46 }
  0x6a   :  { %3421 = vmatprep.subr.mxu0 %v4009_v15 }
  0x6b   :  { %3422 = vmatpush3.msra.mxu0 %v4175_v47 }
  0x6c   :  { %3423 = vmatprep.subr.mxu0 %v4009_v15 }
  0x6d   :  { %3424 = vmatpush3.msra.mxu0 %v4179_v48 }
  0x6e   :  { %3425 = vmatprep.subr.mxu0 %v4009_v15 }
  0x6f   :  { %3426 = vmatpush3.msra.mxu0 %v4183_v49 }
  0x70   :  { %3428 = vmatmul.mubr.f32.vlgmr.msra.gmra.mxu0 %v4009_v15  ;;  %3441 = vmatprep.subr.mxu0 %v4009_v15 }
  0x71   :  { %3449 = vmatprep.mubr.msk.f32.mxu0 %vm4010_vm1, %v4009_v15 }
 0x118   :  { %v3367_v20 = vpop.f32.mrf.mxu0 }
 0x119   :  { %v254_v21 = vadd.f32 %v3367_v20, %v3145_v19 }
 0x11a   :  { %v248_v22 = vpop.f32.mrf.mxu0 }
 0x11b   :  { %v249_v23 = vadd.f32 %v3145_v19, %v248_v22  ;;  %v288_v26 = vmax.f32 %v254_v21, 0.0 }
 0x11c   :  { %v3370_v24 = vpop.f32.mrf.mxu0 }
 0x11d   :  { %v287_v25 = vmax.f32 %v249_v23, 0.0  ;;  %v264_v27 = vadd.f32 %v3370_v24, %v3145_v19 }
 0x11e   :  { %v258_v28 = vpop.f32.mrf.mxu0 }
 0x11f   :  { %v259_v29 = vadd.f32 %v3145_v19, %v258_v28  ;;  %3385 = vmatprep.mubr.msk.f32.mxu1 %vm306_vm2, %v287_v25  ;;  %v290_v32 = vmax.f32 %v264_v27, 0.0 }
 0x120   :  { %v3373_v30 = vpop.f32.mrf.mxu0  ;;  %3386 = vmatmul.mubr.msk.f32.vlgmr.msra.gmra.mxu1 %vm306_vm2, %v288_v26 }
 0x121   :  { %v289_v31 = vmax.f32 %v259_v29, 0.0  ;;  %v274_v33 = vadd.f32 %v3373_v30, %v3145_v19 }
 0x122   :  { %v268_v34 = vpop.f32.mrf.mxu0 }
 0x123   :  { %v269_v35 = vadd.f32 %v3145_v19, %v268_v34  ;;  %3388 = vmatprep.mubr.msk.f32.mxu1 %vm306_vm2, %v289_v31  ;;  %v292_v38 = vmax.f32 %v274_v33, 0.0 }
 0x124   :  { %v3376_v36 = vpop.f32.mrf.mxu0  ;;  %3389 = vmatmul.mubr.msk.f32.gmra.mxu1 %vm306_vm2, %v290_v32 }
 0x125   :  { %v291_v37 = vmax.f32 %v269_v35, 0.0  ;;  %v284_v39 = vadd.f32 %v3376_v36, %v3145_v19 }
 0x126   :  { %v278_v40 = vpop.f32.mrf.mxu0 }
 0x127   :  { %v279_v41 = vadd.f32 %v3145_v19, %v278_v40  ;;  %3391 = vmatprep.mubr.msk.f32.mxu1 %vm306_vm2, %v291_v37  ;;  %v294_v43 = vmax.f32 %v284_v39, 0.0  ;;  %v4210_v37 = vld [vmem:[%s4800_s6] ss:$0 sm:$0xff] }
 0x128   :  { %3392 = vmatmul.mubr.msk.f32.gmra.mxu1 %vm306_vm2, %v292_v38  ;;  %v4171_v44 = vpop.f32.mrf.mxu0 }
 0x129   :  { %v293_v42 = vmax.f32 %v279_v41, 0.0 }
 0x12a   :  { %v3407_v45 = vpop.f32.mrf.mxu0 }
 0x12b   :  { %3394 = vmatprep.mubr.msk.f32.mxu1 %vm306_vm2, %v293_v42 }
 0x12c   :  { %3395 = vmatmul.mubr.msk.f32.gmra.mxu1 %vm306_vm2, %v294_v43 }
 0x12d   :  { %3416 = vmatprep.mubr.msk.f32.mxu1 %vm4010_vm1, %v4009_v15 }
 0x1e0   :  { %v3387_v51 = vpop.f32.mrf.mxu1 }
 0x1e1   :  { %v403_v52 = vadd.f32 %v3387_v51, %v3154_v50 }
 0x1e2   :  { %v397_v53 = vpop.f32.mrf.mxu1 }
 0x1e3   :  { %438 = vst.msk [vmem:[#allocation2 + $0x8] sm:$0xff] %vm436_vm3, %v403_v52  ;;  %v398_v54 = vadd.f32 %v3154_v50, %v397_v53 }
 0x1e4   :  { %v3390_v55 = vpop.f32.mrf.mxu1 }
 0x1e5   :  { %437 = vst.msk [vmem:[#allocation2] sm:$0xff] %vm436_vm3, %v398_v54  ;;  %v413_v56 = vadd.f32 %v3390_v55, %v3154_v50 }
 0x1e6   :  { %v407_v57 = vpop.f32.mrf.mxu1 }
 0x1e7   :  { %440 = vst.msk [vmem:[#allocation2 + $0x18] sm:$0xff] %vm436_vm3, %v413_v56  ;;  %v408_v58 = vadd.f32 %v3154_v50, %v407_v57 }
 0x1e8   :  { %v3393_v59 = vpop.f32.mrf.mxu1 }
 0x1e9   :  { %439 = vst.msk [vmem:[#allocation2 + $0x10] sm:$0xff] %vm436_vm3, %v408_v58  ;;  %v423_v60 = vadd.f32 %v3393_v59, %v3154_v50  ;;  %v4217_v59 = vadd.f32 %v4210_v37, %v4171_v44 }
 0x1ea   :  { %v417_v61 = vpop.f32.mrf.mxu1  ;;  %v446_v62 = vld [vmem:[#allocation2 + $0x8] sm:$0x1]  ;;  %v493_v63 = vld [vmem:[#allocation2 + $0x9] sm:$0x1]  ;;  %v536_v0 = vld [vmem:[#allocation2 + $0xa] sm:$0x1] }
 0x1eb   :  { %442 = vst.msk [vmem:[#allocation2 + $0x28] sm:$0xff] %vm436_vm3, %v423_v60  ;;  %v418_v1 = vadd.f32 %v3154_v50, %v417_v61  ;;  %v461_v3 = vrot.slane %v446_v62, 7  ;;  %v508_v6 = vrot.slane %v493_v63, 7  ;;  %v551_v7 = vrot.slane %v536_v0, 7  ;;  %v579_v11 = vld [vmem:[#allocation2 + $0xb] sm:$0x1] }
 0x1ec   :  { %v3396_v2 = vpop.f32.mrf.mxu1  ;;  %v445_v5 = vld [vmem:[#allocation2] sm:$0x1]  ;;  %v492_v10 = vld [vmem:[#allocation2 + $0x1] sm:$0x1]  ;;  %v535_v19 = vld [vmem:[#allocation2 + $0x2] sm:$0x1] }
 0x1ed   :  { %441 = vst.msk [vmem:[#allocation2 + $0x20] sm:$0xff] %vm436_vm3, %v418_v1  ;;  %v433_v4 = vadd.f32 %v3396_v2, %v3154_v50  ;;  %v463_v22 = vsel %vm462_vm4, %v461_v3, %v445_v5  ;;  %v509_v31 = vsel %vm462_vm4, %v508_v6, %v492_v10  ;;  %v552_v33 = vsel %vm462_vm4, %v551_v7, %v535_v19  ;;  %v578_v39 = vld [vmem:[#allocation2 + $0x3] sm:$0x1] }
 0x1ee   :  { %v427_v8 = vpop.f32.mrf.mxu1  ;;  %v448_v9 = vld [vmem:[#allocation2 + $0x18] sm:$0x1]  ;;  %v495_v13 = vld [vmem:[#allocation2 + $0x19] sm:$0x1]  ;;  %v538_v20 = vld [vmem:[#allocation2 + $0x1a] sm:$0x1] }
 0x1ef   :  { %444 = vst.msk [vmem:[#allocation2 + $0x38] sm:$0xff] %vm436_vm3, %v433_v4  ;;  %v428_v12 = vadd.f32 %v3154_v50, %v427_v8  ;;  %v467_v26 = vrot.slane %v448_v9, 5  ;;  %v512_v32 = vrot.slane %v495_v13, 5  ;;  %v555_v34 = vrot.slane %v538_v20, 5  ;;  %v581_v56 = vld [vmem:[#allocation2 + $0x1b] sm:$0x1] }
 0x1f0   :  { %v447_v21 = vld [vmem:[#allocation2 + $0x10] sm:$0x1]  ;;  %v494_v23 = vld [vmem:[#allocation2 + $0x11] sm:$0x1]  ;;  %v537_v24 = vld [vmem:[#allocation2 + $0x12] sm:$0x1] }
 0x1f1   :  { %443 = vst.msk [vmem:[#allocation2 + $0x30] sm:$0xff] %vm436_vm3, %v428_v12  ;;  %v464_v25 = vrot.slane %v447_v21, 6  ;;  %v510_v27 = vrot.slane %v494_v23, 6  ;;  %v553_v28 = vrot.slane %v537_v24, 6  ;;  %v594_v40 = vrot.slane %v579_v11, 7 }
 0x1f2   :  { %v450_v29 = vld [vmem:[#allocation2 + $0x28] sm:$0x1]  ;;  %v497_v30 = vld [vmem:[#allocation2 + $0x29] sm:$0x1]  ;;  %v540_v53 = vld [vmem:[#allocation2 + $0x2a] sm:$0x1] }
 0x1f3   :  { %v466_v35 = vsel %vm465_vm5, %v464_v25, %v463_v22  ;;  %v473_v36 = vrot.slane %v450_v29, 3  ;;  %v511_v38 = vsel %vm465_vm5, %v510_v27, %v509_v31  ;;  %v554_v45 = vsel %vm465_vm5, %v553_v28, %v552_v33  ;;  %v580_v55 = vld [vmem:[#allocation2 + $0x13] sm:$0x1]  ;;  %v583_v63 = vld [vmem:[#allocation2 + $0x2b] sm:$0x1] }
 0x1f4   :  { %v449_v41 = vld [vmem:[#allocation2 + $0x20] sm:$0x1]  ;;  %v496_v42 = vld [vmem:[#allocation2 + $0x21] sm:$0x1]  ;;  %v539_v43 = vld [vmem:[#allocation2 + $0x22] sm:$0x1]  ;;  %v469_v58 = vsel %vm468_vm6, %v467_v26, %v466_v35  ;;  %v513_v61 = vsel %vm468_vm6, %v512_v32, %v511_v38  ;;  %v556_v62 = vsel %vm468_vm6, %v555_v34, %v554_v45  ;;  %v595_v11 = vsel %vm462_vm4, %v594_v40, %v578_v39 }
 0x1f5   :  { %v470_v50 = vrot.slane %v449_v41, 4  ;;  %v514_v51 = vrot.slane %v496_v42, 4  ;;  %v516_v52 = vrot.slane %v497_v30, 3  ;;  %v557_v54 = vrot.slane %v539_v43, 4  ;;  %v582_v5 = vld [vmem:[#allocation2 + $0x23] sm:$0x1] }
 0x1f6   :  { %v452_v57 = vld [vmem:[#allocation2 + $0x38] sm:$0x1]  ;;  %v499_v60 = vld [vmem:[#allocation2 + $0x39] sm:$0x1]  ;;  %v542_v4 = vld [vmem:[#allocation2 + $0x3a] sm:$0x1] }
 0x1f7   :  { %v472_v0 = vsel %vm471_vm7, %v470_v50, %v469_v58  ;;  %v479_v1 = vrot.slane %v452_v57, 1  ;;  %v515_v2 = vsel %vm471_vm7, %v514_v51, %v513_v61  ;;  %v520_v3 = vrot.slane %v499_v60, 1  ;;  %v585_v21 = vld [vmem:[#allocation2 + $0x3b] sm:$0x1]  ;;  %v622_v22 = vld [vmem:[#allocation2 + $0xc] sm:$0x1] }
 0x1f8   :  { %v451_v6 = vld [vmem:[#allocation2 + $0x30] sm:$0x1]  ;;  %v475_v7 = vsel %vm474_vm8, %v473_v36, %v472_v0  ;;  %v498_v8 = vld [vmem:[#allocation2 + $0x31] sm:$0x1]  ;;  %v517_v44 = vsel %vm474_vm8, %v516_v52, %v515_v2  ;;  %v541_v9 = vld [vmem:[#allocation2 + $0x32] sm:$0x1]  ;;  %v558_v10 = vsel %vm471_vm7, %v557_v54, %v556_v62 }
 0x1f9   :  { %v476_v12 = vrot.slane %v451_v6, 2  ;;  %v518_v13 = vrot.slane %v498_v8, 2  ;;  %v559_v19 = vrot.slane %v540_v53, 3  ;;  %v561_v20 = vrot.slane %v541_v9, 2  ;;  %v623_v23 = vld [vmem:[#allocation2 + $0x14] sm:$0x1] }
 0x1fa   :  { %v563_v24 = vrot.slane %v542_v4, 1  ;;  %v584_v25 = vld [vmem:[#allocation2 + $0x33] sm:$0x1]  ;;  %v596_v26 = vrot.slane %v580_v55, 6  ;;  %v598_v27 = vrot.slane %v581_v56, 5  ;;  %v600_v28 = vrot.slane %v582_v5, 4 }
 0x1fb   :  { %v478_v29 = vsel %vm477_vm9, %v476_v12, %v475_v7  ;;  %v519_v30 = vsel %vm477_vm9, %v518_v13, %v517_v44  ;;  %v560_v31 = vsel %vm474_vm8, %v559_v19, %v558_v10  ;;  %v602_v32 = vrot.slane %v583_v63, 3  ;;  %v621_v33 = vld [vmem:[#allocation2 + $0x4] sm:$0x1]  ;;  %v624_v34 = vld [vmem:[#allocation2 + $0x1c] sm:$0x1] }
 0x1fc   :  { %v625_v35 = vld [vmem:[#allocation2 + $0x24] sm:$0x1]  ;;  %v481_v36 = vsel %vm480_vm10, %v479_v1, %v478_v29  ;;  %v4232_v38 = vsel %vm480_vm10, %v520_v3, %v519_v30  ;;  %v562_v39 = vsel %vm477_vm9, %v561_v20, %v560_v31  ;;  %v597_v40 = vsel %vm465_vm5, %v596_v26, %v595_v11  ;;  %v626_v41 = vld [vmem:[#allocation2 + $0x2c] sm:$0x1]  ;;  %v627_v42 = vld [vmem:[#allocation2 + $0x34] sm:$0x1] }
 0x1fd   :  { %v4236_v43 = vld [vmem:[#allocation2 + $0x3c] sm:$0x1]  ;;  %488 = vrot.lane.b32.xlu1 %v481_v36, %s4011_s24  ;;  %483 = vst.msk [vmem:[#allocation3] sm:$0xff] %vm306_vm2, %v481_v36  ;;  %484 = vrot.lane.b32.xlu0 %v481_v36, %s4012_s25  ;;  %524 = vst.msk [vmem:[#allocation3 + $0x8] sm:$0xff] %vm306_vm2, %v4232_v38  ;;  %v4244_v45 = vsel %vm480_vm10, %v563_v24, %v562_v39  ;;  %v599_v50 = vsel %vm468_vm6, %v598_v27, %v597_v40  ;;  %v604_v51 = vrot.slane %v584_v25, 2 }
 0x1fe   :  { %v606_v52 = vrot.slane %v585_v21, 1  ;;  %v664_v53 = vld [vmem:[#allocation2 + $0x5] sm:$0x1]  ;;  %v665_v54 = vld [vmem:[#allocation2 + $0xd] sm:$0x1]  ;;  %567 = vst.msk [vmem:[#allocation3 + $0x10] sm:$0xff] %vm306_vm2, %v4244_v45  ;;  %v601_v55 = vsel %vm471_vm7, %v600_v28, %v599_v50 }
 0x1ff   :  { %v637_v56 = vrot.slane %v622_v22, 7  ;;  %v639_v57 = vrot.slane %v623_v23, 6  ;;  %v666_v58 = vld [vmem:[#allocation2 + $0x15] sm:$0x1]  ;;  %v667_v60 = vld [vmem:[#allocation2 + $0x1d] sm:$0x1]  ;;  %v603_v61 = vsel %vm474_vm8, %v602_v32, %v601_v55 }
 0x200   :  { %v641_v62 = vrot.slane %v624_v34, 5  ;;  %v643_v63 = vrot.slane %v625_v35, 4  ;;  %v645_v0 = vrot.slane %v626_v41, 3  ;;  %v668_v1 = vld [vmem:[#allocation2 + $0x25] sm:$0x1]  ;;  %v605_v2 = vsel %vm477_vm9, %v604_v51, %v603_v61 }
 0x201   :  { %v638_v3 = vsel %vm462_vm4, %v637_v56, %v621_v33  ;;  %v647_v4 = vrot.slane %v627_v42, 2  ;;  %v669_v5 = vld [vmem:[#allocation2 + $0x2d] sm:$0x1]  ;;  %v670_v6 = vld [vmem:[#allocation2 + $0x35] sm:$0x1]  ;;  %v680_v7 = vrot.slane %v665_v54, 7  ;;  %908 = vrot.lane.b32.xlu1 %v4217_v59, %s4011_s24  ;;  %897 = vrot.lane.b32.xlu0 %v4217_v59, %s4012_s25  ;;  %v4258_v8 = vsel %vm480_vm10, %v606_v52, %v605_v2 }
 0x202   :  { %v640_v44 = vsel %vm465_vm5, %v639_v57, %v638_v3  ;;  %v649_v9 = vrot.slane %v4236_v43, 1  ;;  %v671_v10 = vld [vmem:[#allocation2 + $0x3d] sm:$0x1]  ;;  %v682_v11 = vrot.slane %v666_v58, 6  ;;  %v708_v12 = vld [vmem:[#allocation2 + $0xe] sm:$0x1] }
 0x203   :  { %610 = vst.msk [vmem:[#allocation3 + $0x18] sm:$0xff] %vm306_vm2, %v4258_v8  ;;  %v642_v13 = vsel %vm468_vm6, %v641_v62, %v640_v44  ;;  %v681_v19 = vsel %vm462_vm4, %v680_v7, %v664_v53  ;;  %v684_v20 = vrot.slane %v667_v60, 5  ;;  %v686_v21 = vrot.slane %v668_v1, 4  ;;  %v709_v22 = vld [vmem:[#allocation2 + $0x16] sm:$0x1] }
 0x204   :  { %v710_v23 = vld [vmem:[#allocation2 + $0x1e] sm:$0x1]  ;;  %v644_v24 = vsel %vm471_vm7, %v643_v63, %v642_v13  ;;  %v683_v25 = vsel %vm465_vm5, %v682_v11, %v681_v19  ;;  %v688_v26 = vrot.slane %v669_v5, 3  ;;  %v690_v27 = vrot.slane %v670_v6, 2  ;;  %v707_v28 = vld [vmem:[#allocation2 + $0x6] sm:$0x1] }
 0x205   :  { %v711_v29 = vld [vmem:[#allocation2 + $0x26] sm:$0x1]  ;;  %v646_v30 = vsel %vm474_vm8, %v645_v0, %v644_v24  ;;  %v685_v31 = vsel %vm468_vm6, %v684_v20, %v683_v25  ;;  %v723_v32 = vrot.slane %v708_v12, 7  ;;  %v725_v33 = vrot.slane %v709_v22, 6  ;;  %v712_v39 = vld [vmem:[#allocation2 + $0x2e] sm:$0x1] }
 0x206   :  { %v648_v34 = vsel %vm477_vm9, %v647_v4, %v646_v30  ;;  %v687_v35 = vsel %vm471_vm7, %v686_v21, %v685_v31  ;;  %v692_v36 = vrot.slane %v671_v10, 1  ;;  %v713_v40 = vld [vmem:[#allocation2 + $0x36] sm:$0x1]  ;;  %v727_v41 = vrot.slane %v710_v23, 5  ;;  %v751_v52 = vld [vmem:[#allocation2 + $0xf] sm:$0x1] }
 0x207   :  { %v4273_v42 = vsel %vm480_vm10, %v649_v9, %v648_v34  ;;  %v689_v43 = vsel %vm474_vm8, %v688_v26, %v687_v35  ;;  %v724_v50 = vsel %vm462_vm4, %v723_v32, %v707_v28  ;;  %v729_v51 = vrot.slane %v711_v29, 4  ;;  %v714_v54 = vld [vmem:[#allocation2 + $0x3e] sm:$0x1]  ;;  %v750_v56 = vld [vmem:[#allocation2 + $0x7] sm:$0x1]  ;;  %v4291_v12 = vld [vmem:[#allocation14 + $0x18] sm:$0xff] }
 0x208   :  { %653 = vst.msk [vmem:[#allocation3 + $0x20] sm:$0xff] %vm306_vm2, %v4273_v42  ;;  %v691_v53 = vsel %vm477_vm9, %v690_v27, %v689_v43  ;;  %v726_v55 = vsel %vm465_vm5, %v725_v33, %v724_v50  ;;  %v752_v57 = vld [vmem:[#allocation2 + $0x17] sm:$0x1]  ;;  %v731_v61 = vrot.slane %v712_v39, 3  ;;  %v733_v62 = vrot.slane %v713_v40, 2  ;;  %v4293_v13 = vld [vmem:[#allocation14 + $0x10] sm:$0xff]  ;;  %3409 = vmatpush3.msra.mxu1 %v4291_v12  ;;  %3442 = vmatpush3.msra.mxu0 %v4291_v12 }
 0x209   :  { %v4282_v58 = vsel %vm480_vm10, %v692_v36, %v691_v53  ;;  %v728_v60 = vsel %vm468_vm6, %v727_v41, %v726_v55  ;;  %v753_v63 = vld [vmem:[#allocation2 + $0x1f] sm:$0x1]  ;;  %v754_v0 = vld [vmem:[#allocation2 + $0x27] sm:$0x1]  ;;  %v756_v2 = vld [vmem:[#allocation2 + $0x37] sm:$0x1]  ;;  %3410 = vmatprep.subr.mxu1 %v4009_v15  ;;  %3443 = vmatprep.subr.mxu0 %v4009_v15  ;;  %v1068_v36 = vpop.f32.mrf.mxu0 }
 0x20a   :  { %696 = vst.msk [vmem:[#allocation3 + $0x28] sm:$0xff] %vm306_vm2, %v4282_v58  ;;  %v730_v1 = vsel %vm471_vm7, %v729_v51, %v728_v60  ;;  %v766_v3 = vrot.slane %v751_v52, 7  ;;  %v735_v5 = vrot.slane %v714_v54, 1  ;;  %v755_v6 = vld [vmem:[#allocation2 + $0x2f] sm:$0x1]  ;;  %v768_v7 = vrot.slane %v752_v57, 6  ;;  %3411 = vmatpush3.msra.mxu1 %v4293_v13  ;;  %3444 = vmatpush3.msra.mxu0 %v4293_v13 }
 0x20b   :  { %v732_v4 = vsel %vm474_vm8, %v731_v61, %v730_v1  ;;  %v772_v44 = vrot.slane %v754_v0, 4  ;;  %v770_v11 = vrot.slane %v753_v63, 5  ;;  %v757_v20 = vld [vmem:[#allocation2 + $0x3f] sm:$0x1]  ;;  %v776_v22 = vrot.slane %v756_v2, 2  ;;  %3412 = vmatprep.subr.mxu1 %v4009_v15  ;;  %v4313_v29 = vld [vmem:[#allocation14] sm:$0xff]  ;;  %3445 = vmatprep.subr.mxu0 %v4009_v15  ;;  %v3429_v40 = vpop.f32.mrf.mxu0 }
 0x20c   :  { %v734_v9 = vsel %vm477_vm9, %v733_v62, %v732_v4  ;;  %v767_v10 = vsel %vm462_vm4, %v766_v3, %v750_v56  ;;  %v774_v24 = vrot.slane %v755_v6, 3  ;;  %v4305_v25 = vld [vmem:[#allocation14 + $0x8] sm:$0xff]  ;;  %v778_v28 = vrot.slane %v757_v20, 1  ;;  %v887_v32 = vld [vmem:[#allocation3] sm:$0xff] }
 0x20d   :  { %v4296_v19 = vsel %vm480_vm10, %v735_v5, %v734_v9  ;;  %v769_v21 = vsel %vm465_vm5, %v768_v7, %v767_v10  ;;  %3413 = vmatpush3.msra.mxu1 %v4305_v25  ;;  %3446 = vmatpush3.msra.mxu0 %v4305_v25  ;;  %v888_v33 = vadd.f32 %v887_v32, %v4217_v59  ;;  %v4334_v35 = vld [vmem:[%s4804_s10] ss:$0 sm:$0xff] }
 0x20e   :  { %739 = vst.msk [vmem:[#allocation3 + $0x30] sm:$0xff] %vm306_vm2, %v4296_v19  ;;  %v771_v23 = vsel %vm468_vm6, %v770_v11, %v769_v21  ;;  %3414 = vmatprep.subr.mxu1 %v4009_v15  ;;  %3447 = vmatprep.subr.mxu0 %v4009_v15  ;;  %v1069_v39 = vadd.f32 %v4334_v35, %v1068_v36  ;;  %v4369_v5 = vld [vmem:[%s4803_s9] ss:$0 sm:$0xff] }
 0x20f   :  { %v773_v26 = vsel %vm471_vm7, %v772_v44, %v771_v23  ;;  %3415 = vmatpush3.msra.mxu1 %v4313_v29  ;;  %3448 = vmatpush3.msra.mxu0 %v4313_v29  ;;  %v3164_v34 = vmul.f32 -1.442695, %v888_v33 }
 0x210   :  { %v775_v27 = vsel %vm474_vm8, %v774_v24, %v773_v26  ;;  %3430 = vmatprep.subr.mxu1 %v4009_v15  ;;  %3463 = vmatprep.subr.mxu0 %v4009_v15 }
 0x211   :  { %v777_v30 = vsel %vm477_vm9, %v776_v22, %v775_v27  ;;  %3687 = vpow2.f32 %v3164_v34  ;;  %1080 = vrot.lane.b32.xlu0 %v1069_v39, %s4011_s24 }
 0x212   :  { %v4320_v31 = vsel %vm480_vm10, %v778_v28, %v777_v30 }
 0x213   :  { %782 = vst.msk [vmem:[#allocation3 + $0x38] sm:$0xff] %vm306_vm2, %v4320_v31 }
 0x21e   :  { %v3688_v41 = vpop.eup %3687 }
 0x21f   :  { %v892_v51 = vadd.f32 1.0, %v3688_v41  ;;  %v1171_v41 = vld [vmem:[#allocation3 + $0x8] sm:$0xff] }
 0x221   :  { %3689 = vrcp.f32 %v892_v51 }
 0x22e   :  { %v3690_v56 = vpop.eup %3689 }
 0x26f   :  { %v489_v43 = vpop.permute.xlu1 %488  ;;  %v485_v50 = vpop.permute.xlu0 %484 }
 0x270   :  { %491 = vst.msk [vmem:[#allocation5] sm:$0xff] %vm306_vm2, %v489_v43  ;;  %487 = vst.msk [vmem:[#allocation4] sm:$0xff] %vm306_vm2, %v485_v50 }
 0x273   :  { %v898_v59 = vpop.permute.xlu0 %897  ;;  %v909_v55 = vpop.permute.xlu1 %908 }
 0x274   :  { %v911_v60 = vmul.f32 %v3690_v56, %v909_v55 }
 0x277   :  { %v895_v52 = vld [vmem:[#allocation4] sm:$0xff] }
 0x278   :  { %v900_v53 = vadd.f32 %v898_v59, %v895_v52  ;;  %v907_v57 = vld [vmem:[#allocation5] sm:$0xff] }
 0x279   :  { %v912_v61 = vadd.f32 %v911_v60, %v907_v57 }
 0x27a   :  { %v3165_v54 = vmul.f32 -1.442695, %v900_v53 }
 0x27c   :  { %3691 = vpow2.f32 %v3165_v54 }
 0x27d   :  { %3693 = vtanh.f32 %v912_v61 }
 0x283   :  { %v1081_v23 = vpop.permute.xlu0 %1080 }
 0x289   :  { %v3692_v62 = vpop.eup %3691 }
 0x28a   :  { %v904_v63 = vadd.f32 1.0, %v3692_v62  ;;  %v3694_v0 = vpop.eup %3693 }
 0x28b   :  { %v914_v1 = vsub.f32 0.0, %v3694_v0 }
 0x28c   :  { %3695 = vrcp.f32 %v904_v63 }
 0x299   :  { %v3696_v2 = vpop.eup %3695 }
 0x29a   :  { %v915_v3 = vmul.f32 %v3696_v2, %v914_v1 }
 0x29c   :  { %v4340_v4 = vadd.f32 %v3694_v0, %v915_v3 }
 0x29e   :  { %3417 = vmatmul.mubr.msk.f32.vlgmr.msra.gmra.mxu1 %vm306_vm2, %v4340_v4 }
 0x29f   :  { %3431 = vmatpush3.msra.mxu1 %v4135_v14  ;;  %3438 = vmatprep.mubr.msk.f32.mxu1 %vm4010_vm1, %v4009_v15 }
 0x2a0   :  { %3432 = vmatprep.subr.mxu1 %v4009_v15 }
 0x2a1   :  { %3433 = vmatpush3.msra.mxu1 %v4138_v16 }
 0x2a2   :  { %3434 = vmatprep.subr.mxu1 %v4009_v15 }
 0x2a3   :  { %3435 = vmatpush3.msra.mxu1 %v4145_v17 }
 0x2a4   :  { %3436 = vmatprep.subr.mxu1 %v4009_v15 }
 0x2a5   :  { %3437 = vmatpush3.msra.mxu1 %v4149_v18 }
 0x2a6   :  { %3439 = vmatmul.mubr.msk.f32.vlgmr.msra.gmra.mxu1 %vm306_vm2, %v4340_v4  ;;  %3452 = vmatprep.subr.mxu1 %v4009_v15 }
 0x2a7   :  { %3453 = vmatpush3.msra.mxu1 %v4173_v46  ;;  %3460 = vmatprep.mubr.msk.f32.mxu1 %vm4010_vm1, %v4009_v15 }
 0x2a8   :  { %3454 = vmatprep.subr.mxu1 %v4009_v15 }
 0x2a9   :  { %3455 = vmatpush3.msra.mxu1 %v4175_v47 }
 0x2aa   :  { %3456 = vmatprep.subr.mxu1 %v4009_v15 }
 0x2ab   :  { %3457 = vmatpush3.msra.mxu1 %v4179_v48 }
 0x2ac   :  { %3458 = vmatprep.subr.mxu1 %v4009_v15 }
 0x2ad   :  { %3459 = vmatpush3.msra.mxu1 %v4183_v49 }
 0x2ae   :  { %3474 = vmatprep.subr.mxu1 %v4009_v15 }
 0x35e   :  { %v992_v6 = vpop.f32.mrf.mxu1 }
 0x35f   :  { %v993_v7 = vadd.f32 %v4369_v5, %v992_v6 }
 0x360   :  { %v3418_v44 = vpop.f32.mrf.mxu1 }
 0x361   :  { %v1072_v9 = vadd.f32 %v1069_v39, %v993_v7 }
 0x363   :  { %v3169_v10 = vmul.f32 -1.442695, %v1072_v9 }
 0x365   :  { %3697 = vpow2.f32 %v3169_v10 }
 0x366   :  { %v1167_v11 = vpop.f32.mrf.mxu1 }
 0x367   :  { %v1168_v39 = vadd.f32 %v4210_v37, %v1167_v11 }
 0x368   :  { %v3440_v20 = vpop.f32.mrf.mxu1 }
 0x369   :  { %v1172_v43 = vadd.f32 %v1171_v41, %v1168_v39 }
 0x372   :  { %v3698_v21 = vpop.eup %3697 }
 0x373   :  { %v1076_v22 = vadd.f32 1.0, %v3698_v21 }
 0x375   :  { %3699 = vrcp.f32 %v1076_v22 }
 0x382   :  { %v3700_v24 = vpop.eup %3699 }
 0x383   :  { %v1083_v26 = vmul.f32 %v3700_v24, %v1081_v23 }
 0x385   :  { %1085 = vrot.lane.b32.xlu1 %v1083_v26, %s4011_s24 }
 0x3f7   :  { %v1086_v27 = vpop.permute.xlu1 %1085 }
 0x3f8   :  { %v1088_v28 = vadd.f32 %v1086_v27, %v993_v7 }
 0x3fa   :  { %3701 = vtanh.f32 %v1088_v28 }
 0x407   :  { %v3702_v30 = vpop.eup %3701 }
 0x408   :  { %v1090_v32 = vsub.f32 0.0, %v3702_v30 }
 0x40a   :  { %1092 = vrot.lane.b32.xlu0 %v1090_v32, %s4012_s25 }
 0x40e   :  { %525 = vrot.lane.b32.xlu0 %v4232_v38, %s4012_s25 }
 0x412   :  { %530 = vrot.lane.b32.xlu0 %v4232_v38, %s4011_s24  ;;  %v3171_v38 = vmul.f32 -1.442695, %v1172_v43 }
 0x414   :  { %3703 = vpow2.f32 %v3171_v38  ;;  %v1448_v38 = vld [vmem:[#allocation3 + $0x10] sm:$0xff] }
 0x421   :  { %v3704_v50 = vpop.eup %3703 }
 0x422   :  { %v1176_v51 = vadd.f32 1.0, %v3704_v50 }
 0x424   :  { %3705 = vrcp.f32 %v1176_v51 }
 0x431   :  { %v3706_v60 = vpop.eup %3705 }
 0x47c   :  { %v1093_v33 = vpop.permute.xlu0 %1092 }
 0x47d   :  { %v1095_v34 = vmul.f32 %v3700_v24, %v1093_v33 }
 0x47f   :  { %1097 = vrot.lane.b32.xlu1 %v1095_v34, %s4013_s29 }
 0x480   :  { %v526_v36 = vpop.permute.xlu0 %525 }
 0x481   :  { %529 = vst.msk [vmem:[#allocation4 + $0x8] sm:$0xff] %vm306_vm2, %v526_v36 }
 0x483   :  { %1181 = vrot.lane.b32.xlu1 %v1168_v39, %s4012_s25 }
 0x484   :  { %v531_v40 = vpop.permute.xlu0 %530 }
 0x485   :  { %534 = vst.msk [vmem:[#allocation5 + $0x8] sm:$0xff] %vm306_vm2, %v531_v40 }
 0x487   :  { %1192 = vrot.lane.b32.xlu1 %v1168_v39, %s4011_s24 }
 0x488   :  { %v1179_v53 = vld [vmem:[#allocation4 + $0x8] sm:$0xff] }
 0x48c   :  { %v1191_v62 = vld [vmem:[#allocation5 + $0x8] sm:$0xff] }
 0x4f1   :  { %v1098_v59 = vpop.permute.xlu1 %1097 }
 0x4f2   :  { %v4384_v52 = vadd.f32 %v3702_v30, %v1098_v59 }
 0x4f4   :  { %1275 = vrot.lane.b32.xlu0 %v4384_v52, %s4011_s24 }
 0x4f5   :  { %v1182_v54 = vpop.permute.xlu1 %1181 }
 0x4f6   :  { %v1184_v55 = vadd.f32 %v1182_v54, %v1179_v53 }
 0x4f8   :  { %v3172_v56 = vmul.f32 -1.442695, %v1184_v55 }
 0x4f9   :  { %v1193_v57 = vpop.permute.xlu1 %1192 }
 0x4fa   :  { %3707 = vpow2.f32 %v3172_v56  ;;  %v1195_v61 = vmul.f32 %v3706_v60, %v1193_v57 }
 0x4fc   :  { %v1196_v63 = vadd.f32 %v1195_v61, %v1191_v62 }
 0x4fe   :  { %3709 = vtanh.f32 %v1196_v63 }
 0x507   :  { %v3708_v0 = vpop.eup %3707 }
 0x508   :  { %v1188_v1 = vadd.f32 1.0, %v3708_v0 }
 0x50a   :  { %3711 = vrcp.f32 %v1188_v1 }
 0x50b   :  { %v3710_v2 = vpop.eup %3709 }
 0x50c   :  { %v1198_v3 = vsub.f32 %v4340_v4, %v3710_v2 }
 0x517   :  { %v3712_v6 = vpop.eup %3711 }
 0x518   :  { %v1199_v7 = vmul.f32 %v3712_v6, %v1198_v3 }
 0x51a   :  { %v4389_v44 = vadd.f32 %v3710_v2, %v1199_v7 }
 0x51c   :  { %3450 = vmatmul.mubr.msk.f32.vlgmr.msra.gmra.mxu0 %vm306_vm2, %v4389_v44 }
 0x51d   :  { %3464 = vmatpush3.msra.mxu0 %v4135_v14  ;;  %3471 = vmatprep.mubr.msk.f32.mxu0 %vm4010_vm1, %v4009_v15 }
 0x51e   :  { %3465 = vmatprep.subr.mxu0 %v4009_v15 }
 0x51f   :  { %3466 = vmatpush3.msra.mxu0 %v4138_v16 }
 0x520   :  { %3467 = vmatprep.subr.mxu0 %v4009_v15 }
 0x521   :  { %3468 = vmatpush3.msra.mxu0 %v4145_v17 }
 0x522   :  { %3469 = vmatprep.subr.mxu0 %v4009_v15 }
 0x523   :  { %3470 = vmatpush3.msra.mxu0 %v4149_v18 }
 0x524   :  { %3472 = vmatmul.mubr.msk.f32.vlgmr.msra.gmra.mxu0 %vm306_vm2, %v4389_v44  ;;  %3485 = vmatprep.subr.mxu0 %v4009_v15 }
 0x525   :  { %3486 = vmatpush3.msra.mxu0 %v4173_v46  ;;  %3493 = vmatprep.mubr.msk.f32.mxu0 %vm4010_vm1, %v4009_v15 }
 0x526   :  { %3487 = vmatprep.subr.mxu0 %v4009_v15 }
 0x527   :  { %3488 = vmatpush3.msra.mxu0 %v4175_v47 }
 0x528   :  { %3489 = vmatprep.subr.mxu0 %v4009_v15 }
 0x529   :  { %3490 = vmatpush3.msra.mxu0 %v4179_v48 }
 0x52a   :  { %3491 = vmatprep.subr.mxu0 %v4009_v15 }
 0x52b   :  { %3492 = vmatpush3.msra.mxu0 %v4183_v49 }
 0x52c   :  { %3507 = vmatprep.subr.mxu0 %v4009_v15 }
 0x566   :  { %v1276_v14 = vpop.permute.xlu0 %1275 }
 0x567   :  { %3461 = vmatmul.mubr.msk.f32.vlgmr.msra.gmra.mxu1 %vm306_vm2, %v1276_v14 }
 0x568   :  { %3475 = vmatpush3.msra.mxu1 %v4291_v12  ;;  %3482 = vmatprep.mubr.msk.f32.mxu1 %vm4010_vm1, %v4009_v15 }
 0x569   :  { %3476 = vmatprep.subr.mxu1 %v4009_v15 }
 0x56a   :  { %3477 = vmatpush3.msra.mxu1 %v4293_v13 }
 0x56b   :  { %3478 = vmatprep.subr.mxu1 %v4009_v15 }
 0x56c   :  { %3479 = vmatpush3.msra.mxu1 %v4305_v25 }
 0x56d   :  { %3480 = vmatprep.subr.mxu1 %v4009_v15 }
 0x56e   :  { %3481 = vmatpush3.msra.mxu1 %v4313_v29 }
 0x56f   :  { %3496 = vmatprep.subr.mxu1 %v4009_v15 }
 0x5dc   :  { %v1270_v16 = vpop.f32.mrf.mxu0 }
 0x5dd   :  { %v1271_v20 = vadd.f32 %v4369_v5, %v1270_v16 }
 0x5de   :  { %v3451_v17 = vpop.f32.mrf.mxu0 }
 0x5df   :  { %v4451_v17 = vld [vmem:[#allocation12 + $0x18] sm:$0xff] }
 0x5e4   :  { %v1444_v18 = vpop.f32.mrf.mxu0 }
 0x5e5   :  { %v1445_v41 = vadd.f32 %v4210_v37, %v1444_v18  ;;  %v4457_v18 = vld [vmem:[#allocation12 + $0x10] sm:$0xff] }
 0x5e6   :  { %v3473_v4 = vpop.f32.mrf.mxu0 }
 0x5e7   :  { %v1449_v50 = vadd.f32 %v1448_v38, %v1445_v41  ;;  %v4465_v4 = vld [vmem:[#allocation12] sm:$0xff] }
 0x5e9   :  { %v3177_v51 = vmul.f32 -1.442695, %v1449_v50  ;;  %v1725_v50 = vld [vmem:[#allocation3 + $0x18] sm:$0xff] }
 0x627   :  { %v1345_v9 = vpop.f32.mrf.mxu1 }
 0x628   :  { %v1346_v10 = vadd.f32 %v4334_v35, %v1345_v9 }
 0x629   :  { %v3462_v11 = vpop.f32.mrf.mxu1 }
 0x62a   :  { %1357 = vrot.lane.b32.xlu1 %v1346_v10, %s4011_s24  ;;  %v1349_v21 = vadd.f32 %v1346_v10, %v1271_v20 }
 0x62c   :  { %v3175_v22 = vmul.f32 -1.442695, %v1349_v21 }
 0x62e   :  { %3713 = vpow2.f32 %v3175_v22 }
 0x63b   :  { %v3714_v23 = vpop.eup %3713 }
 0x63c   :  { %v1353_v24 = vadd.f32 1.0, %v3714_v23 }
 0x63e   :  { %3715 = vrcp.f32 %v1353_v24 }
 0x64b   :  { %v3716_v26 = vpop.eup %3715 }
 0x69c   :  { %v1358_v27 = vpop.permute.xlu1 %1357 }
 0x69d   :  { %v1360_v28 = vmul.f32 %v3716_v26, %v1358_v27 }
 0x69f   :  { %1362 = vrot.lane.b32.xlu0 %v1360_v28, %s4011_s24 }
 0x711   :  { %v1363_v30 = vpop.permute.xlu0 %1362 }
 0x712   :  { %v1365_v32 = vadd.f32 %v1363_v30, %v1271_v20 }
 0x714   :  { %3717 = vtanh.f32 %v1365_v32 }
 0x715   :  { %3719 = vpow2.f32 %v3177_v51 }
 0x721   :  { %v3718_v33 = vpop.eup %3717 }
 0x722   :  { %v1367_v34 = vsub.f32 %v4384_v52, %v3718_v33 }
 0x724   :  { %1369 = vrot.lane.b32.xlu1 %v1367_v34, %s4012_s25 }
 0x728   :  { %568 = vrot.lane.b32.xlu1 %v4244_v45, %s4012_s25 }
 0x72c   :  { %573 = vrot.lane.b32.xlu1 %v4244_v45, %s4011_s24  ;;  %v3720_v45 = vpop.eup %3719 }
 0x72d   :  { %v1453_v59 = vadd.f32 1.0, %v3720_v45 }
 0x72f   :  { %3721 = vrcp.f32 %v1453_v59 }
 0x73c   :  { %v3722_v61 = vpop.eup %3721 }
 0x796   :  { %v1370_v36 = vpop.permute.xlu1 %1369 }
 0x797   :  { %v1372_v39 = vmul.f32 %v3716_v26, %v1370_v36 }
 0x799   :  { %1374 = vrot.lane.b32.xlu0 %v1372_v39, %s4013_s29 }
 0x79a   :  { %v569_v40 = vpop.permute.xlu1 %568 }
 0x79b   :  { %572 = vst.msk [vmem:[#allocation4 + $0x10] sm:$0xff] %vm306_vm2, %v569_v40 }
 0x79d   :  { %1458 = vrot.lane.b32.xlu0 %v1445_v41, %s4012_s25 }
 0x79e   :  { %v574_v43 = vpop.permute.xlu1 %573 }
 0x79f   :  { %577 = vst.msk [vmem:[#allocation5 + $0x10] sm:$0xff] %vm306_vm2, %v574_v43 }
 0x7a1   :  { %1469 = vrot.lane.b32.xlu0 %v1445_v41, %s4011_s24 }
 0x7a2   :  { %v1456_v55 = vld [vmem:[#allocation4 + $0x10] sm:$0xff] }
 0x7a6   :  { %v1468_v63 = vld [vmem:[#allocation5 + $0x10] sm:$0xff] }
 0x80b   :  { %v1375_v52 = vpop.permute.xlu0 %1374 }
 0x80c   :  { %v4442_v53 = vadd.f32 %v3718_v33, %v1375_v52 }
 0x80e   :  { %1552 = vrot.lane.b32.xlu1 %v4442_v53, %s4011_s24 }
 0x80f   :  { %v1459_v54 = vpop.permute.xlu0 %1458 }
 0x810   :  { %v1461_v56 = vadd.f32 %v1459_v54, %v1456_v55 }
 0x812   :  { %v3178_v57 = vmul.f32 -1.442695, %v1461_v56 }
 0x813   :  { %v1470_v60 = vpop.permute.xlu0 %1469 }
 0x814   :  { %3723 = vpow2.f32 %v3178_v57  ;;  %v1472_v62 = vmul.f32 %v3722_v61, %v1470_v60 }
 0x816   :  { %v1473_v0 = vadd.f32 %v1472_v62, %v1468_v63 }
 0x818   :  { %3725 = vtanh.f32 %v1473_v0 }
 0x821   :  { %v3724_v1 = vpop.eup %3723 }
 0x822   :  { %v1465_v2 = vadd.f32 1.0, %v3724_v1 }
 0x824   :  { %3727 = vrcp.f32 %v1465_v2 }
 0x825   :  { %v3726_v3 = vpop.eup %3725 }
 0x826   :  { %v1475_v6 = vsub.f32 %v4389_v44, %v3726_v3  ;;  %v4461_v44 = vld [vmem:[#allocation12 + $0x8] sm:$0xff] }
 0x831   :  { %v3728_v7 = vpop.eup %3727 }
 0x832   :  { %v1476_v14 = vmul.f32 %v3728_v7, %v1475_v6 }
 0x834   :  { %v4447_v16 = vadd.f32 %v3726_v3, %v1476_v14 }
 0x836   :  { %3483 = vmatmul.mubr.msk.f32.vlgmr.msra.gmra.mxu1 %vm306_vm2, %v4447_v16 }
 0x837   :  { %3497 = vmatpush3.msra.mxu1 %v4451_v17  ;;  %3504 = vmatprep.mubr.msk.f32.mxu1 %vm4010_vm1, %v4009_v15 }
 0x838   :  { %3498 = vmatprep.subr.mxu1 %v4009_v15 }
 0x839   :  { %3499 = vmatpush3.msra.mxu1 %v4457_v18 }
 0x83a   :  { %3500 = vmatprep.subr.mxu1 %v4009_v15 }
 0x83b   :  { %3501 = vmatpush3.msra.mxu1 %v4461_v44 }
 0x83c   :  { %3502 = vmatprep.subr.mxu1 %v4009_v15 }
 0x83d   :  { %3503 = vmatpush3.msra.mxu1 %v4465_v4 }
 0x83e   :  { %3505 = vmatmul.mubr.msk.f32.vlgmr.msra.gmra.mxu1 %vm306_vm2, %v4447_v16  ;;  %3518 = vmatprep.subr.mxu1 %v4009_v15 }
 0x83f   :  { %3519 = vmatpush3.msra.mxu1 %v4173_v46  ;;  %3526 = vmatprep.mubr.msk.f32.mxu1 %vm4010_vm1, %v4009_v15 }
 0x840   :  { %3520 = vmatprep.subr.mxu1 %v4009_v15 }
 0x841   :  { %3521 = vmatpush3.msra.mxu1 %v4175_v47 }
 0x842   :  { %3522 = vmatprep.subr.mxu1 %v4009_v15 }
 0x843   :  { %3523 = vmatpush3.msra.mxu1 %v4179_v48 }
 0x844   :  { %3524 = vmatprep.subr.mxu1 %v4009_v15 }
 0x845   :  { %3525 = vmatpush3.msra.mxu1 %v4183_v49 }
 0x846   :  { %3540 = vmatprep.subr.mxu1 %v4009_v15 }
 0x880   :  { %v1553_v9 = vpop.permute.xlu1 %1552 }
 0x881   :  { %3494 = vmatmul.mubr.msk.f32.vlgmr.msra.gmra.mxu0 %vm306_vm2, %v1553_v9  ;;  %v4535_v9 = vld [vmem:[#allocation15 + $0x10] sm:$0xff] }
 0x882   :  { %3508 = vmatpush3.msra.mxu0 %v4291_v12  ;;  %3515 = vmatprep.mubr.msk.f32.mxu0 %vm4010_vm1, %v4009_v15 }
 0x883   :  { %3509 = vmatprep.subr.mxu0 %v4009_v15 }
 0x884   :  { %3510 = vmatpush3.msra.mxu0 %v4293_v13 }
 0x885   :  { %3511 = vmatprep.subr.mxu0 %v4009_v15 }
 0x886   :  { %3512 = vmatpush3.msra.mxu0 %v4305_v25 }
 0x887   :  { %3513 = vmatprep.subr.mxu0 %v4009_v15 }
 0x888   :  { %3514 = vmatpush3.msra.mxu0 %v4313_v29 }
 0x889   :  { %3529 = vmatprep.subr.mxu0 %v4009_v15 }
 0x8f6   :  { %v1547_v46 = vpop.f32.mrf.mxu1 }
 0x8f7   :  { %v1548_v21 = vadd.f32 %v4369_v5, %v1547_v46  ;;  %v4539_v46 = vld [vmem:[#allocation15 + $0x8] sm:$0xff] }
 0x8f8   :  { %v3484_v47 = vpop.f32.mrf.mxu1 }
 0x8f9   :  { %v4543_v47 = vld [vmem:[#allocation15] sm:$0xff] }
 0x8fe   :  { %v1721_v48 = vpop.f32.mrf.mxu1 }
 0x8ff   :  { %v1722_v43 = vadd.f32 %v4210_v37, %v1721_v48 }
 0x900   :  { %v3506_v49 = vpop.f32.mrf.mxu1 }
 0x901   :  { %v1726_v51 = vadd.f32 %v1725_v50, %v1722_v43 }
 0x903   :  { %v3183_v45 = vmul.f32 -1.442695, %v1726_v51  ;;  %v4572_v51 = vld [vmem:[%s4800_s6] ss:$0 sm:$0xff] }
 0x941   :  { %v1622_v10 = vpop.f32.mrf.mxu0 }
 0x942   :  { %v1623_v11 = vadd.f32 %v4334_v35, %v1622_v10 }
 0x943   :  { %v3495_v20 = vpop.f32.mrf.mxu0 }
 0x944   :  { %1634 = vrot.lane.b32.xlu0 %v1623_v11, %s4011_s24  ;;  %v1626_v22 = vadd.f32 %v1623_v11, %v1548_v21 }
 0x946   :  { %v3181_v23 = vmul.f32 -1.442695, %v1626_v22 }
 0x948   :  { %3729 = vpow2.f32 %v3181_v23 }
 0x955   :  { %v3730_v24 = vpop.eup %3729 }
 0x956   :  { %v1630_v26 = vadd.f32 1.0, %v3730_v24 }
 0x958   :  { %3731 = vrcp.f32 %v1630_v26 }
 0x965   :  { %v3732_v27 = vpop.eup %3731 }
 0x9b6   :  { %v1635_v28 = vpop.permute.xlu0 %1634 }
 0x9b7   :  { %v1637_v30 = vmul.f32 %v3732_v27, %v1635_v28 }
 0x9b9   :  { %1639 = vrot.lane.b32.xlu1 %v1637_v30, %s4011_s24 }
 0xa2b   :  { %v1640_v32 = vpop.permute.xlu1 %1639 }
 0xa2c   :  { %v1642_v33 = vadd.f32 %v1640_v32, %v1548_v21 }
 0xa2e   :  { %3733 = vtanh.f32 %v1642_v33 }
 0xa2f   :  { %3735 = vpow2.f32 %v3183_v45 }
 0xa3b   :  { %v3734_v34 = vpop.eup %3733 }
 0xa3c   :  { %v1644_v36 = vsub.f32 %v4442_v53, %v3734_v34 }
 0xa3e   :  { %1646 = vrot.lane.b32.xlu0 %v1644_v36, %s4012_s25 }
 0xa42   :  { %611 = vrot.lane.b32.xlu0 %v4258_v8, %s4012_s25 }
 0xa46   :  { %616 = vrot.lane.b32.xlu0 %v4258_v8, %s4011_s24  ;;  %v3736_v8 = vpop.eup %3735 }
 0xa47   :  { %v1730_v59 = vadd.f32 1.0, %v3736_v8 }
 0xa49   :  { %3737 = vrcp.f32 %v1730_v59 }
 0xa56   :  { %v3738_v60 = vpop.eup %3737 }
 0xab0   :  { %v1647_v39 = vpop.permute.xlu0 %1646 }
 0xab1   :  { %v1649_v40 = vmul.f32 %v3732_v27, %v1647_v39 }
 0xab3   :  { %1651 = vrot.lane.b32.xlu1 %v1649_v40, %s4013_s29 }
 0xab4   :  { %v612_v41 = vpop.permute.xlu0 %611 }
 0xab5   :  { %615 = vst.msk [vmem:[#allocation4 + $0x18] sm:$0xff] %vm306_vm2, %v612_v41 }
 0xab7   :  { %1735 = vrot.lane.b32.xlu1 %v1722_v43, %s4012_s25 }
 0xab8   :  { %v617_v38 = vpop.permute.xlu0 %616 }
 0xab9   :  { %620 = vst.msk [vmem:[#allocation5 + $0x18] sm:$0xff] %vm306_vm2, %v617_v38 }
 0xabb   :  { %1746 = vrot.lane.b32.xlu1 %v1722_v43, %s4011_s24 }
 0xabc   :  { %v1733_v37 = vld [vmem:[#allocation4 + $0x18] sm:$0xff] }
 0xac0   :  { %v1745_v62 = vld [vmem:[#allocation5 + $0x18] sm:$0xff] }
 0xb25   :  { %v1652_v52 = vpop.permute.xlu1 %1651 }
 0xb26   :  { %v4508_v53 = vadd.f32 %v3734_v34, %v1652_v52 }
 0xb28   :  { %1829 = vrot.lane.b32.xlu0 %v4508_v53, %s4011_s24 }
 0xb29   :  { %v1736_v54 = vpop.permute.xlu1 %1735 }
 0xb2a   :  { %v1738_v55 = vadd.f32 %v1736_v54, %v1733_v37 }
 0xb2c   :  { %v3184_v56 = vmul.f32 -1.442695, %v1738_v55 }
 0xb2d   :  { %v1747_v57 = vpop.permute.xlu1 %1746 }
 0xb2e   :  { %3739 = vpow2.f32 %v3184_v56  ;;  %v1749_v61 = vmul.f32 %v3738_v60, %v1747_v57 }
 0xb30   :  { %v1750_v63 = vadd.f32 %v1749_v61, %v1745_v62 }
 0xb32   :  { %3741 = vtanh.f32 %v1750_v63 }
 0xb3b   :  { %v3740_v0 = vpop.eup %3739 }
 0xb3c   :  { %v1742_v1 = vadd.f32 1.0, %v3740_v0 }
 0xb3e   :  { %3743 = vrcp.f32 %v1742_v1 }
 0xb3f   :  { %v3742_v2 = vpop.eup %3741 }
 0xb40   :  { %v1752_v3 = vsub.f32 %v4447_v16, %v3742_v2  ;;  %v4529_v16 = vld [vmem:[#allocation15 + $0x18] sm:$0xff] }
 0xb4b   :  { %v3744_v6 = vpop.eup %3743 }
 0xb4c   :  { %v1753_v7 = vmul.f32 %v3744_v6, %v1752_v3 }
 0xb4e   :  { %v4513_v14 = vadd.f32 %v3742_v2, %v1753_v7 }
 0xb50   :  { %3516 = vmatmul.mubr.msk.f32.vlgmr.msra.gmra.mxu0 %vm306_vm2, %v4513_v14 }
 0xb51   :  { %3530 = vmatpush3.msra.mxu0 %v4451_v17  ;;  %3537 = vmatprep.mubr.msk.f32.mxu0 %vm4010_vm1, %v4009_v15 }
 0xb52   :  { %3531 = vmatprep.subr.mxu0 %v4009_v15 }
 0xb53   :  { %3532 = vmatpush3.msra.mxu0 %v4457_v18 }
 0xb54   :  { %3533 = vmatprep.subr.mxu0 %v4009_v15 }
 0xb55   :  { %3534 = vmatpush3.msra.mxu0 %v4461_v44 }
 0xb56   :  { %3535 = vmatprep.subr.mxu0 %v4009_v15 }
 0xb57   :  { %3536 = vmatpush3.msra.mxu0 %v4465_v4 }
 0xb58   :  { %3538 = vmatmul.mubr.msk.f32.vlgmr.msra.gmra.mxu0 %vm306_vm2, %v4513_v14  ;;  %3551 = vmatprep.subr.mxu0 %v4009_v15 }
 0xb59   :  { %3552 = vmatpush3.msra.mxu0 %v4529_v16  ;;  %3559 = vmatprep.mubr.msk.f32.mxu0 %vm4010_vm1, %v4009_v15 }
 0xb5a   :  { %3553 = vmatprep.subr.mxu0 %v4009_v15 }
 0xb5b   :  { %3554 = vmatpush3.msra.mxu0 %v4535_v9 }
 0xb5c   :  { %3555 = vmatprep.subr.mxu0 %v4009_v15 }
 0xb5d   :  { %3556 = vmatpush3.msra.mxu0 %v4539_v46 }
 0xb5e   :  { %3557 = vmatprep.subr.mxu0 %v4009_v15 }
 0xb5f   :  { %3558 = vmatpush3.msra.mxu0 %v4543_v47 }
 0xb60   :  { %3573 = vmatprep.subr.mxu0 %v4009_v15 }
 0xb9a   :  { %v1830_v48 = vpop.permute.xlu0 %1829 }
 0xb9b   :  { %3527 = vmatmul.mubr.msk.f32.vlgmr.msra.gmra.mxu1 %vm306_vm2, %v1830_v48 }
 0xb9c   :  { %3541 = vmatpush3.msra.mxu1 %v4291_v12  ;;  %3548 = vmatprep.mubr.msk.f32.mxu1 %vm4010_vm1, %v4009_v15 }
 0xb9d   :  { %3542 = vmatprep.subr.mxu1 %v4009_v15 }
 0xb9e   :  { %3543 = vmatpush3.msra.mxu1 %v4293_v13 }
 0xb9f   :  { %3544 = vmatprep.subr.mxu1 %v4009_v15 }
 0xba0   :  { %3545 = vmatpush3.msra.mxu1 %v4305_v25 }
 0xba1   :  { %3546 = vmatprep.subr.mxu1 %v4009_v15 }
 0xba2   :  { %3547 = vmatpush3.msra.mxu1 %v4313_v29 }
 0xba3   :  { %3562 = vmatprep.subr.mxu1 %v4009_v15 }
 0xc10   :  { %v1824_v49 = vpop.f32.mrf.mxu0 }
 0xc11   :  { %v1825_v24 = vadd.f32 %v4369_v5, %v1824_v49 }
 0xc12   :  { %v3517_v10 = vpop.f32.mrf.mxu0 }
 0xc18   :  { %v1998_v11 = vpop.f32.mrf.mxu0 }
 0xc19   :  { %v1999_v45 = vadd.f32 %v4572_v51, %v1998_v11 }
 0xc1a   :  { %v3539_v20 = vpop.f32.mrf.mxu0 }
 0xc5b   :  { %v1899_v21 = vpop.f32.mrf.mxu1 }
 0xc5c   :  { %v1900_v22 = vadd.f32 %v4334_v35, %v1899_v21 }
 0xc5d   :  { %v3528_v23 = vpop.f32.mrf.mxu1 }
 0xc5e   :  { %1911 = vrot.lane.b32.xlu1 %v1900_v22, %s4011_s24  ;;  %v1903_v26 = vadd.f32 %v1900_v22, %v1825_v24 }
 0xc60   :  { %v3187_v27 = vmul.f32 -1.442695, %v1903_v26 }
 0xc62   :  { %3745 = vpow2.f32 %v3187_v27 }
 0xc6f   :  { %v3746_v28 = vpop.eup %3745 }
 0xc70   :  { %v1907_v30 = vadd.f32 1.0, %v3746_v28 }
 0xc72   :  { %3747 = vrcp.f32 %v1907_v30 }
 0xc7f   :  { %v3748_v32 = vpop.eup %3747 }
 0xcd0   :  { %v1912_v33 = vpop.permute.xlu1 %1911 }
 0xcd1   :  { %v1914_v34 = vmul.f32 %v3748_v32, %v1912_v33 }
 0xcd3   :  { %1916 = vrot.lane.b32.xlu0 %v1914_v34, %s4011_s24 }
 0xd45   :  { %v1917_v36 = vpop.permute.xlu0 %1916 }
 0xd46   :  { %v1919_v39 = vadd.f32 %v1917_v36, %v1825_v24 }
 0xd48   :  { %3749 = vtanh.f32 %v1919_v39 }
 0xd55   :  { %v3750_v40 = vpop.eup %3749 }
 0xd56   :  { %v1921_v41 = vsub.f32 %v4508_v53, %v3750_v40 }
 0xd58   :  { %1923 = vrot.lane.b32.xlu1 %v1921_v41, %s4012_s25 }
 0xd5c   :  { %654 = vrot.lane.b32.xlu1 %v4273_v42, %s4012_s25 }
 0xd60   :  { %659 = vrot.lane.b32.xlu1 %v4273_v42, %s4011_s24  ;;  %v2002_v42 = vld [vmem:[#allocation3 + $0x20] sm:$0xff] }
 0xd61   :  { %v2003_v59 = vadd.f32 %v2002_v42, %v1999_v45 }
 0xd63   :  { %v3189_v52 = vmul.f32 -1.442695, %v2003_v59 }
 0xd65   :  { %3751 = vpow2.f32 %v3189_v52 }
 0xd72   :  { %v3752_v53 = vpop.eup %3751 }
 0xd73   :  { %v2007_v37 = vadd.f32 1.0, %v3752_v53 }
 0xd75   :  { %3753 = vrcp.f32 %v2007_v37 }
 0xd82   :  { %v3754_v63 = vpop.eup %3753 }
 0xdca   :  { %v1924_v43 = vpop.permute.xlu1 %1923 }
 0xdcb   :  { %v1926_v38 = vmul.f32 %v3748_v32, %v1924_v43 }
 0xdcd   :  { %1928 = vrot.lane.b32.xlu0 %v1926_v38, %s4013_s29 }
 0xdce   :  { %v655_v50 = vpop.permute.xlu1 %654 }
 0xdcf   :  { %658 = vst.msk [vmem:[#allocation4 + $0x20] sm:$0xff] %vm306_vm2, %v655_v50 }
 0xdd1   :  { %2012 = vrot.lane.b32.xlu0 %v1999_v45, %s4012_s25 }
 0xdd2   :  { %v660_v8 = vpop.permute.xlu1 %659 }
 0xdd3   :  { %663 = vst.msk [vmem:[#allocation5 + $0x20] sm:$0xff] %vm306_vm2, %v660_v8 }
 0xdd5   :  { %2023 = vrot.lane.b32.xlu0 %v1999_v45, %s4011_s24  ;;  %v2279_v45 = vld [vmem:[#allocation3 + $0x28] sm:$0xff] }
 0xdd6   :  { %v2010_v57 = vld [vmem:[#allocation4 + $0x20] sm:$0xff] }
 0xdda   :  { %v2022_v1 = vld [vmem:[#allocation5 + $0x20] sm:$0xff] }
 0xe3f   :  { %v1929_v54 = vpop.permute.xlu0 %1928 }
 0xe40   :  { %v4579_v55 = vadd.f32 %v3750_v40, %v1929_v54 }
 0xe42   :  { %2106 = vrot.lane.b32.xlu1 %v4579_v55, %s4011_s24 }
 0xe43   :  { %v2013_v56 = vpop.permute.xlu0 %2012 }
 0xe44   :  { %v2015_v60 = vadd.f32 %v2013_v56, %v2010_v57 }
 0xe46   :  { %v3190_v61 = vmul.f32 -1.442695, %v2015_v60 }
 0xe47   :  { %v2024_v62 = vpop.permute.xlu0 %2023 }
 0xe48   :  { %3755 = vpow2.f32 %v3190_v61  ;;  %v2026_v0 = vmul.f32 %v3754_v63, %v2024_v62 }
 0xe4a   :  { %v2027_v2 = vadd.f32 %v2026_v0, %v2022_v1 }
 0xe4c   :  { %3757 = vtanh.f32 %v2027_v2 }
 0xe55   :  { %v3756_v3 = vpop.eup %3755 }
 0xe56   :  { %v2019_v6 = vadd.f32 1.0, %v3756_v3 }
 0xe58   :  { %3759 = vrcp.f32 %v2019_v6 }
 0xe59   :  { %v3758_v7 = vpop.eup %3757 }
 0xe5a   :  { %v2029_v48 = vsub.f32 %v4513_v14, %v3758_v7 }
 0xe65   :  { %v3760_v49 = vpop.eup %3759 }
 0xe66   :  { %v2030_v10 = vmul.f32 %v3760_v49, %v2029_v48 }
 0xe68   :  { %v4584_v11 = vadd.f32 %v3758_v7, %v2030_v10  ;;  %v4669_v10 = vld [vmem:[#allocation14 + $0x18] sm:$0xff] }
 0xe6a   :  { %3549 = vmatmul.mubr.msk.f32.vlgmr.msra.gmra.mxu1 %vm306_vm2, %v4584_v11 }
 0xe6b   :  { %3563 = vmatpush3.msra.mxu1 %v4451_v17  ;;  %3570 = vmatprep.mubr.msk.f32.mxu1 %vm4010_vm1, %v4009_v15 }
 0xe6c   :  { %3564 = vmatprep.subr.mxu1 %v4009_v15 }
 0xe6d   :  { %3565 = vmatpush3.msra.mxu1 %v4457_v18 }
 0xe6e   :  { %3566 = vmatprep.subr.mxu1 %v4009_v15 }
 0xe6f   :  { %3567 = vmatpush3.msra.mxu1 %v4461_v44 }
 0xe70   :  { %3568 = vmatprep.subr.mxu1 %v4009_v15 }
 0xe71   :  { %3569 = vmatpush3.msra.mxu1 %v4465_v4 }
 0xe72   :  { %3571 = vmatmul.mubr.msk.f32.vlgmr.msra.gmra.mxu1 %vm306_vm2, %v4584_v11  ;;  %3584 = vmatprep.subr.mxu1 %v4009_v15 }
 0xe73   :  { %3585 = vmatpush3.msra.mxu1 %v4529_v16  ;;  %3592 = vmatprep.mubr.msk.f32.mxu1 %vm4010_vm1, %v4009_v15 }
 0xe74   :  { %3586 = vmatprep.subr.mxu1 %v4009_v15 }
 0xe75   :  { %3587 = vmatpush3.msra.mxu1 %v4535_v9 }
 0xe76   :  { %3588 = vmatprep.subr.mxu1 %v4009_v15 }
 0xe77   :  { %3589 = vmatpush3.msra.mxu1 %v4539_v46 }
 0xe78   :  { %3590 = vmatprep.subr.mxu1 %v4009_v15 }
 0xe79   :  { %3591 = vmatpush3.msra.mxu1 %v4543_v47 }
 0xe7a   :  { %3606 = vmatprep.subr.mxu1 %v4009_v15 }
 0xeb4   :  { %v2107_v14 = vpop.permute.xlu1 %2106 }
 0xeb5   :  { %3560 = vmatmul.mubr.msk.f32.vlgmr.msra.gmra.mxu0 %vm306_vm2, %v2107_v14  ;;  %v4679_v14 = vld [vmem:[#allocation14 + $0x8] sm:$0xff] }
 0xeb6   :  { %3574 = vmatpush3.msra.mxu0 %v4291_v12  ;;  %3581 = vmatprep.mubr.msk.f32.mxu0 %vm4010_vm1, %v4009_v15 }
 0xeb7   :  { %3575 = vmatprep.subr.mxu0 %v4009_v15 }
 0xeb8   :  { %3576 = vmatpush3.msra.mxu0 %v4293_v13 }
 0xeb9   :  { %3577 = vmatprep.subr.mxu0 %v4009_v15 }
 0xeba   :  { %3578 = vmatpush3.msra.mxu0 %v4305_v25 }
 0xebb   :  { %3579 = vmatprep.subr.mxu0 %v4009_v15 }
 0xebc   :  { %3580 = vmatpush3.msra.mxu0 %v4313_v29 }
 0xebd   :  { %3595 = vmatprep.subr.mxu0 %v4009_v15 }
 0xf2a   :  { %v2101_v20 = vpop.f32.mrf.mxu1 }
 0xf2b   :  { %v2102_v13 = vadd.f32 %v4369_v5, %v2101_v20  ;;  %v4683_v20 = vld [vmem:[#allocation14] sm:$0xff] }
 0xf2c   :  { %v3550_v21 = vpop.f32.mrf.mxu1 }
 0xf32   :  { %v2275_v12 = vpop.f32.mrf.mxu1 }
 0xf33   :  { %v2276_v38 = vadd.f32 %v4572_v51, %v2275_v12 }
 0xf34   :  { %v3572_v22 = vpop.f32.mrf.mxu1 }
 0xf35   :  { %v2280_v8 = vadd.f32 %v2279_v45, %v2276_v38 }
 0xf37   :  { %v3195_v42 = vmul.f32 -1.442695, %v2280_v8  ;;  %v2556_v8 = vld [vmem:[#allocation3 + $0x30] sm:$0xff] }
 0xf75   :  { %v2176_v23 = vpop.f32.mrf.mxu0 }
 0xf76   :  { %v2177_v24 = vadd.f32 %v4334_v35, %v2176_v23 }
 0xf77   :  { %v3561_v26 = vpop.f32.mrf.mxu0 }
 0xf78   :  { %2188 = vrot.lane.b32.xlu0 %v2177_v24, %s4011_s24  ;;  %v2180_v27 = vadd.f32 %v2177_v24, %v2102_v13  ;;  %v4690_v26 = vld [vmem:[%s4804_s10] ss:$0 sm:$0xff] }
 0xf7a   :  { %v3193_v25 = vmul.f32 -1.442695, %v2180_v27 }
 0xf7c   :  { %3761 = vpow2.f32 %v3193_v25 }
 0xf89   :  { %v3762_v28 = vpop.eup %3761 }
 0xf8a   :  { %v2184_v30 = vadd.f32 1.0, %v3762_v28 }
 0xf8c   :  { %3763 = vrcp.f32 %v2184_v30 }
 0xf99   :  { %v3764_v29 = vpop.eup %3763 }
 0xfea   :  { %v2189_v32 = vpop.permute.xlu0 %2188 }
 0xfeb   :  { %v2191_v33 = vmul.f32 %v3764_v29, %v2189_v32 }
 0xfed   :  { %2193 = vrot.lane.b32.xlu1 %v2191_v33, %s4011_s24 }
0x105f   :  { %v2194_v34 = vpop.permute.xlu1 %2193 }
0x1060   :  { %v2196_v36 = vadd.f32 %v2194_v34, %v2102_v13 }
0x1062   :  { %3765 = vtanh.f32 %v2196_v36 }
0x1063   :  { %3767 = vpow2.f32 %v3195_v42 }
0x106f   :  { %v3766_v35 = vpop.eup %3765 }
0x1070   :  { %v2198_v39 = vsub.f32 %v4579_v55, %v3766_v35 }
0x1072   :  { %2200 = vrot.lane.b32.xlu0 %v2198_v39, %s4012_s25 }
0x1076   :  { %697 = vrot.lane.b32.xlu0 %v4282_v58, %s4012_s25 }
0x107a   :  { %702 = vrot.lane.b32.xlu0 %v4282_v58, %s4011_s24  ;;  %v3768_v58 = vpop.eup %3767 }
0x107b   :  { %v2284_v59 = vadd.f32 1.0, %v3768_v58 }
0x107d   :  { %3769 = vrcp.f32 %v2284_v59 }
0x108a   :  { %v3770_v60 = vpop.eup %3769 }
0x10e4   :  { %v2201_v40 = vpop.permute.xlu0 %2200 }
0x10e5   :  { %v2203_v41 = vmul.f32 %v3764_v29, %v2201_v40 }
0x10e7   :  { %2205 = vrot.lane.b32.xlu1 %v2203_v41, %s4013_s29 }
0x10e8   :  { %v698_v43 = vpop.permute.xlu0 %697 }
0x10e9   :  { %701 = vst.msk [vmem:[#allocation4 + $0x28] sm:$0xff] %vm306_vm2, %v698_v43 }
0x10eb   :  { %2289 = vrot.lane.b32.xlu1 %v2276_v38, %s4012_s25 }
0x10ec   :  { %v703_v50 = vpop.permute.xlu0 %702 }
0x10ed   :  { %706 = vst.msk [vmem:[#allocation5 + $0x28] sm:$0xff] %vm306_vm2, %v703_v50 }
0x10ef   :  { %2300 = vrot.lane.b32.xlu1 %v2276_v38, %s4011_s24 }
0x10f0   :  { %v2287_v37 = vld [vmem:[#allocation4 + $0x28] sm:$0xff] }
0x10f4   :  { %v2299_v62 = vld [vmem:[#allocation5 + $0x28] sm:$0xff] }
0x1159   :  { %v2206_v52 = vpop.permute.xlu1 %2205 }
0x115a   :  { %v4637_v53 = vadd.f32 %v3766_v35, %v2206_v52 }
0x115c   :  { %2383 = vrot.lane.b32.xlu0 %v4637_v53, %s4011_s24 }
0x115d   :  { %v2290_v54 = vpop.permute.xlu1 %2289 }
0x115e   :  { %v2292_v55 = vadd.f32 %v2290_v54, %v2287_v37 }
0x1160   :  { %v3196_v56 = vmul.f32 -1.442695, %v2292_v55 }
0x1161   :  { %v2301_v57 = vpop.permute.xlu1 %2300 }
0x1162   :  { %3771 = vpow2.f32 %v3196_v56  ;;  %v2303_v61 = vmul.f32 %v3770_v60, %v2301_v57 }
0x1164   :  { %v2304_v63 = vadd.f32 %v2303_v61, %v2299_v62 }
0x1166   :  { %3773 = vtanh.f32 %v2304_v63 }
0x116f   :  { %v3772_v0 = vpop.eup %3771 }
0x1170   :  { %v2296_v1 = vadd.f32 1.0, %v3772_v0 }
0x1172   :  { %3775 = vrcp.f32 %v2296_v1 }
0x1173   :  { %v3774_v2 = vpop.eup %3773 }
0x1174   :  { %v2306_v3 = vsub.f32 %v4584_v11, %v3774_v2  ;;  %v4675_v11 = vld [vmem:[#allocation14 + $0x10] sm:$0xff] }
0x117f   :  { %v3776_v6 = vpop.eup %3775 }
0x1180   :  { %v2307_v7 = vmul.f32 %v3776_v6, %v2306_v3 }
0x1182   :  { %v4642_v48 = vadd.f32 %v3774_v2, %v2307_v7 }
0x1184   :  { %3582 = vmatmul.mubr.msk.f32.vlgmr.msra.gmra.mxu0 %vm306_vm2, %v4642_v48 }
0x1185   :  { %3596 = vmatpush3.msra.mxu0 %v4451_v17  ;;  %3603 = vmatprep.mubr.msk.f32.mxu0 %vm4010_vm1, %v4009_v15 }
0x1186   :  { %3597 = vmatprep.subr.mxu0 %v4009_v15 }
0x1187   :  { %3598 = vmatpush3.msra.mxu0 %v4457_v18 }
0x1188   :  { %3599 = vmatprep.subr.mxu0 %v4009_v15 }
0x1189   :  { %3600 = vmatpush3.msra.mxu0 %v4461_v44 }
0x118a   :  { %3601 = vmatprep.subr.mxu0 %v4009_v15 }
0x118b   :  { %3602 = vmatpush3.msra.mxu0 %v4465_v4 }
0x118c   :  { %3604 = vmatmul.mubr.msk.f32.vlgmr.msra.gmra.mxu0 %vm306_vm2, %v4642_v48  ;;  %3617 = vmatprep.subr.mxu0 %v4009_v15 }
0x118d   :  { %3618 = vmatpush3.msra.mxu0 %v4529_v16  ;;  %3625 = vmatprep.mubr.msk.f32.mxu0 %vm4010_vm1, %v4009_v15 }
0x118e   :  { %3619 = vmatprep.subr.mxu0 %v4009_v15 }
0x118f   :  { %3620 = vmatpush3.msra.mxu0 %v4535_v9 }
0x1190   :  { %3621 = vmatprep.subr.mxu0 %v4009_v15 }
0x1191   :  { %3622 = vmatpush3.msra.mxu0 %v4539_v46 }
0x1192   :  { %3623 = vmatprep.subr.mxu0 %v4009_v15 }
0x1193   :  { %3624 = vmatpush3.msra.mxu0 %v4543_v47 }
0x1194   :  { %3639 = vmatprep.subr.mxu0 %v4009_v15 }
0x11ce   :  { %v2384_v49 = vpop.permute.xlu0 %2383 }
0x11cf   :  { %3593 = vmatmul.mubr.msk.f32.vlgmr.msra.gmra.mxu1 %vm306_vm2, %v2384_v49 }
0x11d0   :  { %3607 = vmatpush3.msra.mxu1 %v4669_v10  ;;  %3614 = vmatprep.mubr.msk.f32.mxu1 %vm4010_vm1, %v4009_v15 }
0x11d1   :  { %3608 = vmatprep.subr.mxu1 %v4009_v15 }
0x11d2   :  { %3609 = vmatpush3.msra.mxu1 %v4675_v11 }
0x11d3   :  { %3610 = vmatprep.subr.mxu1 %v4009_v15 }
0x11d4   :  { %3611 = vmatpush3.msra.mxu1 %v4679_v14 }
0x11d5   :  { %3612 = vmatprep.subr.mxu1 %v4009_v15 }
0x11d6   :  { %3613 = vmatpush3.msra.mxu1 %v4683_v20 }
0x11d7   :  { %3628 = vmatprep.subr.mxu1 %v4009_v15 }
0x1244   :  { %v2378_v21 = vpop.f32.mrf.mxu0 }
0x1245   :  { %v2379_v25 = vadd.f32 %v4369_v5, %v2378_v21 }
0x1246   :  { %v3583_v12 = vpop.f32.mrf.mxu0 }
0x124c   :  { %v2552_v22 = vpop.f32.mrf.mxu0 }
0x124d   :  { %v2553_v50 = vadd.f32 %v4572_v51, %v2552_v22 }
0x124e   :  { %v3605_v23 = vpop.f32.mrf.mxu0 }
0x124f   :  { %v2557_v42 = vadd.f32 %v2556_v8, %v2553_v50 }
0x1251   :  { %v3201_v58 = vmul.f32 -1.442695, %v2557_v42 }
0x128f   :  { %v2453_v24 = vpop.f32.mrf.mxu1 }
0x1290   :  { %v2454_v13 = vadd.f32 %v4690_v26, %v2453_v24 }
0x1291   :  { %v3594_v27 = vpop.f32.mrf.mxu1 }
0x1292   :  { %2465 = vrot.lane.b32.xlu1 %v2454_v13, %s4011_s24  ;;  %v2457_v28 = vadd.f32 %v2454_v13, %v2379_v25 }
0x1294   :  { %v3199_v30 = vmul.f32 -1.442695, %v2457_v28 }
0x1296   :  { %3777 = vpow2.f32 %v3199_v30 }
0x12a3   :  { %v3778_v29 = vpop.eup %3777 }
0x12a4   :  { %v2461_v32 = vadd.f32 1.0, %v3778_v29 }
0x12a6   :  { %3779 = vrcp.f32 %v2461_v32 }
0x12b3   :  { %v3780_v33 = vpop.eup %3779 }
0x1304   :  { %v2466_v34 = vpop.permute.xlu1 %2465 }
0x1305   :  { %v2468_v36 = vmul.f32 %v3780_v33, %v2466_v34  ;;  %v2833_v34 = vld [vmem:[#allocation3 + $0x38] sm:$0xff] }
0x1307   :  { %2470 = vrot.lane.b32.xlu0 %v2468_v36, %s4011_s24 }
0x1379   :  { %v2471_v35 = vpop.permute.xlu0 %2470 }
0x137a   :  { %v2473_v39 = vadd.f32 %v2471_v35, %v2379_v25 }
0x137c   :  { %3781 = vtanh.f32 %v2473_v39 }
0x137d   :  { %3783 = vpow2.f32 %v3201_v58 }
0x1389   :  { %v3782_v40 = vpop.eup %3781 }
0x138a   :  { %v2475_v41 = vsub.f32 %v4637_v53, %v3782_v40 }
0x138c   :  { %2477 = vrot.lane.b32.xlu1 %v2475_v41, %s4012_s25 }
0x1390   :  { %740 = vrot.lane.b32.xlu1 %v4296_v19, %s4012_s25 }
0x1394   :  { %745 = vrot.lane.b32.xlu1 %v4296_v19, %s4011_s24  ;;  %v3784_v19 = vpop.eup %3783 }
0x1395   :  { %v2561_v59 = vadd.f32 1.0, %v3784_v19 }
0x1397   :  { %3785 = vrcp.f32 %v2561_v59 }
0x13a4   :  { %v3786_v60 = vpop.eup %3785 }
0x13fe   :  { %v2478_v5 = vpop.permute.xlu1 %2477 }
0x13ff   :  { %v2480_v43 = vmul.f32 %v3780_v33, %v2478_v5 }
0x1401   :  { %2482 = vrot.lane.b32.xlu0 %v2480_v43, %s4013_s29 }
0x1402   :  { %v741_v38 = vpop.permute.xlu1 %740 }
0x1403   :  { %744 = vst.msk [vmem:[#allocation4 + $0x30] sm:$0xff] %vm306_vm2, %v741_v38 }
0x1405   :  { %2566 = vrot.lane.b32.xlu0 %v2553_v50, %s4012_s25 }
0x1406   :  { %v746_v45 = vpop.permute.xlu1 %745 }
0x1407   :  { %749 = vst.msk [vmem:[#allocation5 + $0x30] sm:$0xff] %vm306_vm2, %v746_v45 }
0x1409   :  { %2577 = vrot.lane.b32.xlu0 %v2553_v50, %s4011_s24 }
0x140a   :  { %v2564_v54 = vld [vmem:[#allocation4 + $0x30] sm:$0xff] }
0x140e   :  { %v2576_v62 = vld [vmem:[#allocation5 + $0x30] sm:$0xff] }
0x1473   :  { %v2483_v52 = vpop.permute.xlu0 %2482 }
0x1474   :  { %v4708_v53 = vadd.f32 %v3782_v40, %v2483_v52 }
0x1476   :  { %2660 = vrot.lane.b32.xlu1 %v4708_v53, %s4011_s24 }
0x1477   :  { %v2567_v37 = vpop.permute.xlu0 %2566 }
0x1478   :  { %v2569_v55 = vadd.f32 %v2567_v37, %v2564_v54 }
0x147a   :  { %v3202_v56 = vmul.f32 -1.442695, %v2569_v55 }
0x147b   :  { %v2578_v57 = vpop.permute.xlu0 %2577 }
0x147c   :  { %3787 = vpow2.f32 %v3202_v56  ;;  %v2580_v61 = vmul.f32 %v3786_v60, %v2578_v57 }
0x147e   :  { %v2581_v63 = vadd.f32 %v2580_v61, %v2576_v62 }
0x1480   :  { %3789 = vtanh.f32 %v2581_v63 }
0x1489   :  { %v3788_v0 = vpop.eup %3787 }
0x148a   :  { %v2573_v1 = vadd.f32 1.0, %v3788_v0 }
0x148c   :  { %3791 = vrcp.f32 %v2573_v1 }
0x148d   :  { %v3790_v2 = vpop.eup %3789 }
0x148e   :  { %v2583_v3 = vsub.f32 %v4642_v48, %v3790_v2  ;;  %v4754_v48 = vld [vmem:[%s4803_s9] ss:$0 sm:$0xff] }
0x1499   :  { %v3792_v6 = vpop.eup %3791 }
0x149a   :  { %v2584_v7 = vmul.f32 %v3792_v6, %v2583_v3 }
0x149c   :  { %v4713_v49 = vadd.f32 %v3790_v2, %v2584_v7 }
0x149e   :  { %3615 = vmatmul.mubr.msk.f32.vlgmr.msra.gmra.mxu1 %vm306_vm2, %v4713_v49 }
0x149f   :  { %3629 = vmatpush3.msra.mxu1 %v4451_v17  ;;  %3636 = vmatprep.mubr.msk.f32.mxu1 %vm4010_vm1, %v4009_v15 }
0x14a0   :  { %3630 = vmatprep.subr.mxu1 %v4009_v15 }
0x14a1   :  { %3631 = vmatpush3.msra.mxu1 %v4457_v18 }
0x14a2   :  { %3632 = vmatprep.subr.mxu1 %v4009_v15 }
0x14a3   :  { %3633 = vmatpush3.msra.mxu1 %v4461_v44 }
0x14a4   :  { %3634 = vmatprep.subr.mxu1 %v4009_v15 }
0x14a5   :  { %3635 = vmatpush3.msra.mxu1 %v4465_v4 }
0x14a6   :  { %3637 = vmatmul.mubr.msk.f32.vlgmr.msra.gmra.mxu1 %vm306_vm2, %v4713_v49  ;;  %3650 = vmatprep.subr.mxu1 %v4009_v15 }
0x14a7   :  { %3651 = vmatpush3.msra.mxu1 %v4529_v16  ;;  %3658 = vmatprep.mubr.msk.f32.mxu1 %vm4010_vm1, %v4009_v15 }
0x14a8   :  { %3652 = vmatprep.subr.mxu1 %v4009_v15 }
0x14a9   :  { %3653 = vmatpush3.msra.mxu1 %v4535_v9 }
0x14aa   :  { %3654 = vmatprep.subr.mxu1 %v4009_v15 }
0x14ab   :  { %3655 = vmatpush3.msra.mxu1 %v4539_v46 }
0x14ac   :  { %3656 = vmatprep.subr.mxu1 %v4009_v15 }
0x14ad   :  { %3657 = vmatpush3.msra.mxu1 %v4543_v47 }
0x14e8   :  { %v2661_v17 = vpop.permute.xlu1 %2660 }
0x14e9   :  { %3626 = vmatmul.mubr.msk.f32.vlgmr.msra.gmra.mxu0 %vm306_vm2, %v2661_v17 }
0x14ea   :  { %3640 = vmatpush3.msra.mxu0 %v4669_v10  ;;  %3647 = vmatprep.mubr.msk.f32.mxu0 %vm4010_vm1, %v4009_v15 }
0x14eb   :  { %3641 = vmatprep.subr.mxu0 %v4009_v15 }
0x14ec   :  { %3642 = vmatpush3.msra.mxu0 %v4675_v11 }
0x14ed   :  { %3643 = vmatprep.subr.mxu0 %v4009_v15 }
0x14ee   :  { %3644 = vmatpush3.msra.mxu0 %v4679_v14 }
0x14ef   :  { %3645 = vmatprep.subr.mxu0 %v4009_v15 }
0x14f0   :  { %3646 = vmatpush3.msra.mxu0 %v4683_v20 }
0x14f1   :  { %3661 = vmatprep.subr.mxu0 %v4009_v15 }
0x155e   :  { %v2655_v18 = vpop.f32.mrf.mxu1 }
0x155f   :  { %v2656_v10 = vadd.f32 %v4754_v48, %v2655_v18 }
0x1560   :  { %v3616_v44 = vpop.f32.mrf.mxu1 }
0x1566   :  { %v2829_v4 = vpop.f32.mrf.mxu1 }
0x1567   :  { %v2830_v32 = vadd.f32 %v4572_v51, %v2829_v4 }
0x1568   :  { %v3638_v16 = vpop.f32.mrf.mxu1 }
0x1569   :  { %v2834_v36 = vadd.f32 %v2833_v34, %v2830_v32  ;;  %v3043_v16 = vld [vmem:[#allocation17 + $0x18] sm:$0xff] }
0x156b   :  { %v3207_v35 = vmul.f32 -1.442695, %v2834_v36 }
0x15a9   :  { %v2730_v9 = vpop.f32.mrf.mxu0 }
0x15aa   :  { %v2731_v46 = vadd.f32 %v4690_v26, %v2730_v9  ;;  %v3042_v9 = vld [vmem:[#allocation17 + $0x10] sm:$0xff] }
0x15ab   :  { %v3627_v47 = vpop.f32.mrf.mxu0 }
0x15ac   :  { %2742 = vrot.lane.b32.xlu0 %v2731_v46, %s4011_s24  ;;  %v2734_v11 = vadd.f32 %v2731_v46, %v2656_v10  ;;  %v3041_v46 = vld [vmem:[#allocation17 + $0x8] sm:$0xff]  ;;  %v3040_v47 = vld [vmem:[#allocation17] sm:$0xff] }
0x15ae   :  { %v3205_v14 = vmul.f32 -1.442695, %v2734_v11 }
0x15b0   :  { %3793 = vpow2.f32 %v3205_v14 }
0x15bd   :  { %v3794_v20 = vpop.eup %3793 }
0x15be   :  { %v2738_v21 = vadd.f32 1.0, %v3794_v20 }
0x15c0   :  { %3795 = vrcp.f32 %v2738_v21  ;;  %v3212_v21 = vld [vmem:[%s4806_s12] ss:$0 sm:$0xff] }
0x15cd   :  { %v3796_v12 = vpop.eup %3795 }
0x161e   :  { %v2743_v22 = vpop.permute.xlu0 %2742 }
0x161f   :  { %v2745_v23 = vmul.f32 %v3796_v12, %v2743_v22 }
0x1621   :  { %2747 = vrot.lane.b32.xlu1 %v2745_v23, %s4011_s24 }
0x1693   :  { %v2748_v24 = vpop.permute.xlu1 %2747 }
0x1694   :  { %v2750_v13 = vadd.f32 %v2748_v24, %v2656_v10 }
0x1696   :  { %3797 = vtanh.f32 %v2750_v13 }
0x1697   :  { %3799 = vpow2.f32 %v3207_v35 }
0x16a3   :  { %v3798_v27 = vpop.eup %3797 }
0x16a4   :  { %v2752_v25 = vsub.f32 %v4708_v53, %v3798_v27 }
0x16a6   :  { %2754 = vrot.lane.b32.xlu0 %v2752_v25, %s4012_s25 }
0x16aa   :  { %783 = vrot.lane.b32.xlu0 %v4320_v31, %s4012_s25 }
0x16ae   :  { %788 = vrot.lane.b32.xlu0 %v4320_v31, %s4011_s24  ;;  %v3800_v31 = vpop.eup %3799 }
0x16af   :  { %v2838_v39 = vadd.f32 1.0, %v3800_v31 }
0x16b1   :  { %3801 = vrcp.f32 %v2838_v39 }
0x16be   :  { %v3802_v45 = vpop.eup %3801 }
0x1718   :  { %v2755_v28 = vpop.permute.xlu0 %2754 }
0x1719   :  { %v2757_v30 = vmul.f32 %v3796_v12, %v2755_v28 }
0x171b   :  { %2759 = vrot.lane.b32.xlu1 %v2757_v30, %s4013_s29 }
0x171c   :  { %v784_v29 = vpop.permute.xlu0 %783 }
0x171d   :  { %787 = vst.msk [vmem:[#allocation4 + $0x38] sm:$0xff] %vm306_vm2, %v784_v29 }
0x171f   :  { %2843 = vrot.lane.b32.xlu1 %v2830_v32, %s4012_s25 }
0x1720   :  { %v789_v33 = vpop.permute.xlu0 %788 }
0x1721   :  { %792 = vst.msk [vmem:[#allocation5 + $0x38] sm:$0xff] %vm306_vm2, %v789_v33 }
0x1723   :  { %2854 = vrot.lane.b32.xlu1 %v2830_v32, %s4011_s24 }
0x1724   :  { %v2841_v51 = vld [vmem:[#allocation4 + $0x38] sm:$0xff] }
0x1728   :  { %v2853_v42 = vld [vmem:[#allocation5 + $0x38] sm:$0xff] }
0x178d   :  { %v2760_v40 = vpop.permute.xlu1 %2759 }
0x178e   :  { %v2762_v41 = vadd.f32 %v3798_v27, %v2760_v40 }
0x1790   :  { %2937 = vrot.lane.b32.xlu0 %v2762_v41, %s4011_s24 }
0x1791   :  { %v2844_v5 = vpop.permute.xlu1 %2843 }
0x1792   :  { %v2846_v43 = vadd.f32 %v2844_v5, %v2841_v51 }
0x1794   :  { %v3208_v38 = vmul.f32 -1.442695, %v2846_v43 }
0x1795   :  { %v2855_v50 = vpop.permute.xlu1 %2854 }
0x1796   :  { %3803 = vpow2.f32 %v3208_v38  ;;  %v2857_v8 = vmul.f32 %v3802_v45, %v2855_v50 }
0x1798   :  { %v2858_v58 = vadd.f32 %v2857_v8, %v2853_v42 }
0x179a   :  { %3805 = vtanh.f32 %v2858_v58 }
0x17a3   :  { %v3804_v19 = vpop.eup %3803 }
0x17a4   :  { %v2850_v59 = vadd.f32 1.0, %v3804_v19 }
0x17a6   :  { %3807 = vrcp.f32 %v2850_v59 }
0x17a7   :  { %v3806_v52 = vpop.eup %3805 }
0x17a8   :  { %v2860_v53 = vsub.f32 %v4713_v49, %v3806_v52 }
0x17b3   :  { %v3808_v37 = vpop.eup %3807 }
0x17b4   :  { %v2861_v54 = vmul.f32 %v3808_v37, %v2860_v53 }
0x17b6   :  { %v2862_v55 = vadd.f32 %v3806_v52, %v2861_v54 }
0x17b8   :  { %3648 = vmatmul.mubr.msk.f32.vlgmr.msra.gmra.mxu0 %vm306_vm2, %v2862_v55 }
0x17b9   :  { %3669 = vmatprep.mubr.msk.f32.mxu0 %vm4010_vm1, %v4009_v15  ;;  %3662 = vmatpush3.msra.mxu0 %v3043_v16 }
0x17ba   :  { %3663 = vmatprep.subr.mxu0 %v4009_v15 }
0x17bb   :  { %3664 = vmatpush3.msra.mxu0 %v3042_v9 }
0x17bc   :  { %3665 = vmatprep.subr.mxu0 %v4009_v15 }
0x17bd   :  { %3666 = vmatpush3.msra.mxu0 %v3041_v46 }
0x17be   :  { %3667 = vmatprep.subr.mxu0 %v4009_v15 }
0x17bf   :  { %3668 = vmatpush3.msra.mxu0 %v3040_v47 }
0x1802   :  { %v2938_v56 = vpop.permute.xlu0 %2937 }
0x1803   :  { %3659 = vmatmul.mubr.msk.f32.vlgmr.msra.gmra.mxu1 %vm306_vm2, %v2938_v56 }
0x1878   :  { %v2932_v57 = vpop.f32.mrf.mxu0 }
0x1879   :  { %v2933_v0 = vadd.f32 %v4754_v48, %v2932_v57 }
0x187a   :  { %v3649_v60 = vpop.f32.mrf.mxu0 }
0x18c3   :  { %v3007_v61 = vpop.f32.mrf.mxu1 }
0x18c4   :  { %v3008_v62 = vadd.f32 %v4690_v26, %v3007_v61 }
0x18c5   :  { %v3660_v63 = vpop.f32.mrf.mxu1 }
0x18c6   :  { %3019 = vrot.lane.b32.xlu1 %v3008_v62, %s4011_s24  ;;  %v3011_v1 = vadd.f32 %v3008_v62, %v2933_v0 }
0x18c8   :  { %v3211_v2 = vmul.f32 -1.442695, %v3011_v1 }
0x18ca   :  { %3809 = vpow2.f32 %v3211_v2 }
0x18d7   :  { %v3810_v3 = vpop.eup %3809 }
0x18d8   :  { %v3015_v6 = vadd.f32 1.0, %v3810_v3 }
0x18da   :  { %3811 = vrcp.f32 %v3015_v6 }
0x18e7   :  { %v3812_v7 = vpop.eup %3811 }
0x1938   :  { %v3020_v49 = vpop.permute.xlu1 %3019 }
0x1939   :  { %v3022_v17 = vmul.f32 %v3812_v7, %v3020_v49 }
0x193b   :  { %3024 = vrot.lane.b32.xlu0 %v3022_v17, %s4011_s24 }
0x19ad   :  { %v3025_v18 = vpop.permute.xlu0 %3024 }
0x19ae   :  { %v3027_v44 = vadd.f32 %v3025_v18, %v2933_v0 }
0x19b0   :  { %3813 = vtanh.f32 %v3027_v44 }
0x19bd   :  { %v3814_v26 = vpop.eup %3813 }
0x19be   :  { %v3029_v4 = vsub.f32 %v2762_v41, %v3814_v26 }
0x19c0   :  { %3031 = vrot.lane.b32.xlu1 %v3029_v4, %s4012_s25 }
0x1a32   :  { %v3032_v48 = vpop.permute.xlu1 %3031 }
0x1a33   :  { %v3034_v10 = vmul.f32 %v3812_v7, %v3032_v48 }
0x1a35   :  { %3036 = vrot.lane.b32.xlu0 %v3034_v10, %s4013_s29 }
0x1aa7   :  { %v3037_v11 = vpop.permute.xlu0 %3036 }
0x1aa8   :  { %v3039_v14 = vadd.f32 %v3814_v26, %v3037_v11 }
0x1aaa   :  { %3052 = vrot.lane.b32.xlu1 %v3039_v14, %s4011_s24 }
0x1b1c   :  { %v3053_v20 = vpop.permute.xlu1 %3052 }
0x1b1d   :  { %3670 = vmatmul.mubr.msk.f32.vlgmr.msra.gmra.mxu0 %vm306_vm2, %v3053_v20 }
0x1bdd   :  { %v3122_v12 = vpop.f32.mrf.mxu0 }
0x1bde   :  { %v3123_v15 = vadd.f32 %v3212_v21, %v3122_v12 }
0x1bdf   :  { %v3671_v22 = vpop.f32.mrf.mxu0 }
0x1be0   :  { %3126 = vst.msk [vmem:[#allocation18] sm:$0xff] %vm306_vm2, %v3123_v15 }
0x1be1   :  { %3981 = shalt.err (!%p3978_p11)
}
0x1be2   :  { %3136 = dma.vmem_to_hbm [thread:$0]  %s3134_s19, 128, %s4807_s13, [#allocation8]  }
0x1be3   :  { %3998 = dma.done.wait [#allocation8], 128  }
0x1be4   :  { %3999 = vsyncadd [#allocation8], 4294967168 }
0x1be5   :  { %3140 = vsyncpa [#allocation7], 1 }
0x1be6   :  { %3141 = vsyncpa [#allocation10], 1 }
0x1be7   :  { %3142 = vsyncpa [#allocation13], 1 }
0x1be8   :  { %3143 = vsyncpa [#allocation16], 1 }
0x1be9   :  { %3144 = vsyncpa [#allocation8], 1 }

</bundles_post_ra>
